<compile_context>
chip_gen: v7x
topology: tpu7x:2x2x1
jax: 0.10.0
libtpu: 0.0.40
codegen_flags: <defaults>
</compile_context>

<pallas_src>
from functools import partial

import numpy as np
import jax
import jax.numpy as jnp
from jax.experimental import pallas as pl
from jax.experimental.pallas import tpu as pltpu

EPS = 1e-5
MAX_STATIC_UNROLL = 32   # fully unroll the recurrence when S <= this


# ----------------------------------------------------------------------------
# Fused Pallas kernel: all blocks + post-norm, one batch tile per grid step
# ----------------------------------------------------------------------------
def xlstm_stack_kernel(x_ref, w_ih_ref, w_hh_ref, b_ref, wg_ref, bg_ref,
                       lnw_ref, lnb_ref, postw_ref, postb_ref,
                       o_ref,
                       xbuf, zx_scr, hs_scr, h_scr, c_scr,
                       *, seq_len: int, apply_post_norm: bool):
    R, D = x_ref.shape            # R = seq_len * batch_tile (time-major rows)
    S = seq_len
    bb = R // S                   # batch rows per tile
    H = D
    NB = w_ih_ref.shape[0]        # number of xLSTM blocks (static)

    def layer_norm(y, w, b):
        mean = jnp.mean(y, axis=-1, keepdims=True)
        var = jnp.mean((y - mean) ** 2, axis=-1, keepdims=True)
        return (y - mean) * jax.lax.rsqrt(var + EPS) * w + b

    def lstm_step(t, w_hh_t):
        # rows [t*bb, (t+1)*bb) hold all batch elements of timestep t
        rows = pl.ds(t * bb, bb)
        h = h_scr[...]
        c = c_scr[...]
        # only the recurrent half of the matmul lives in the serial loop
        z = zx_scr[rows, :] + jnp.dot(h, w_hh_t,
                                      preferred_element_type=jnp.float32)
        i_g = jax.nn.sigmoid(z[:, 0 * H:1 * H])
        f_g = jax.nn.sigmoid(z[:, 1 * H:2 * H])
        g_g = jnp.tanh(z[:, 2 * H:3 * H])
        o_g = jax.nn.sigmoid(z[:, 3 * H:4 * H])
        c_new = f_g * c + i_g * g_g
        h_new = o_g * jnp.tanh(c_new)
        h_scr[...] = h_new
        c_scr[...] = c_new
        hs_scr[rows, :] = h_new

    # activations stay resident in VMEM across all blocks
    xbuf[...] = x_ref[...]

    for blk in range(NB):                              # static block loop
        w_ih_t = w_ih_ref[blk]                         # [D, 4H]
        w_hh_t = w_hh_ref[blk]                         # [H, 4H]
        bias = b_ref[blk]                              # [1, 4H]

        x_all = xbuf[...]                              # [R, D]

        # (1) hoisted, non-recurrent input projection: one big MXU matmul
        zx_scr[...] = jnp.dot(x_all, w_ih_t,
                              preferred_element_type=jnp.float32) + bias

        # zero initial hidden / cell state (PyTorch default)
        h_scr[...] = jnp.zeros_like(h_scr)
        c_scr[...] = jnp.zeros_like(c_scr)

        # (2) serial recurrence over time
        if S <= MAX_STATIC_UNROLL:
            for t in range(S):                         # fully unrolled (LLO visibility)
                lstm_step(t, w_hh_t)
        else:
            @pl.loop(0, S)
            def _(t, w_hh_t=w_hh_t):
                lstm_step(t, w_hh_t)

        # (3) batched epilogue: gate matmul + residual + LayerNorm, all timesteps at once
        hs = hs_scr[...]                               # [R, D]
        gate = jax.nn.sigmoid(
            jnp.dot(hs, wg_ref[blk], preferred_element_type=jnp.float32)
            + bg_ref[blk])
        y = x_all + gate * hs
        xbuf[...] = layer_norm(y, lnw_ref[blk], lnb_ref[blk])

    out = xbuf[...]
    if apply_post_norm:
        out = layer_norm(out, postw_ref[...], postb_ref[...])
    o_ref[...] = out                                   # single lane-dense bulk store


# ----------------------------------------------------------------------------
# Wrapper
# ----------------------------------------------------------------------------
def xlstm_block_stack(x, params, post_w, post_b, *, add_post_blocks_norm=True,
                      block_b=None, interpret=False):
    """x: [B, S, D] float32. params: dict of stacked per-block weights."""
    B, S, D = x.shape
    NB = params["w_ih_t"].shape[0]

    if block_b is None:
        block_b = B
    assert B % block_b == 0, "block_b must divide batch"
    n_tiles = B // block_b
    R = S * block_b

    # [B,S,D] -> [n_tiles, S*bb, D]; within a tile, row = t*bb + b (time-major)
    xt = (x.reshape(n_tiles, block_b, S, D)
            .transpose(0, 2, 1, 3)
            .reshape(n_tiles, R, D))

    def full_spec(a):
        return pl.BlockSpec(a.shape, lambda i, _nd=a.ndim: (0,) * _nd)

    kernel = partial(xlstm_stack_kernel, seq_len=S,
                     apply_post_norm=add_post_blocks_norm)

    # explicit VMEM budget (portable to v7x's 64 MiB): operands + scratch, 2x headroom
    f32 = 4
    weight_elems = NB * (2 * D * 4 * D + 4 * D + D * D + 3 * D) + 2 * D
    scratch_elems = R * D + R * 4 * D + R * D + 2 * block_b * D
    footprint = f32 * (2 * R * D + weight_elems + scratch_elems)
    vmem_limit = int(min(max(2 * footprint, 8 * 2 ** 20), 64 * 2 ** 20))

    out = pl.pallas_call(
        kernel,
        out_shape=jax.ShapeDtypeStruct((n_tiles, R, D), jnp.float32),
        grid=(n_tiles,),
        in_specs=[
            pl.BlockSpec((pl.Squeezed(), R, D), lambda i: (i, 0, 0)),   # x tile
            full_spec(params["w_ih_t"]), full_spec(params["w_hh_t"]),
            full_spec(params["b"]),
            full_spec(params["wg_t"]), full_spec(params["bg"]),
            full_spec(params["ln_w"]), full_spec(params["ln_b"]),
            full_spec(post_w), full_spec(post_b),
        ],
        out_specs=pl.BlockSpec((pl.Squeezed(), R, D), lambda i: (i, 0, 0)),
        scratch_shapes=[
            pltpu.VMEM((R, D), jnp.float32),          # xbuf: resident activations
            pltpu.VMEM((R, 4 * D), jnp.float32),      # zx:   precomputed x @ W_ih + b
            pltpu.VMEM((R, D), jnp.float32),          # hs:   per-step hidden states
            pltpu.VMEM((block_b, D), jnp.float32),    # h
            pltpu.VMEM((block_b, D), jnp.float32),    # c
        ],
        compiler_params=pltpu.CompilerParams(
            dimension_semantics=("parallel",),        # batch tiles are independent
            vmem_limit_bytes=vmem_limit),
        interpret=interpret,
    )(xt, params["w_ih_t"], params["w_hh_t"], params["b"],
      params["wg_t"], params["bg"], params["ln_w"], params["ln_b"],
      post_w, post_b)

    # [n_tiles, S*bb, D] -> [B, S, D]
    return (out.reshape(n_tiles, S, block_b, D)
               .transpose(0, 2, 1, 3)
               .reshape(B, S, D))


# ----------------------------------------------------------------------------
# Deterministic parameter init (stacked per-block weights, PyTorch shapes)
# ----------------------------------------------------------------------------
def init_params(key, num_blocks, D):
    scale = 1.0 / np.sqrt(D)
    w_ih_t, w_hh_t, b, wg_t, bg = [], [], [], [], []
    for _ in range(num_blocks):
        key, k0, k1, k2, k3, k4, k5 = jax.random.split(key, 7)
        w_ih = jax.random.uniform(k0, (4 * D, D), jnp.float32, -scale, scale)
        w_hh = jax.random.uniform(k1, (4 * D, D), jnp.float32, -scale, scale)
        b_ih = jax.random.uniform(k2, (4 * D,), jnp.float32, -scale, scale)
        b_hh = jax.random.uniform(k3, (4 * D,), jnp.float32, -scale, scale)
        wg = jax.random.uniform(k4, (D, D), jnp.float32, -scale, scale)
        bg_v = jax.random.uniform(k5, (D,), jnp.float32, -scale, scale)
        w_ih_t.append(w_ih.T)                          # [D, 4D]
        w_hh_t.append(w_hh.T)                          # [D, 4D]
        b.append((b_ih + b_hh)[None, :])               # [1, 4D]
        wg_t.append(wg.T)                              # [D, D]
        bg.append(bg_v[None, :])                       # [1, D]
    params = dict(
        w_ih_t=jnp.stack(w_ih_t),                      # [NB, D, 4D]
        w_hh_t=jnp.stack(w_hh_t),                      # [NB, D, 4D]
        b=jnp.stack(b),                                # [NB, 1, 4D]
        wg_t=jnp.stack(wg_t),                          # [NB, D, D]
        bg=jnp.stack(bg),                              # [NB, 1, D]
        ln_w=jnp.ones((num_blocks, 1, D), jnp.float32),
        ln_b=jnp.zeros((num_blocks, 1, D), jnp.float32),
    )
    post_w = jnp.ones((1, D), jnp.float32)
    post_b = jnp.zeros((1, D), jnp.float32)
    return params, post_w, post_b


# ----------------------------------------------------------------------------
# Pure-JAX reference (exact PyTorch semantics) for verification
# ----------------------------------------------------------------------------
def ref_forward(x, p, post_w, post_b, add_post_blocks_norm=True):
    def layernorm(y, w, b):
        mean = jnp.mean(y, axis=-1, keepdims=True)
        var = jnp.mean((y - mean) ** 2, axis=-1, keepdims=True)
        return (y - mean) * jax.lax.rsqrt(var + EPS) * w + b

    NB = p["w_ih_t"].shape[0]
    B, S, D = x.shape
    for blk in range(NB):
        h0 = jnp.zeros((B, D), jnp.float32)
        c0 = jnp.zeros((B, D), jnp.float32)

        def step(carry, x_t, blk=blk):
            h, c = carry
            z = x_t @ p["w_ih_t"][blk] + h @ p["w_hh_t"][blk] + p["b"][blk, 0]
            i = jax.nn.sigmoid(z[:, 0 * D:1 * D])
            f = jax.nn.sigmoid(z[:, 1 * D:2 * D])
            g = jnp.tanh(z[:, 2 * D:3 * D])
            o = jax.nn.sigmoid(z[:, 3 * D:4 * D])
            c_new = f * c + i * g
            h_new = o * jnp.tanh(c_new)
            return (h_new, c_new), h_new

        _, hs = jax.lax.scan(step, (h0, c0), jnp.swapaxes(x, 0, 1))
        lstm_out = jnp.swapaxes(hs, 0, 1)              # [B, S, D]
        gate = jax.nn.sigmoid(lstm_out @ p["wg_t"][blk] + p["bg"][blk, 0])
        x = layernorm(x + gate * lstm_out, p["ln_w"][blk, 0], p["ln_b"][blk, 0])

    if add_post_blocks_norm:
        x = layernorm(x, post_w[0], post_b[0])
    return x


# ----------------------------------------------------------------------------
if __name__ == "__main__":
    # config: embedding_dim=32, num_blocks=2, add_post_blocks_norm=True
    B, S, D = 2, 8, 32
    NUM_BLOCKS = 2

    key = jax.random.PRNGKey(0)
    kx, kp = jax.random.split(key)
    x = jax.random.normal(kx, (B, S, D), jnp.float32)
    params, post_w, post_b = init_params(kp, NUM_BLOCKS, D)

    # block_b=1 -> grid=(2,) of independent batch tiles ("parallel", uses both
    # TensorCores on v7x; harmless sequential iterations on v5e/v6e).
    out = xlstm_block_stack(x, params, post_w, post_b, block_b=1)
    out = jax.block_until_ready(out)

    ref = jax.block_until_ready(ref_forward(x, params, post_w, post_b))
    assert out.shape == (B, S, D)
    np.testing.assert_allclose(np.asarray(out), np.asarray(ref),
                               rtol=1e-4, atol=1e-4)
    print("KERNEL_OK")
</pallas_src>

<mosaic_0001>
module attributes {stable_mosaic.version = 11 : i64} {
  func.func @xlstm_stack_kernel(%arg0: i32, %arg1: memref<1x8x32xf32, #tpu.memory_space<vmem>>, %arg2: memref<2x32x128xf32, #tpu.memory_space<vmem>>, %arg3: memref<2x32x128xf32, #tpu.memory_space<vmem>>, %arg4: memref<2x1x128xf32, #tpu.memory_space<vmem>>, %arg5: memref<2x32x32xf32, #tpu.memory_space<vmem>>, %arg6: memref<2x1x32xf32, #tpu.memory_space<vmem>>, %arg7: memref<2x1x32xf32, #tpu.memory_space<vmem>>, %arg8: memref<2x1x32xf32, #tpu.memory_space<vmem>>, %arg9: memref<1x32xf32, #tpu.memory_space<vmem>>, %arg10: memref<1x32xf32, #tpu.memory_space<vmem>>, %arg11: memref<1x8x32xf32, #tpu.memory_space<vmem>>, %arg12: memref<8x32xf32, #tpu.memory_space<vmem>>, %arg13: memref<8x128xf32, #tpu.memory_space<vmem>>, %arg14: memref<8x32xf32, #tpu.memory_space<vmem>>, %arg15: memref<1x32xf32, #tpu.memory_space<vmem>>, %arg16: memref<1x32xf32, #tpu.memory_space<vmem>>) attributes {dimension_semantics = [#tpu.dimension_semantics<parallel>], iteration_bounds = array<i64: 2>, scalar_prefetch = 0 : i64, scratch_operands = 5 : i64, tpu.core_type = #tpu.core_type<tc>, window_params = [{transform_indices = @transform_0, window_bounds = array<i64: 1, 8, 32>}, {pipeline_mode = #tpu.pipeline_mode<synchronous>, transform_indices = @transform_1, window_bounds = array<i64: 2, 32, 128>}, {pipeline_mode = #tpu.pipeline_mode<synchronous>, transform_indices = @transform_2, window_bounds = array<i64: 2, 32, 128>}, {pipeline_mode = #tpu.pipeline_mode<synchronous>, transform_indices = @transform_3, window_bounds = array<i64: 2, 1, 128>}, {pipeline_mode = #tpu.pipeline_mode<synchronous>, transform_indices = @transform_4, window_bounds = array<i64: 2, 32, 32>}, {pipeline_mode = #tpu.pipeline_mode<synchronous>, transform_indices = @transform_5, window_bounds = array<i64: 2, 1, 32>}, {pipeline_mode = #tpu.pipeline_mode<synchronous>, transform_indices = @transform_6, window_bounds = array<i64: 2, 1, 32>}, {pipeline_mode = #tpu.pipeline_mode<synchronous>, transform_indices = @transform_7, window_bounds = array<i64: 2, 1, 32>}, {pipeline_mode = #tpu.pipeline_mode<synchronous>, transform_indices = @transform_8, window_bounds = array<i64: 1, 32>}, {pipeline_mode = #tpu.pipeline_mode<synchronous>, transform_indices = @transform_9, window_bounds = array<i64: 1, 32>}, {transform_indices = @transform_10, window_bounds = array<i64: 1, 8, 32>}]} {
    %c0 = arith.constant 0 : index
    %c0_0 = arith.constant 0 : index
    %c0_1 = arith.constant 0 : index
    %0 = vector.load %arg1[%c0, %c0_0, %c0_1] : memref<1x8x32xf32, #tpu.memory_space<vmem>>, vector<1x8x32xf32>
    %1 = vector.shape_cast %0 : vector<1x8x32xf32> to vector<8x32xf32>
    %c0_2 = arith.constant 0 : index
    %c0_3 = arith.constant 0 : index
    %2 = vector.load %arg12[%c0_2, %c0_3] : memref<8x32xf32, #tpu.memory_space<vmem>>, vector<8x32xf32>
    tpu.vector_store %arg12[%c0_2, %c0_3], %1 {strides = array<i32>} : memref<8x32xf32, #tpu.memory_space<vmem>>, vector<8x32xf32>,
    %c0_4 = arith.constant 0 : index
    %c0_5 = arith.constant 0 : index
    %c0_6 = arith.constant 0 : index
    %3 = vector.load %arg2[%c0_4, %c0_5, %c0_6] : memref<2x32x128xf32, #tpu.memory_space<vmem>>, vector<1x32x128xf32>
    %4 = vector.shape_cast %3 : vector<1x32x128xf32> to vector<32x128xf32>
    %c0_7 = arith.constant 0 : index
    %c0_8 = arith.constant 0 : index
    %c0_9 = arith.constant 0 : index
    %5 = vector.load %arg3[%c0_7, %c0_8, %c0_9] : memref<2x32x128xf32, #tpu.memory_space<vmem>>, vector<1x32x128xf32>
    %6 = vector.shape_cast %5 : vector<1x32x128xf32> to vector<32x128xf32>
    %c0_10 = arith.constant 0 : index
    %c0_11 = arith.constant 0 : index
    %c0_12 = arith.constant 0 : index
    %7 = vector.load %arg4[%c0_10, %c0_11, %c0_12] : memref<2x1x128xf32, #tpu.memory_space<vmem>>, vector<1x1x128xf32>
    %8 = vector.shape_cast %7 : vector<1x1x128xf32> to vector<1x128xf32>
    %c0_13 = arith.constant 0 : index
    %c0_14 = arith.constant 0 : index
    %9 = vector.load %arg12[%c0_13, %c0_14] : memref<8x32xf32, #tpu.memory_space<vmem>>, vector<8x32xf32>
    %cst = arith.constant dense<0.000000e+00> : vector<8x128xf32>
    %10 = tpu.matmul %9, %4, %cst {dimension_numbers = #tpu.dot_dimension_numbers<[1], [0], [0], [1], [0, 0, 1, 1], [], []>} : vector<8x32xf32>, vector<32x128xf32>, vector<8x128xf32> -> vector<8x128xf32>
    %11 = vector.broadcast %8 : vector<1x128xf32> to vector<8x128xf32>
    %12 = arith.addf %10, %11 : vector<8x128xf32>
    %c0_15 = arith.constant 0 : index
    %c0_16 = arith.constant 0 : index
    %13 = vector.load %arg13[%c0_15, %c0_16] : memref<8x128xf32, #tpu.memory_space<vmem>>, vector<8x128xf32>
    tpu.vector_store %arg13[%c0_15, %c0_16], %12 {strides = array<i32>} : memref<8x128xf32, #tpu.memory_space<vmem>>, vector<8x128xf32>,
    %cst_17 = arith.constant 0.000000e+00 : f32
    %14 = vector.broadcast %cst_17 : f32 to vector<1x32xf32>
    %c0_18 = arith.constant 0 : index
    %c0_19 = arith.constant 0 : index
    %15 = vector.load %arg15[%c0_18, %c0_19] : memref<1x32xf32, #tpu.memory_space<vmem>>, vector<1x32xf32>
    tpu.vector_store %arg15[%c0_18, %c0_19], %14 {strides = array<i32>} : memref<1x32xf32, #tpu.memory_space<vmem>>, vector<1x32xf32>,
    %cst_20 = arith.constant 0.000000e+00 : f32
    %16 = vector.broadcast %cst_20 : f32 to vector<1x32xf32>
    %c0_21 = arith.constant 0 : index
    %c0_22 = arith.constant 0 : index
    %17 = vector.load %arg16[%c0_21, %c0_22] : memref<1x32xf32, #tpu.memory_space<vmem>>, vector<1x32xf32>
    tpu.vector_store %arg16[%c0_21, %c0_22], %16 {strides = array<i32>} : memref<1x32xf32, #tpu.memory_space<vmem>>, vector<1x32xf32>,
    %c0_23 = arith.constant 0 : index
    %c0_24 = arith.constant 0 : index
    %18 = vector.load %arg15[%c0_23, %c0_24] : memref<1x32xf32, #tpu.memory_space<vmem>>, vector<1x32xf32>
    %c0_25 = arith.constant 0 : index
    %c0_26 = arith.constant 0 : index
    %19 = vector.load %arg16[%c0_25, %c0_26] : memref<1x32xf32, #tpu.memory_space<vmem>>, vector<1x32xf32>
    %c0_27 = arith.constant 0 : index
    %c0_28 = arith.constant 0 : index
    %20 = vector.load %arg13[%c0_27, %c0_28] : memref<8x128xf32, #tpu.memory_space<vmem>>, vector<1x128xf32>
    %cst_29 = arith.constant dense<0.000000e+00> : vector<1x128xf32>
    %21 = tpu.matmul %18, %6, %cst_29 {dimension_numbers = #tpu.dot_dimension_numbers<[1], [0], [0], [1], [0, 0, 1, 1], [], []>} : vector<1x32xf32>, vector<32x128xf32>, vector<1x128xf32> -> vector<1x128xf32>
    %22 = arith.addf %20, %21 : vector<1x128xf32>
    %23 = vector.extract_strided_slice %22 {offsets = [0, 0], sizes = [1, 32], strides = [1, 1]} : vector<1x128xf32> to vector<1x32xf32>
    %24 = arith.negf %23 : vector<1x32xf32>
    %25 = math.exp %24 : vector<1x32xf32>
    %cst_30 = arith.constant 1.000000e+00 : f32
    %26 = vector.broadcast %cst_30 : f32 to vector<1x32xf32>
    %27 = arith.addf %26, %25 : vector<1x32xf32>
    %28 = arith.divf %26, %27 : vector<1x32xf32>
    %29 = vector.extract_strided_slice %22 {offsets = [0, 32], sizes = [1, 32], strides = [1, 1]} : vector<1x128xf32> to vector<1x32xf32>
    %30 = arith.negf %29 : vector<1x32xf32>
    %31 = math.exp %30 : vector<1x32xf32>
    %cst_31 = arith.constant 1.000000e+00 : f32
    %32 = vector.broadcast %cst_31 : f32 to vector<1x32xf32>
    %33 = arith.addf %32, %31 : vector<1x32xf32>
    %34 = arith.divf %32, %33 : vector<1x32xf32>
    %35 = vector.extract_strided_slice %22 {offsets = [0, 64], sizes = [1, 32], strides = [1, 1]} : vector<1x128xf32> to vector<1x32xf32>
    %36 = math.tanh %35 : vector<1x32xf32>
    %37 = vector.extract_strided_slice %22 {offsets = [0, 96], sizes = [1, 32], strides = [1, 1]} : vector<1x128xf32> to vector<1x32xf32>
    %38 = arith.negf %37 : vector<1x32xf32>
    %39 = math.exp %38 : vector<1x32xf32>
    %cst_32 = arith.constant 1.000000e+00 : f32
    %40 = vector.broadcast %cst_32 : f32 to vector<1x32xf32>
    %41 = arith.addf %40, %39 : vector<1x32xf32>
    %42 = arith.divf %40, %41 : vector<1x32xf32>
    %43 = arith.mulf %34, %19 : vector<1x32xf32>
    %44 = arith.mulf %28, %36 : vector<1x32xf32>
    %45 = arith.addf %43, %44 : vector<1x32xf32>
    %46 = math.tanh %45 : vector<1x32xf32>
    %47 = arith.mulf %42, %46 : vector<1x32xf32>
    %c0_33 = arith.constant 0 : index
    %c0_34 = arith.constant 0 : index
    %48 = vector.load %arg15[%c0_33, %c0_34] : memref<1x32xf32, #tpu.memory_space<vmem>>, vector<1x32xf32>
    tpu.vector_store %arg15[%c0_33, %c0_34], %47 {strides = array<i32>} : memref<1x32xf32, #tpu.memory_space<vmem>>, vector<1x32xf32>,
    %c0_35 = arith.constant 0 : index
    %c0_36 = arith.constant 0 : index
    %49 = vector.load %arg16[%c0_35, %c0_36] : memref<1x32xf32, #tpu.memory_space<vmem>>, vector<1x32xf32>
    tpu.vector_store %arg16[%c0_35, %c0_36], %45 {strides = array<i32>} : memref<1x32xf32, #tpu.memory_space<vmem>>, vector<1x32xf32>,
    %c0_37 = arith.constant 0 : index
    %c0_38 = arith.constant 0 : index
    %50 = vector.load %arg14[%c0_37, %c0_38] : memref<8x32xf32, #tpu.memory_space<vmem>>, vector<1x32xf32>
    tpu.vector_store %arg14[%c0_37, %c0_38], %47 {strides = array<i32>} : memref<8x32xf32, #tpu.memory_space<vmem>>, vector<1x32xf32>,
    %c0_39 = arith.constant 0 : index
    %c0_40 = arith.constant 0 : index
    %51 = vector.load %arg15[%c0_39, %c0_40] : memref<1x32xf32, #tpu.memory_space<vmem>>, vector<1x32xf32>
    %c0_41 = arith.constant 0 : index
    %c0_42 = arith.constant 0 : index
    %52 = vector.load %arg16[%c0_41, %c0_42] : memref<1x32xf32, #tpu.memory_space<vmem>>, vector<1x32xf32>
    %c1 = arith.constant 1 : index
    %c0_43 = arith.constant 0 : index
    %53 = vector.load %arg13[%c1, %c0_43] : memref<8x128xf32, #tpu.memory_space<vmem>>, vector<1x128xf32>
    %cst_44 = arith.constant dense<0.000000e+00> : vector<1x128xf32>
    %54 = tpu.matmul %51, %6, %cst_44 {dimension_numbers = #tpu.dot_dimension_numbers<[1], [0], [0], [1], [0, 0, 1, 1], [], []>} : vector<1x32xf32>, vector<32x128xf32>, vector<1x128xf32> -> vector<1x128xf32>
    %55 = arith.addf %53, %54 : vector<1x128xf32>
    %56 = vector.extract_strided_slice %55 {offsets = [0, 0], sizes = [1, 32], strides = [1, 1]} : vector<1x128xf32> to vector<1x32xf32>
    %57 = arith.negf %56 : vector<1x32xf32>
    %58 = math.exp %57 : vector<1x32xf32>
    %cst_45 = arith.constant 1.000000e+00 : f32
    %59 = vector.broadcast %cst_45 : f32 to vector<1x32xf32>
    %60 = arith.addf %59, %58 : vector<1x32xf32>
    %61 = arith.divf %59, %60 : vector<1x32xf32>
    %62 = vector.extract_strided_slice %55 {offsets = [0, 32], sizes = [1, 32], strides = [1, 1]} : vector<1x128xf32> to vector<1x32xf32>
    %63 = arith.negf %62 : vector<1x32xf32>
    %64 = math.exp %63 : vector<1x32xf32>
    %cst_46 = arith.constant 1.000000e+00 : f32
    %65 = vector.broadcast %cst_46 : f32 to vector<1x32xf32>
    %66 = arith.addf %65, %64 : vector<1x32xf32>
    %67 = arith.divf %65, %66 : vector<1x32xf32>
    %68 = vector.extract_strided_slice %55 {offsets = [0, 64], sizes = [1, 32], strides = [1, 1]} : vector<1x128xf32> to vector<1x32xf32>
    %69 = math.tanh %68 : vector<1x32xf32>
    %70 = vector.extract_strided_slice %55 {offsets = [0, 96], sizes = [1, 32], strides = [1, 1]} : vector<1x128xf32> to vector<1x32xf32>
    %71 = arith.negf %70 : vector<1x32xf32>
    %72 = math.exp %71 : vector<1x32xf32>
    %cst_47 = arith.constant 1.000000e+00 : f32
    %73 = vector.broadcast %cst_47 : f32 to vector<1x32xf32>
    %74 = arith.addf %73, %72 : vector<1x32xf32>
    %75 = arith.divf %73, %74 : vector<1x32xf32>
    %76 = arith.mulf %67, %52 : vector<1x32xf32>
    %77 = arith.mulf %61, %69 : vector<1x32xf32>
    %78 = arith.addf %76, %77 : vector<1x32xf32>
    %79 = math.tanh %78 : vector<1x32xf32>
    %80 = arith.mulf %75, %79 : vector<1x32xf32>
    %c0_48 = arith.constant 0 : index
    %c0_49 = arith.constant 0 : index
    %81 = vector.load %arg15[%c0_48, %c0_49] : memref<1x32xf32, #tpu.memory_space<vmem>>, vector<1x32xf32>
    tpu.vector_store %arg15[%c0_48, %c0_49], %80 {strides = array<i32>} : memref<1x32xf32, #tpu.memory_space<vmem>>, vector<1x32xf32>,
    %c0_50 = arith.constant 0 : index
    %c0_51 = arith.constant 0 : index
    %82 = vector.load %arg16[%c0_50, %c0_51] : memref<1x32xf32, #tpu.memory_space<vmem>>, vector<1x32xf32>
    tpu.vector_store %arg16[%c0_50, %c0_51], %78 {strides = array<i32>} : memref<1x32xf32, #tpu.memory_space<vmem>>, vector<1x32xf32>,
    %c1_52 = arith.constant 1 : index
    %c0_53 = arith.constant 0 : index
    %83 = vector.load %arg14[%c1_52, %c0_53] : memref<8x32xf32, #tpu.memory_space<vmem>>, vector<1x32xf32>
    tpu.vector_store %arg14[%c1_52, %c0_53], %80 {strides = array<i32>} : memref<8x32xf32, #tpu.memory_space<vmem>>, vector<1x32xf32>,
    %c0_54 = arith.constant 0 : index
    %c0_55 = arith.constant 0 : index
    %84 = vector.load %arg15[%c0_54, %c0_55] : memref<1x32xf32, #tpu.memory_space<vmem>>, vector<1x32xf32>
    %c0_56 = arith.constant 0 : index
    %c0_57 = arith.constant 0 : index
    %85 = vector.load %arg16[%c0_56, %c0_57] : memref<1x32xf32, #tpu.memory_space<vmem>>, vector<1x32xf32>
    %c2 = arith.constant 2 : index
    %c0_58 = arith.constant 0 : index
    %86 = vector.load %arg13[%c2, %c0_58] : memref<8x128xf32, #tpu.memory_space<vmem>>, vector<1x128xf32>
    %cst_59 = arith.constant dense<0.000000e+00> : vector<1x128xf32>
    %87 = tpu.matmul %84, %6, %cst_59 {dimension_numbers = #tpu.dot_dimension_numbers<[1], [0], [0], [1], [0, 0, 1, 1], [], []>} : vector<1x32xf32>, vector<32x128xf32>, vector<1x128xf32> -> vector<1x128xf32>
    %88 = arith.addf %86, %87 : vector<1x128xf32>
    %89 = vector.extract_strided_slice %88 {offsets = [0, 0], sizes = [1, 32], strides = [1, 1]} : vector<1x128xf32> to vector<1x32xf32>
    %90 = arith.negf %89 : vector<1x32xf32>
    %91 = math.exp %90 : vector<1x32xf32>
    %cst_60 = arith.constant 1.000000e+00 : f32
    %92 = vector.broadcast %cst_60 : f32 to vector<1x32xf32>
    %93 = arith.addf %92, %91 : vector<1x32xf32>
    %94 = arith.divf %92, %93 : vector<1x32xf32>
    %95 = vector.extract_strided_slice %88 {offsets = [0, 32], sizes = [1, 32], strides = [1, 1]} : vector<1x128xf32> to vector<1x32xf32>
    %96 = arith.negf %95 : vector<1x32xf32>
    %97 = math.exp %96 : vector<1x32xf32>
    %cst_61 = arith.constant 1.000000e+00 : f32
    %98 = vector.broadcast %cst_61 : f32 to vector<1x32xf32>
    %99 = arith.addf %98, %97 : vector<1x32xf32>
    %100 = arith.divf %98, %99 : vector<1x32xf32>
    %101 = vector.extract_strided_slice %88 {offsets = [0, 64], sizes = [1, 32], strides = [1, 1]} : vector<1x128xf32> to vector<1x32xf32>
    %102 = math.tanh %101 : vector<1x32xf32>
    %103 = vector.extract_strided_slice %88 {offsets = [0, 96], sizes = [1, 32], strides = [1, 1]} : vector<1x128xf32> to vector<1x32xf32>
    %104 = arith.negf %103 : vector<1x32xf32>
    %105 = math.exp %104 : vector<1x32xf32>
    %cst_62 = arith.constant 1.000000e+00 : f32
    %106 = vector.broadcast %cst_62 : f32 to vector<1x32xf32>
    %107 = arith.addf %106, %105 : vector<1x32xf32>
    %108 = arith.divf %106, %107 : vector<1x32xf32>
    %109 = arith.mulf %100, %85 : vector<1x32xf32>
    %110 = arith.mulf %94, %102 : vector<1x32xf32>
    %111 = arith.addf %109, %110 : vector<1x32xf32>
    %112 = math.tanh %111 : vector<1x32xf32>
    %113 = arith.mulf %108, %112 : vector<1x32xf32>
    %c0_63 = arith.constant 0 : index
    %c0_64 = arith.constant 0 : index
    %114 = vector.load %arg15[%c0_63, %c0_64] : memref<1x32xf32, #tpu.memory_space<vmem>>, vector<1x32xf32>
    tpu.vector_store %arg15[%c0_63, %c0_64], %113 {strides = array<i32>} : memref<1x32xf32, #tpu.memory_space<vmem>>, vector<1x32xf32>,
    %c0_65 = arith.constant 0 : index
    %c0_66 = arith.constant 0 : index
    %115 = vector.load %arg16[%c0_65, %c0_66] : memref<1x32xf32, #tpu.memory_space<vmem>>, vector<1x32xf32>
    tpu.vector_store %arg16[%c0_65, %c0_66], %111 {strides = array<i32>} : memref<1x32xf32, #tpu.memory_space<vmem>>, vector<1x32xf32>,
    %c2_67 = arith.constant 2 : index
    %c0_68 = arith.constant 0 : index
    %116 = vector.load %arg14[%c2_67, %c0_68] : memref<8x32xf32, #tpu.memory_space<vmem>>, vector<1x32xf32>
    tpu.vector_store %arg14[%c2_67, %c0_68], %113 {strides = array<i32>} : memref<8x32xf32, #tpu.memory_space<vmem>>, vector<1x32xf32>,
    %c0_69 = arith.constant 0 : index
    %c0_70 = arith.constant 0 : index
    %117 = vector.load %arg15[%c0_69, %c0_70] : memref<1x32xf32, #tpu.memory_space<vmem>>, vector<1x32xf32>
    %c0_71 = arith.constant 0 : index
    %c0_72 = arith.constant 0 : index
    %118 = vector.load %arg16[%c0_71, %c0_72] : memref<1x32xf32, #tpu.memory_space<vmem>>, vector<1x32xf32>
    %c3 = arith.constant 3 : index
    %c0_73 = arith.constant 0 : index
    %119 = vector.load %arg13[%c3, %c0_73] : memref<8x128xf32, #tpu.memory_space<vmem>>, vector<1x128xf32>
    %cst_74 = arith.constant dense<0.000000e+00> : vector<1x128xf32>
    %120 = tpu.matmul %117, %6, %cst_74 {dimension_numbers = #tpu.dot_dimension_numbers<[1], [0], [0], [1], [0, 0, 1, 1], [], []>} : vector<1x32xf32>, vector<32x128xf32>, vector<1x128xf32> -> vector<1x128xf32>
    %121 = arith.addf %119, %120 : vector<1x128xf32>
    %122 = vector.extract_strided_slice %121 {offsets = [0, 0], sizes = [1, 32], strides = [1, 1]} : vector<1x128xf32> to vector<1x32xf32>
    %123 = arith.negf %122 : vector<1x32xf32>
    %124 = math.exp %123 : vector<1x32xf32>
    %cst_75 = arith.constant 1.000000e+00 : f32
    %125 = vector.broadcast %cst_75 : f32 to vector<1x32xf32>
    %126 = arith.addf %125, %124 : vector<1x32xf32>
    %127 = arith.divf %125, %126 : vector<1x32xf32>
    %128 = vector.extract_strided_slice %121 {offsets = [0, 32], sizes = [1, 32], strides = [1, 1]} : vector<1x128xf32> to vector<1x32xf32>
    %129 = arith.negf %128 : vector<1x32xf32>
    %130 = math.exp %129 : vector<1x32xf32>
    %cst_76 = arith.constant 1.000000e+00 : f32
    %131 = vector.broadcast %cst_76 : f32 to vector<1x32xf32>
    %132 = arith.addf %131, %130 : vector<1x32xf32>
    %133 = arith.divf %131, %132 : vector<1x32xf32>
    %134 = vector.extract_strided_slice %121 {offsets = [0, 64], sizes = [1, 32], strides = [1, 1]} : vector<1x128xf32> to vector<1x32xf32>
    %135 = math.tanh %134 : vector<1x32xf32>
    %136 = vector.extract_strided_slice %121 {offsets = [0, 96], sizes = [1, 32], strides = [1, 1]} : vector<1x128xf32> to vector<1x32xf32>
    %137 = arith.negf %136 : vector<1x32xf32>
    %138 = math.exp %137 : vector<1x32xf32>
    %cst_77 = arith.constant 1.000000e+00 : f32
    %139 = vector.broadcast %cst_77 : f32 to vector<1x32xf32>
    %140 = arith.addf %139, %138 : vector<1x32xf32>
    %141 = arith.divf %139, %140 : vector<1x32xf32>
    %142 = arith.mulf %133, %118 : vector<1x32xf32>
    %143 = arith.mulf %127, %135 : vector<1x32xf32>
    %144 = arith.addf %142, %143 : vector<1x32xf32>
    %145 = math.tanh %144 : vector<1x32xf32>
    %146 = arith.mulf %141, %145 : vector<1x32xf32>
    %c0_78 = arith.constant 0 : index
    %c0_79 = arith.constant 0 : index
    %147 = vector.load %arg15[%c0_78, %c0_79] : memref<1x32xf32, #tpu.memory_space<vmem>>, vector<1x32xf32>
    tpu.vector_store %arg15[%c0_78, %c0_79], %146 {strides = array<i32>} : memref<1x32xf32, #tpu.memory_space<vmem>>, vector<1x32xf32>,
    %c0_80 = arith.constant 0 : index
    %c0_81 = arith.constant 0 : index
    %148 = vector.load %arg16[%c0_80, %c0_81] : memref<1x32xf32, #tpu.memory_space<vmem>>, vector<1x32xf32>
    tpu.vector_store %arg16[%c0_80, %c0_81], %144 {strides = array<i32>} : memref<1x32xf32, #tpu.memory_space<vmem>>, vector<1x32xf32>,
    %c3_82 = arith.constant 3 : index
    %c0_83 = arith.constant 0 : index
    %149 = vector.load %arg14[%c3_82, %c0_83] : memref<8x32xf32, #tpu.memory_space<vmem>>, vector<1x32xf32>
    tpu.vector_store %arg14[%c3_82, %c0_83], %146 {strides = array<i32>} : memref<8x32xf32, #tpu.memory_space<vmem>>, vector<1x32xf32>,
    %c0_84 = arith.constant 0 : index
    %c0_85 = arith.constant 0 : index
    %150 = vector.load %arg15[%c0_84, %c0_85] : memref<1x32xf32, #tpu.memory_space<vmem>>, vector<1x32xf32>
    %c0_86 = arith.constant 0 : index
    %c0_87 = arith.constant 0 : index
    %151 = vector.load %arg16[%c0_86, %c0_87] : memref<1x32xf32, #tpu.memory_space<vmem>>, vector<1x32xf32>
    %c4 = arith.constant 4 : index
    %c0_88 = arith.constant 0 : index
    %152 = vector.load %arg13[%c4, %c0_88] : memref<8x128xf32, #tpu.memory_space<vmem>>, vector<1x128xf32>
    %cst_89 = arith.constant dense<0.000000e+00> : vector<1x128xf32>
    %153 = tpu.matmul %150, %6, %cst_89 {dimension_numbers = #tpu.dot_dimension_numbers<[1], [0], [0], [1], [0, 0, 1, 1], [], []>} : vector<1x32xf32>, vector<32x128xf32>, vector<1x128xf32> -> vector<1x128xf32>
    %154 = arith.addf %152, %153 : vector<1x128xf32>
    %155 = vector.extract_strided_slice %154 {offsets = [0, 0], sizes = [1, 32], strides = [1, 1]} : vector<1x128xf32> to vector<1x32xf32>
    %156 = arith.negf %155 : vector<1x32xf32>
    %157 = math.exp %156 : vector<1x32xf32>
    %cst_90 = arith.constant 1.000000e+00 : f32
    %158 = vector.broadcast %cst_90 : f32 to vector<1x32xf32>
    %159 = arith.addf %158, %157 : vector<1x32xf32>
    %160 = arith.divf %158, %159 : vector<1x32xf32>
    %161 = vector.extract_strided_slice %154 {offsets = [0, 32], sizes = [1, 32], strides = [1, 1]} : vector<1x128xf32> to vector<1x32xf32>
    %162 = arith.negf %161 : vector<1x32xf32>
    %163 = math.exp %162 : vector<1x32xf32>
    %cst_91 = arith.constant 1.000000e+00 : f32
    %164 = vector.broadcast %cst_91 : f32 to vector<1x32xf32>
    %165 = arith.addf %164, %163 : vector<1x32xf32>
    %166 = arith.divf %164, %165 : vector<1x32xf32>
    %167 = vector.extract_strided_slice %154 {offsets = [0, 64], sizes = [1, 32], strides = [1, 1]} : vector<1x128xf32> to vector<1x32xf32>
    %168 = math.tanh %167 : vector<1x32xf32>
    %169 = vector.extract_strided_slice %154 {offsets = [0, 96], sizes = [1, 32], strides = [1, 1]} : vector<1x128xf32> to vector<1x32xf32>
    %170 = arith.negf %169 : vector<1x32xf32>
    %171 = math.exp %170 : vector<1x32xf32>
    %cst_92 = arith.constant 1.000000e+00 : f32
    %172 = vector.broadcast %cst_92 : f32 to vector<1x32xf32>
    %173 = arith.addf %172, %171 : vector<1x32xf32>
    %174 = arith.divf %172, %173 : vector<1x32xf32>
    %175 = arith.mulf %166, %151 : vector<1x32xf32>
    %176 = arith.mulf %160, %168 : vector<1x32xf32>
    %177 = arith.addf %175, %176 : vector<1x32xf32>
    %178 = math.tanh %177 : vector<1x32xf32>
    %179 = arith.mulf %174, %178 : vector<1x32xf32>
    %c0_93 = arith.constant 0 : index
    %c0_94 = arith.constant 0 : index
    %180 = vector.load %arg15[%c0_93, %c0_94] : memref<1x32xf32, #tpu.memory_space<vmem>>, vector<1x32xf32>
    tpu.vector_store %arg15[%c0_93, %c0_94], %179 {strides = array<i32>} : memref<1x32xf32, #tpu.memory_space<vmem>>, vector<1x32xf32>,
    %c0_95 = arith.constant 0 : index
    %c0_96 = arith.constant 0 : index
    %181 = vector.load %arg16[%c0_95, %c0_96] : memref<1x32xf32, #tpu.memory_space<vmem>>, vector<1x32xf32>
    tpu.vector_store %arg16[%c0_95, %c0_96], %177 {strides = array<i32>} : memref<1x32xf32, #tpu.memory_space<vmem>>, vector<1x32xf32>,
    %c4_97 = arith.constant 4 : index
    %c0_98 = arith.constant 0 : index
    %182 = vector.load %arg14[%c4_97, %c0_98] : memref<8x32xf32, #tpu.memory_space<vmem>>, vector<1x32xf32>
    tpu.vector_store %arg14[%c4_97, %c0_98], %179 {strides = array<i32>} : memref<8x32xf32, #tpu.memory_space<vmem>>, vector<1x32xf32>,
    %c0_99 = arith.constant 0 : index
    %c0_100 = arith.constant 0 : index
    %183 = vector.load %arg15[%c0_99, %c0_100] : memref<1x32xf32, #tpu.memory_space<vmem>>, vector<1x32xf32>
    %c0_101 = arith.constant 0 : index
    %c0_102 = arith.constant 0 : index
    %184 = vector.load %arg16[%c0_101, %c0_102] : memref<1x32xf32, #tpu.memory_space<vmem>>, vector<1x32xf32>
    %c5 = arith.constant 5 : index
    %c0_103 = arith.constant 0 : index
    %185 = vector.load %arg13[%c5, %c0_103] : memref<8x128xf32, #tpu.memory_space<vmem>>, vector<1x128xf32>
    %cst_104 = arith.constant dense<0.000000e+00> : vector<1x128xf32>
    %186 = tpu.matmul %183, %6, %cst_104 {dimension_numbers = #tpu.dot_dimension_numbers<[1], [0], [0], [1], [0, 0, 1, 1], [], []>} : vector<1x32xf32>, vector<32x128xf32>, vector<1x128xf32> -> vector<1x128xf32>
    %187 = arith.addf %185, %186 : vector<1x128xf32>
    %188 = vector.extract_strided_slice %187 {offsets = [0, 0], sizes = [1, 32], strides = [1, 1]} : vector<1x128xf32> to vector<1x32xf32>
    %189 = arith.negf %188 : vector<1x32xf32>
    %190 = math.exp %189 : vector<1x32xf32>
    %cst_105 = arith.constant 1.000000e+00 : f32
    %191 = vector.broadcast %cst_105 : f32 to vector<1x32xf32>
    %192 = arith.addf %191, %190 : vector<1x32xf32>
    %193 = arith.divf %191, %192 : vector<1x32xf32>
    %194 = vector.extract_strided_slice %187 {offsets = [0, 32], sizes = [1, 32], strides = [1, 1]} : vector<1x128xf32> to vector<1x32xf32>
    %195 = arith.negf %194 : vector<1x32xf32>
    %196 = math.exp %195 : vector<1x32xf32>
    %cst_106 = arith.constant 1.000000e+00 : f32
    %197 = vector.broadcast %cst_106 : f32 to vector<1x32xf32>
    %198 = arith.addf %197, %196 : vector<1x32xf32>
    %199 = arith.divf %197, %198 : vector<1x32xf32>
    %200 = vector.extract_strided_slice %187 {offsets = [0, 64], sizes = [1, 32], strides = [1, 1]} : vector<1x128xf32> to vector<1x32xf32>
    %201 = math.tanh %200 : vector<1x32xf32>
    %202 = vector.extract_strided_slice %187 {offsets = [0, 96], sizes = [1, 32], strides = [1, 1]} : vector<1x128xf32> to vector<1x32xf32>
    %203 = arith.negf %202 : vector<1x32xf32>
    %204 = math.exp %203 : vector<1x32xf32>
    %cst_107 = arith.constant 1.000000e+00 : f32
    %205 = vector.broadcast %cst_107 : f32 to vector<1x32xf32>
    %206 = arith.addf %205, %204 : vector<1x32xf32>
    %207 = arith.divf %205, %206 : vector<1x32xf32>
    %208 = arith.mulf %199, %184 : vector<1x32xf32>
    %209 = arith.mulf %193, %201 : vector<1x32xf32>
    %210 = arith.addf %208, %209 : vector<1x32xf32>
    %211 = math.tanh %210 : vector<1x32xf32>
    %212 = arith.mulf %207, %211 : vector<1x32xf32>
    %c0_108 = arith.constant 0 : index
    %c0_109 = arith.constant 0 : index
    %213 = vector.load %arg15[%c0_108, %c0_109] : memref<1x32xf32, #tpu.memory_space<vmem>>, vector<1x32xf32>
    tpu.vector_store %arg15[%c0_108, %c0_109], %212 {strides = array<i32>} : memref<1x32xf32, #tpu.memory_space<vmem>>, vector<1x32xf32>,
    %c0_110 = arith.constant 0 : index
    %c0_111 = arith.constant 0 : index
    %214 = vector.load %arg16[%c0_110, %c0_111] : memref<1x32xf32, #tpu.memory_space<vmem>>, vector<1x32xf32>
    tpu.vector_store %arg16[%c0_110, %c0_111], %210 {strides = array<i32>} : memref<1x32xf32, #tpu.memory_space<vmem>>, vector<1x32xf32>,
    %c5_112 = arith.constant 5 : index
    %c0_113 = arith.constant 0 : index
    %215 = vector.load %arg14[%c5_112, %c0_113] : memref<8x32xf32, #tpu.memory_space<vmem>>, vector<1x32xf32>
    tpu.vector_store %arg14[%c5_112, %c0_113], %212 {strides = array<i32>} : memref<8x32xf32, #tpu.memory_space<vmem>>, vector<1x32xf32>,
    %c0_114 = arith.constant 0 : index
    %c0_115 = arith.constant 0 : index
    %216 = vector.load %arg15[%c0_114, %c0_115] : memref<1x32xf32, #tpu.memory_space<vmem>>, vector<1x32xf32>
    %c0_116 = arith.constant 0 : index
    %c0_117 = arith.constant 0 : index
    %217 = vector.load %arg16[%c0_116, %c0_117] : memref<1x32xf32, #tpu.memory_space<vmem>>, vector<1x32xf32>
    %c6 = arith.constant 6 : index
    %c0_118 = arith.constant 0 : index
    %218 = vector.load %arg13[%c6, %c0_118] : memref<8x128xf32, #tpu.memory_space<vmem>>, vector<1x128xf32>
    %cst_119 = arith.constant dense<0.000000e+00> : vector<1x128xf32>
    %219 = tpu.matmul %216, %6, %cst_119 {dimension_numbers = #tpu.dot_dimension_numbers<[1], [0], [0], [1], [0, 0, 1, 1], [], []>} : vector<1x32xf32>, vector<32x128xf32>, vector<1x128xf32> -> vector<1x128xf32>
    %220 = arith.addf %218, %219 : vector<1x128xf32>
    %221 = vector.extract_strided_slice %220 {offsets = [0, 0], sizes = [1, 32], strides = [1, 1]} : vector<1x128xf32> to vector<1x32xf32>
    %222 = arith.negf %221 : vector<1x32xf32>
    %223 = math.exp %222 : vector<1x32xf32>
    %cst_120 = arith.constant 1.000000e+00 : f32
    %224 = vector.broadcast %cst_120 : f32 to vector<1x32xf32>
    %225 = arith.addf %224, %223 : vector<1x32xf32>
    %226 = arith.divf %224, %225 : vector<1x32xf32>
    %227 = vector.extract_strided_slice %220 {offsets = [0, 32], sizes = [1, 32], strides = [1, 1]} : vector<1x128xf32> to vector<1x32xf32>
    %228 = arith.negf %227 : vector<1x32xf32>
    %229 = math.exp %228 : vector<1x32xf32>
    %cst_121 = arith.constant 1.000000e+00 : f32
    %230 = vector.broadcast %cst_121 : f32 to vector<1x32xf32>
    %231 = arith.addf %230, %229 : vector<1x32xf32>
    %232 = arith.divf %230, %231 : vector<1x32xf32>
    %233 = vector.extract_strided_slice %220 {offsets = [0, 64], sizes = [1, 32], strides = [1, 1]} : vector<1x128xf32> to vector<1x32xf32>
    %234 = math.tanh %233 : vector<1x32xf32>
    %235 = vector.extract_strided_slice %220 {offsets = [0, 96], sizes = [1, 32], strides = [1, 1]} : vector<1x128xf32> to vector<1x32xf32>
    %236 = arith.negf %235 : vector<1x32xf32>
    %237 = math.exp %236 : vector<1x32xf32>
    %cst_122 = arith.constant 1.000000e+00 : f32
    %238 = vector.broadcast %cst_122 : f32 to vector<1x32xf32>
    %239 = arith.addf %238, %237 : vector<1x32xf32>
    %240 = arith.divf %238, %239 : vector<1x32xf32>
    %241 = arith.mulf %232, %217 : vector<1x32xf32>
    %242 = arith.mulf %226, %234 : vector<1x32xf32>
    %243 = arith.addf %241, %242 : vector<1x32xf32>
    %244 = math.tanh %243 : vector<1x32xf32>
    %245 = arith.mulf %240, %244 : vector<1x32xf32>
    %c0_123 = arith.constant 0 : index
    %c0_124 = arith.constant 0 : index
    %246 = vector.load %arg15[%c0_123, %c0_124] : memref<1x32xf32, #tpu.memory_space<vmem>>, vector<1x32xf32>
    tpu.vector_store %arg15[%c0_123, %c0_124], %245 {strides = array<i32>} : memref<1x32xf32, #tpu.memory_space<vmem>>, vector<1x32xf32>,
    %c0_125 = arith.constant 0 : index
    %c0_126 = arith.constant 0 : index
    %247 = vector.load %arg16[%c0_125, %c0_126] : memref<1x32xf32, #tpu.memory_space<vmem>>, vector<1x32xf32>
    tpu.vector_store %arg16[%c0_125, %c0_126], %243 {strides = array<i32>} : memref<1x32xf32, #tpu.memory_space<vmem>>, vector<1x32xf32>,
    %c6_127 = arith.constant 6 : index
    %c0_128 = arith.constant 0 : index
    %248 = vector.load %arg14[%c6_127, %c0_128] : memref<8x32xf32, #tpu.memory_space<vmem>>, vector<1x32xf32>
    tpu.vector_store %arg14[%c6_127, %c0_128], %245 {strides = array<i32>} : memref<8x32xf32, #tpu.memory_space<vmem>>, vector<1x32xf32>,
    %c0_129 = arith.constant 0 : index
    %c0_130 = arith.constant 0 : index
    %249 = vector.load %arg15[%c0_129, %c0_130] : memref<1x32xf32, #tpu.memory_space<vmem>>, vector<1x32xf32>
    %c0_131 = arith.constant 0 : index
    %c0_132 = arith.constant 0 : index
    %250 = vector.load %arg16[%c0_131, %c0_132] : memref<1x32xf32, #tpu.memory_space<vmem>>, vector<1x32xf32>
    %c7 = arith.constant 7 : index
    %c0_133 = arith.constant 0 : index
    %251 = vector.load %arg13[%c7, %c0_133] : memref<8x128xf32, #tpu.memory_space<vmem>>, vector<1x128xf32>
    %cst_134 = arith.constant dense<0.000000e+00> : vector<1x128xf32>
    %252 = tpu.matmul %249, %6, %cst_134 {dimension_numbers = #tpu.dot_dimension_numbers<[1], [0], [0], [1], [0, 0, 1, 1], [], []>} : vector<1x32xf32>, vector<32x128xf32>, vector<1x128xf32> -> vector<1x128xf32>
    %253 = arith.addf %251, %252 : vector<1x128xf32>
    %254 = vector.extract_strided_slice %253 {offsets = [0, 0], sizes = [1, 32], strides = [1, 1]} : vector<1x128xf32> to vector<1x32xf32>
    %255 = arith.negf %254 : vector<1x32xf32>
    %256 = math.exp %255 : vector<1x32xf32>
    %cst_135 = arith.constant 1.000000e+00 : f32
    %257 = vector.broadcast %cst_135 : f32 to vector<1x32xf32>
    %258 = arith.addf %257, %256 : vector<1x32xf32>
    %259 = arith.divf %257, %258 : vector<1x32xf32>
    %260 = vector.extract_strided_slice %253 {offsets = [0, 32], sizes = [1, 32], strides = [1, 1]} : vector<1x128xf32> to vector<1x32xf32>
    %261 = arith.negf %260 : vector<1x32xf32>
    %262 = math.exp %261 : vector<1x32xf32>
    %cst_136 = arith.constant 1.000000e+00 : f32
    %263 = vector.broadcast %cst_136 : f32 to vector<1x32xf32>
    %264 = arith.addf %263, %262 : vector<1x32xf32>
    %265 = arith.divf %263, %264 : vector<1x32xf32>
    %266 = vector.extract_strided_slice %253 {offsets = [0, 64], sizes = [1, 32], strides = [1, 1]} : vector<1x128xf32> to vector<1x32xf32>
    %267 = math.tanh %266 : vector<1x32xf32>
    %268 = vector.extract_strided_slice %253 {offsets = [0, 96], sizes = [1, 32], strides = [1, 1]} : vector<1x128xf32> to vector<1x32xf32>
    %269 = arith.negf %268 : vector<1x32xf32>
    %270 = math.exp %269 : vector<1x32xf32>
    %cst_137 = arith.constant 1.000000e+00 : f32
    %271 = vector.broadcast %cst_137 : f32 to vector<1x32xf32>
    %272 = arith.addf %271, %270 : vector<1x32xf32>
    %273 = arith.divf %271, %272 : vector<1x32xf32>
    %274 = arith.mulf %265, %250 : vector<1x32xf32>
    %275 = arith.mulf %259, %267 : vector<1x32xf32>
    %276 = arith.addf %274, %275 : vector<1x32xf32>
    %277 = math.tanh %276 : vector<1x32xf32>
    %278 = arith.mulf %273, %277 : vector<1x32xf32>
    %c0_138 = arith.constant 0 : index
    %c0_139 = arith.constant 0 : index
    %279 = vector.load %arg15[%c0_138, %c0_139] : memref<1x32xf32, #tpu.memory_space<vmem>>, vector<1x32xf32>
    tpu.vector_store %arg15[%c0_138, %c0_139], %278 {strides = array<i32>} : memref<1x32xf32, #tpu.memory_space<vmem>>, vector<1x32xf32>,
    %c0_140 = arith.constant 0 : index
    %c0_141 = arith.constant 0 : index
    %280 = vector.load %arg16[%c0_140, %c0_141] : memref<1x32xf32, #tpu.memory_space<vmem>>, vector<1x32xf32>
    tpu.vector_store %arg16[%c0_140, %c0_141], %276 {strides = array<i32>} : memref<1x32xf32, #tpu.memory_space<vmem>>, vector<1x32xf32>,
    %c7_142 = arith.constant 7 : index
    %c0_143 = arith.constant 0 : index
    %281 = vector.load %arg14[%c7_142, %c0_143] : memref<8x32xf32, #tpu.memory_space<vmem>>, vector<1x32xf32>
    tpu.vector_store %arg14[%c7_142, %c0_143], %278 {strides = array<i32>} : memref<8x32xf32, #tpu.memory_space<vmem>>, vector<1x32xf32>,
    %c0_144 = arith.constant 0 : index
    %c0_145 = arith.constant 0 : index
    %282 = vector.load %arg14[%c0_144, %c0_145] : memref<8x32xf32, #tpu.memory_space<vmem>>, vector<8x32xf32>
    %c0_146 = arith.constant 0 : index
    %c0_147 = arith.constant 0 : index
    %c0_148 = arith.constant 0 : index
    %283 = vector.load %arg5[%c0_146, %c0_147, %c0_148] : memref<2x32x32xf32, #tpu.memory_space<vmem>>, vector<1x32x32xf32>
    %284 = vector.shape_cast %283 : vector<1x32x32xf32> to vector<32x32xf32>
    %cst_149 = arith.constant dense<0.000000e+00> : vector<8x32xf32>
    %285 = tpu.matmul %282, %284, %cst_149 {dimension_numbers = #tpu.dot_dimension_numbers<[1], [0], [0], [1], [0, 0, 1, 1], [], []>} : vector<8x32xf32>, vector<32x32xf32>, vector<8x32xf32> -> vector<8x32xf32>
    %c0_150 = arith.constant 0 : index
    %c0_151 = arith.constant 0 : index
    %c0_152 = arith.constant 0 : index
    %286 = vector.load %arg6[%c0_150, %c0_151, %c0_152] : memref<2x1x32xf32, #tpu.memory_space<vmem>>, vector<1x1x32xf32>
    %287 = vector.shape_cast %286 : vector<1x1x32xf32> to vector<1x32xf32>
    %288 = vector.broadcast %287 : vector<1x32xf32> to vector<8x32xf32>
    %289 = arith.addf %285, %288 : vector<8x32xf32>
    %290 = arith.negf %289 : vector<8x32xf32>
    %291 = math.exp %290 : vector<8x32xf32>
    %cst_153 = arith.constant 1.000000e+00 : f32
    %292 = vector.broadcast %cst_153 : f32 to vector<8x32xf32>
    %293 = arith.addf %292, %291 : vector<8x32xf32>
    %294 = arith.divf %292, %293 : vector<8x32xf32>
    %295 = arith.mulf %294, %282 : vector<8x32xf32>
    %296 = arith.addf %9, %295 : vector<8x32xf32>
    %c0_154 = arith.constant 0 : index
    %c0_155 = arith.constant 0 : index
    %c0_156 = arith.constant 0 : index
    %297 = vector.load %arg7[%c0_154, %c0_155, %c0_156] : memref<2x1x32xf32, #tpu.memory_space<vmem>>, vector<1x1x32xf32>
    %298 = vector.shape_cast %297 : vector<1x1x32xf32> to vector<1x32xf32>
    %c0_157 = arith.constant 0 : index
    %c0_158 = arith.constant 0 : index
    %c0_159 = arith.constant 0 : index
    %299 = vector.load %arg8[%c0_157, %c0_158, %c0_159] : memref<2x1x32xf32, #tpu.memory_space<vmem>>, vector<1x1x32xf32>
    %300 = vector.shape_cast %299 : vector<1x1x32xf32> to vector<1x32xf32>
    %cst_160 = arith.constant dense<0.000000e+00> : vector<8xf32>
    %301 = vector.multi_reduction <add>, %296, %cst_160 [1] : vector<8x32xf32> to vector<8xf32>
    %302 = vector.shape_cast %301 : vector<8xf32> to vector<8x1xf32>
    %cst_161 = arith.constant 3.200000e+01 : f32
    %303 = vector.broadcast %cst_161 : f32 to vector<8x1xf32>
    %304 = arith.divf %302, %303 : vector<8x1xf32>
    %305 = vector.broadcast %304 : vector<8x1xf32> to vector<8x32xf32>
    %306 = arith.subf %296, %305 : vector<8x32xf32>
    %307 = arith.mulf %306, %306 : vector<8x32xf32>
    %cst_162 = arith.constant dense<0.000000e+00> : vector<8xf32>
    %308 = vector.multi_reduction <add>, %307, %cst_162 [1] : vector<8x32xf32> to vector<8xf32>
    %309 = vector.shape_cast %308 : vector<8xf32> to vector<8x1xf32>
    %cst_163 = arith.constant 3.200000e+01 : f32
    %310 = vector.broadcast %cst_163 : f32 to vector<8x1xf32>
    %311 = arith.divf %309, %310 : vector<8x1xf32>
    %312 = vector.broadcast %304 : vector<8x1xf32> to vector<8x32xf32>
    %313 = arith.subf %296, %312 : vector<8x32xf32>
    %cst_164 = arith.constant 9.99999974E-6 : f32
    %314 = vector.broadcast %cst_164 : f32 to vector<8x1xf32>
    %315 = arith.addf %311, %314 : vector<8x1xf32>
    %316 = math.rsqrt %315 : vector<8x1xf32>
    %317 = vector.broadcast %316 : vector<8x1xf32> to vector<8x32xf32>
    %318 = arith.mulf %313, %317 : vector<8x32xf32>
    %319 = vector.broadcast %298 : vector<1x32xf32> to vector<8x32xf32>
    %320 = arith.mulf %318, %319 : vector<8x32xf32>
    %321 = vector.broadcast %300 : vector<1x32xf32> to vector<8x32xf32>
    %322 = arith.addf %320, %321 : vector<8x32xf32>
    %c0_165 = arith.constant 0 : index
    %c0_166 = arith.constant 0 : index
    %323 = vector.load %arg12[%c0_165, %c0_166] : memref<8x32xf32, #tpu.memory_space<vmem>>, vector<8x32xf32>
    tpu.vector_store %arg12[%c0_165, %c0_166], %322 {strides = array<i32>} : memref<8x32xf32, #tpu.memory_space<vmem>>, vector<8x32xf32>,
    %c1_167 = arith.constant 1 : index
    %c0_168 = arith.constant 0 : index
    %c0_169 = arith.constant 0 : index
    %324 = vector.load %arg2[%c1_167, %c0_168, %c0_169] : memref<2x32x128xf32, #tpu.memory_space<vmem>>, vector<1x32x128xf32>
    %325 = vector.shape_cast %324 : vector<1x32x128xf32> to vector<32x128xf32>
    %c1_170 = arith.constant 1 : index
    %c0_171 = arith.constant 0 : index
    %c0_172 = arith.constant 0 : index
    %326 = vector.load %arg3[%c1_170, %c0_171, %c0_172] : memref<2x32x128xf32, #tpu.memory_space<vmem>>, vector<1x32x128xf32>
    %327 = vector.shape_cast %326 : vector<1x32x128xf32> to vector<32x128xf32>
    %c1_173 = arith.constant 1 : index
    %c0_174 = arith.constant 0 : index
    %c0_175 = arith.constant 0 : index
    %328 = vector.load %arg4[%c1_173, %c0_174, %c0_175] : memref<2x1x128xf32, #tpu.memory_space<vmem>>, vector<1x1x128xf32>
    %329 = vector.shape_cast %328 : vector<1x1x128xf32> to vector<1x128xf32>
    %c0_176 = arith.constant 0 : index
    %c0_177 = arith.constant 0 : index
    %330 = vector.load %arg12[%c0_176, %c0_177] : memref<8x32xf32, #tpu.memory_space<vmem>>, vector<8x32xf32>
    %cst_178 = arith.constant dense<0.000000e+00> : vector<8x128xf32>
    %331 = tpu.matmul %330, %325, %cst_178 {dimension_numbers = #tpu.dot_dimension_numbers<[1], [0], [0], [1], [0, 0, 1, 1], [], []>} : vector<8x32xf32>, vector<32x128xf32>, vector<8x128xf32> -> vector<8x128xf32>
    %332 = vector.broadcast %329 : vector<1x128xf32> to vector<8x128xf32>
    %333 = arith.addf %331, %332 : vector<8x128xf32>
    %c0_179 = arith.constant 0 : index
    %c0_180 = arith.constant 0 : index
    %334 = vector.load %arg13[%c0_179, %c0_180] : memref<8x128xf32, #tpu.memory_space<vmem>>, vector<8x128xf32>
    tpu.vector_store %arg13[%c0_179, %c0_180], %333 {strides = array<i32>} : memref<8x128xf32, #tpu.memory_space<vmem>>, vector<8x128xf32>,
    %cst_181 = arith.constant 0.000000e+00 : f32
    %335 = vector.broadcast %cst_181 : f32 to vector<1x32xf32>
    %c0_182 = arith.constant 0 : index
    %c0_183 = arith.constant 0 : index
    %336 = vector.load %arg15[%c0_182, %c0_183] : memref<1x32xf32, #tpu.memory_space<vmem>>, vector<1x32xf32>
    tpu.vector_store %arg15[%c0_182, %c0_183], %335 {strides = array<i32>} : memref<1x32xf32, #tpu.memory_space<vmem>>, vector<1x32xf32>,
    %cst_184 = arith.constant 0.000000e+00 : f32
    %337 = vector.broadcast %cst_184 : f32 to vector<1x32xf32>
    %c0_185 = arith.constant 0 : index
    %c0_186 = arith.constant 0 : index
    %338 = vector.load %arg16[%c0_185, %c0_186] : memref<1x32xf32, #tpu.memory_space<vmem>>, vector<1x32xf32>
    tpu.vector_store %arg16[%c0_185, %c0_186], %337 {strides = array<i32>} : memref<1x32xf32, #tpu.memory_space<vmem>>, vector<1x32xf32>,
    %c0_187 = arith.constant 0 : index
    %c0_188 = arith.constant 0 : index
    %339 = vector.load %arg15[%c0_187, %c0_188] : memref<1x32xf32, #tpu.memory_space<vmem>>, vector<1x32xf32>
    %c0_189 = arith.constant 0 : index
    %c0_190 = arith.constant 0 : index
    %340 = vector.load %arg16[%c0_189, %c0_190] : memref<1x32xf32, #tpu.memory_space<vmem>>, vector<1x32xf32>
    %c0_191 = arith.constant 0 : index
    %c0_192 = arith.constant 0 : index
    %341 = vector.load %arg13[%c0_191, %c0_192] : memref<8x128xf32, #tpu.memory_space<vmem>>, vector<1x128xf32>
    %cst_193 = arith.constant dense<0.000000e+00> : vector<1x128xf32>
    %342 = tpu.matmul %339, %327, %cst_193 {dimension_numbers = #tpu.dot_dimension_numbers<[1], [0], [0], [1], [0, 0, 1, 1], [], []>} : vector<1x32xf32>, vector<32x128xf32>, vector<1x128xf32> -> vector<1x128xf32>
    %343 = arith.addf %341, %342 : vector<1x128xf32>
    %344 = vector.extract_strided_slice %343 {offsets = [0, 0], sizes = [1, 32], strides = [1, 1]} : vector<1x128xf32> to vector<1x32xf32>
    %345 = arith.negf %344 : vector<1x32xf32>
    %346 = math.exp %345 : vector<1x32xf32>
    %cst_194 = arith.constant 1.000000e+00 : f32
    %347 = vector.broadcast %cst_194 : f32 to vector<1x32xf32>
    %348 = arith.addf %347, %346 : vector<1x32xf32>
    %349 = arith.divf %347, %348 : vector<1x32xf32>
    %350 = vector.extract_strided_slice %343 {offsets = [0, 32], sizes = [1, 32], strides = [1, 1]} : vector<1x128xf32> to vector<1x32xf32>
    %351 = arith.negf %350 : vector<1x32xf32>
    %352 = math.exp %351 : vector<1x32xf32>
    %cst_195 = arith.constant 1.000000e+00 : f32
    %353 = vector.broadcast %cst_195 : f32 to vector<1x32xf32>
    %354 = arith.addf %353, %352 : vector<1x32xf32>
    %355 = arith.divf %353, %354 : vector<1x32xf32>
    %356 = vector.extract_strided_slice %343 {offsets = [0, 64], sizes = [1, 32], strides = [1, 1]} : vector<1x128xf32> to vector<1x32xf32>
    %357 = math.tanh %356 : vector<1x32xf32>
    %358 = vector.extract_strided_slice %343 {offsets = [0, 96], sizes = [1, 32], strides = [1, 1]} : vector<1x128xf32> to vector<1x32xf32>
    %359 = arith.negf %358 : vector<1x32xf32>
    %360 = math.exp %359 : vector<1x32xf32>
    %cst_196 = arith.constant 1.000000e+00 : f32
    %361 = vector.broadcast %cst_196 : f32 to vector<1x32xf32>
    %362 = arith.addf %361, %360 : vector<1x32xf32>
    %363 = arith.divf %361, %362 : vector<1x32xf32>
    %364 = arith.mulf %355, %340 : vector<1x32xf32>
    %365 = arith.mulf %349, %357 : vector<1x32xf32>
    %366 = arith.addf %364, %365 : vector<1x32xf32>
    %367 = math.tanh %366 : vector<1x32xf32>
    %368 = arith.mulf %363, %367 : vector<1x32xf32>
    %c0_197 = arith.constant 0 : index
    %c0_198 = arith.constant 0 : index
    %369 = vector.load %arg15[%c0_197, %c0_198] : memref<1x32xf32, #tpu.memory_space<vmem>>, vector<1x32xf32>
    tpu.vector_store %arg15[%c0_197, %c0_198], %368 {strides = array<i32>} : memref<1x32xf32, #tpu.memory_space<vmem>>, vector<1x32xf32>,
    %c0_199 = arith.constant 0 : index
    %c0_200 = arith.constant 0 : index
    %370 = vector.load %arg16[%c0_199, %c0_200] : memref<1x32xf32, #tpu.memory_space<vmem>>, vector<1x32xf32>
    tpu.vector_store %arg16[%c0_199, %c0_200], %366 {strides = array<i32>} : memref<1x32xf32, #tpu.memory_space<vmem>>, vector<1x32xf32>,
    %c0_201 = arith.constant 0 : index
    %c0_202 = arith.constant 0 : index
    %371 = vector.load %arg14[%c0_201, %c0_202] : memref<8x32xf32, #tpu.memory_space<vmem>>, vector<1x32xf32>
    tpu.vector_store %arg14[%c0_201, %c0_202], %368 {strides = array<i32>} : memref<8x32xf32, #tpu.memory_space<vmem>>, vector<1x32xf32>,
    %c0_203 = arith.constant 0 : index
    %c0_204 = arith.constant 0 : index
    %372 = vector.load %arg15[%c0_203, %c0_204] : memref<1x32xf32, #tpu.memory_space<vmem>>, vector<1x32xf32>
    %c0_205 = arith.constant 0 : index
    %c0_206 = arith.constant 0 : index
    %373 = vector.load %arg16[%c0_205, %c0_206] : memref<1x32xf32, #tpu.memory_space<vmem>>, vector<1x32xf32>
    %c1_207 = arith.constant 1 : index
    %c0_208 = arith.constant 0 : index
    %374 = vector.load %arg13[%c1_207, %c0_208] : memref<8x128xf32, #tpu.memory_space<vmem>>, vector<1x128xf32>
    %cst_209 = arith.constant dense<0.000000e+00> : vector<1x128xf32>
    %375 = tpu.matmul %372, %327, %cst_209 {dimension_numbers = #tpu.dot_dimension_numbers<[1], [0], [0], [1], [0, 0, 1, 1], [], []>} : vector<1x32xf32>, vector<32x128xf32>, vector<1x128xf32> -> vector<1x128xf32>
    %376 = arith.addf %374, %375 : vector<1x128xf32>
    %377 = vector.extract_strided_slice %376 {offsets = [0, 0], sizes = [1, 32], strides = [1, 1]} : vector<1x128xf32> to vector<1x32xf32>
    %378 = arith.negf %377 : vector<1x32xf32>
    %379 = math.exp %378 : vector<1x32xf32>
    %cst_210 = arith.constant 1.000000e+00 : f32
    %380 = vector.broadcast %cst_210 : f32 to vector<1x32xf32>
    %381 = arith.addf %380, %379 : vector<1x32xf32>
    %382 = arith.divf %380, %381 : vector<1x32xf32>
    %383 = vector.extract_strided_slice %376 {offsets = [0, 32], sizes = [1, 32], strides = [1, 1]} : vector<1x128xf32> to vector<1x32xf32>
    %384 = arith.negf %383 : vector<1x32xf32>
    %385 = math.exp %384 : vector<1x32xf32>
    %cst_211 = arith.constant 1.000000e+00 : f32
    %386 = vector.broadcast %cst_211 : f32 to vector<1x32xf32>
    %387 = arith.addf %386, %385 : vector<1x32xf32>
    %388 = arith.divf %386, %387 : vector<1x32xf32>
    %389 = vector.extract_strided_slice %376 {offsets = [0, 64], sizes = [1, 32], strides = [1, 1]} : vector<1x128xf32> to vector<1x32xf32>
    %390 = math.tanh %389 : vector<1x32xf32>
    %391 = vector.extract_strided_slice %376 {offsets = [0, 96], sizes = [1, 32], strides = [1, 1]} : vector<1x128xf32> to vector<1x32xf32>
    %392 = arith.negf %391 : vector<1x32xf32>
    %393 = math.exp %392 : vector<1x32xf32>
    %cst_212 = arith.constant 1.000000e+00 : f32
    %394 = vector.broadcast %cst_212 : f32 to vector<1x32xf32>
    %395 = arith.addf %394, %393 : vector<1x32xf32>
    %396 = arith.divf %394, %395 : vector<1x32xf32>
    %397 = arith.mulf %388, %373 : vector<1x32xf32>
    %398 = arith.mulf %382, %390 : vector<1x32xf32>
    %399 = arith.addf %397, %398 : vector<1x32xf32>
    %400 = math.tanh %399 : vector<1x32xf32>
    %401 = arith.mulf %396, %400 : vector<1x32xf32>
    %c0_213 = arith.constant 0 : index
    %c0_214 = arith.constant 0 : index
    %402 = vector.load %arg15[%c0_213, %c0_214] : memref<1x32xf32, #tpu.memory_space<vmem>>, vector<1x32xf32>
    tpu.vector_store %arg15[%c0_213, %c0_214], %401 {strides = array<i32>} : memref<1x32xf32, #tpu.memory_space<vmem>>, vector<1x32xf32>,
    %c0_215 = arith.constant 0 : index
    %c0_216 = arith.constant 0 : index
    %403 = vector.load %arg16[%c0_215, %c0_216] : memref<1x32xf32, #tpu.memory_space<vmem>>, vector<1x32xf32>
    tpu.vector_store %arg16[%c0_215, %c0_216], %399 {strides = array<i32>} : memref<1x32xf32, #tpu.memory_space<vmem>>, vector<1x32xf32>,
    %c1_217 = arith.constant 1 : index
    %c0_218 = arith.constant 0 : index
    %404 = vector.load %arg14[%c1_217, %c0_218] : memref<8x32xf32, #tpu.memory_space<vmem>>, vector<1x32xf32>
    tpu.vector_store %arg14[%c1_217, %c0_218], %401 {strides = array<i32>} : memref<8x32xf32, #tpu.memory_space<vmem>>, vector<1x32xf32>,
    %c0_219 = arith.constant 0 : index
    %c0_220 = arith.constant 0 : index
    %405 = vector.load %arg15[%c0_219, %c0_220] : memref<1x32xf32, #tpu.memory_space<vmem>>, vector<1x32xf32>
    %c0_221 = arith.constant 0 : index
    %c0_222 = arith.constant 0 : index
    %406 = vector.load %arg16[%c0_221, %c0_222] : memref<1x32xf32, #tpu.memory_space<vmem>>, vector<1x32xf32>
    %c2_223 = arith.constant 2 : index
    %c0_224 = arith.constant 0 : index
    %407 = vector.load %arg13[%c2_223, %c0_224] : memref<8x128xf32, #tpu.memory_space<vmem>>, vector<1x128xf32>
    %cst_225 = arith.constant dense<0.000000e+00> : vector<1x128xf32>
    %408 = tpu.matmul %405, %327, %cst_225 {dimension_numbers = #tpu.dot_dimension_numbers<[1], [0], [0], [1], [0, 0, 1, 1], [], []>} : vector<1x32xf32>, vector<32x128xf32>, vector<1x128xf32> -> vector<1x128xf32>
    %409 = arith.addf %407, %408 : vector<1x128xf32>
    %410 = vector.extract_strided_slice %409 {offsets = [0, 0], sizes = [1, 32], strides = [1, 1]} : vector<1x128xf32> to vector<1x32xf32>
    %411 = arith.negf %410 : vector<1x32xf32>
    %412 = math.exp %411 : vector<1x32xf32>
    %cst_226 = arith.constant 1.000000e+00 : f32
    %413 = vector.broadcast %cst_226 : f32 to vector<1x32xf32>
    %414 = arith.addf %413, %412 : vector<1x32xf32>
    %415 = arith.divf %413, %414 : vector<1x32xf32>
    %416 = vector.extract_strided_slice %409 {offsets = [0, 32], sizes = [1, 32], strides = [1, 1]} : vector<1x128xf32> to vector<1x32xf32>
    %417 = arith.negf %416 : vector<1x32xf32>
    %418 = math.exp %417 : vector<1x32xf32>
    %cst_227 = arith.constant 1.000000e+00 : f32
    %419 = vector.broadcast %cst_227 : f32 to vector<1x32xf32>
    %420 = arith.addf %419, %418 : vector<1x32xf32>
    %421 = arith.divf %419, %420 : vector<1x32xf32>
    %422 = vector.extract_strided_slice %409 {offsets = [0, 64], sizes = [1, 32], strides = [1, 1]} : vector<1x128xf32> to vector<1x32xf32>
    %423 = math.tanh %422 : vector<1x32xf32>
    %424 = vector.extract_strided_slice %409 {offsets = [0, 96], sizes = [1, 32], strides = [1, 1]} : vector<1x128xf32> to vector<1x32xf32>
    %425 = arith.negf %424 : vector<1x32xf32>
    %426 = math.exp %425 : vector<1x32xf32>
    %cst_228 = arith.constant 1.000000e+00 : f32
    %427 = vector.broadcast %cst_228 : f32 to vector<1x32xf32>
    %428 = arith.addf %427, %426 : vector<1x32xf32>
    %429 = arith.divf %427, %428 : vector<1x32xf32>
    %430 = arith.mulf %421, %406 : vector<1x32xf32>
    %431 = arith.mulf %415, %423 : vector<1x32xf32>
    %432 = arith.addf %430, %431 : vector<1x32xf32>
    %433 = math.tanh %432 : vector<1x32xf32>
    %434 = arith.mulf %429, %433 : vector<1x32xf32>
    %c0_229 = arith.constant 0 : index
    %c0_230 = arith.constant 0 : index
    %435 = vector.load %arg15[%c0_229, %c0_230] : memref<1x32xf32, #tpu.memory_space<vmem>>, vector<1x32xf32>
    tpu.vector_store %arg15[%c0_229, %c0_230], %434 {strides = array<i32>} : memref<1x32xf32, #tpu.memory_space<vmem>>, vector<1x32xf32>,
    %c0_231 = arith.constant 0 : index
    %c0_232 = arith.constant 0 : index
    %436 = vector.load %arg16[%c0_231, %c0_232] : memref<1x32xf32, #tpu.memory_space<vmem>>, vector<1x32xf32>
    tpu.vector_store %arg16[%c0_231, %c0_232], %432 {strides = array<i32>} : memref<1x32xf32, #tpu.memory_space<vmem>>, vector<1x32xf32>,
    %c2_233 = arith.constant 2 : index
    %c0_234 = arith.constant 0 : index
    %437 = vector.load %arg14[%c2_233, %c0_234] : memref<8x32xf32, #tpu.memory_space<vmem>>, vector<1x32xf32>
    tpu.vector_store %arg14[%c2_233, %c0_234], %434 {strides = array<i32>} : memref<8x32xf32, #tpu.memory_space<vmem>>, vector<1x32xf32>,
    %c0_235 = arith.constant 0 : index
    %c0_236 = arith.constant 0 : index
    %438 = vector.load %arg15[%c0_235, %c0_236] : memref<1x32xf32, #tpu.memory_space<vmem>>, vector<1x32xf32>
    %c0_237 = arith.constant 0 : index
    %c0_238 = arith.constant 0 : index
    %439 = vector.load %arg16[%c0_237, %c0_238] : memref<1x32xf32, #tpu.memory_space<vmem>>, vector<1x32xf32>
    %c3_239 = arith.constant 3 : index
    %c0_240 = arith.constant 0 : index
    %440 = vector.load %arg13[%c3_239, %c0_240] : memref<8x128xf32, #tpu.memory_space<vmem>>, vector<1x128xf32>
    %cst_241 = arith.constant dense<0.000000e+00> : vector<1x128xf32>
    %441 = tpu.matmul %438, %327, %cst_241 {dimension_numbers = #tpu.dot_dimension_numbers<[1], [0], [0], [1], [0, 0, 1, 1], [], []>} : vector<1x32xf32>, vector<32x128xf32>, vector<1x128xf32> -> vector<1x128xf32>
    %442 = arith.addf %440, %441 : vector<1x128xf32>
    %443 = vector.extract_strided_slice %442 {offsets = [0, 0], sizes = [1, 32], strides = [1, 1]} : vector<1x128xf32> to vector<1x32xf32>
    %444 = arith.negf %443 : vector<1x32xf32>
    %445 = math.exp %444 : vector<1x32xf32>
    %cst_242 = arith.constant 1.000000e+00 : f32
    %446 = vector.broadcast %cst_242 : f32 to vector<1x32xf32>
    %447 = arith.addf %446, %445 : vector<1x32xf32>
    %448 = arith.divf %446, %447 : vector<1x32xf32>
    %449 = vector.extract_strided_slice %442 {offsets = [0, 32], sizes = [1, 32], strides = [1, 1]} : vector<1x128xf32> to vector<1x32xf32>
    %450 = arith.negf %449 : vector<1x32xf32>
    %451 = math.exp %450 : vector<1x32xf32>
    %cst_243 = arith.constant 1.000000e+00 : f32
    %452 = vector.broadcast %cst_243 : f32 to vector<1x32xf32>
    %453 = arith.addf %452, %451 : vector<1x32xf32>
    %454 = arith.divf %452, %453 : vector<1x32xf32>
    %455 = vector.extract_strided_slice %442 {offsets = [0, 64], sizes = [1, 32], strides = [1, 1]} : vector<1x128xf32> to vector<1x32xf32>
    %456 = math.tanh %455 : vector<1x32xf32>
    %457 = vector.extract_strided_slice %442 {offsets = [0, 96], sizes = [1, 32], strides = [1, 1]} : vector<1x128xf32> to vector<1x32xf32>
    %458 = arith.negf %457 : vector<1x32xf32>
    %459 = math.exp %458 : vector<1x32xf32>
    %cst_244 = arith.constant 1.000000e+00 : f32
    %460 = vector.broadcast %cst_244 : f32 to vector<1x32xf32>
    %461 = arith.addf %460, %459 : vector<1x32xf32>
    %462 = arith.divf %460, %461 : vector<1x32xf32>
    %463 = arith.mulf %454, %439 : vector<1x32xf32>
    %464 = arith.mulf %448, %456 : vector<1x32xf32>
    %465 = arith.addf %463, %464 : vector<1x32xf32>
    %466 = math.tanh %465 : vector<1x32xf32>
    %467 = arith.mulf %462, %466 : vector<1x32xf32>
    %c0_245 = arith.constant 0 : index
    %c0_246 = arith.constant 0 : index
    %468 = vector.load %arg15[%c0_245, %c0_246] : memref<1x32xf32, #tpu.memory_space<vmem>>, vector<1x32xf32>
    tpu.vector_store %arg15[%c0_245, %c0_246], %467 {strides = array<i32>} : memref<1x32xf32, #tpu.memory_space<vmem>>, vector<1x32xf32>,
    %c0_247 = arith.constant 0 : index
    %c0_248 = arith.constant 0 : index
    %469 = vector.load %arg16[%c0_247, %c0_248] : memref<1x32xf32, #tpu.memory_space<vmem>>, vector<1x32xf32>
    tpu.vector_store %arg16[%c0_247, %c0_248], %465 {strides = array<i32>} : memref<1x32xf32, #tpu.memory_space<vmem>>, vector<1x32xf32>,
    %c3_249 = arith.constant 3 : index
    %c0_250 = arith.constant 0 : index
    %470 = vector.load %arg14[%c3_249, %c0_250] : memref<8x32xf32, #tpu.memory_space<vmem>>, vector<1x32xf32>
    tpu.vector_store %arg14[%c3_249, %c0_250], %467 {strides = array<i32>} : memref<8x32xf32, #tpu.memory_space<vmem>>, vector<1x32xf32>,
    %c0_251 = arith.constant 0 : index
    %c0_252 = arith.constant 0 : index
    %471 = vector.load %arg15[%c0_251, %c0_252] : memref<1x32xf32, #tpu.memory_space<vmem>>, vector<1x32xf32>
    %c0_253 = arith.constant 0 : index
    %c0_254 = arith.constant 0 : index
    %472 = vector.load %arg16[%c0_253, %c0_254] : memref<1x32xf32, #tpu.memory_space<vmem>>, vector<1x32xf32>
    %c4_255 = arith.constant 4 : index
    %c0_256 = arith.constant 0 : index
    %473 = vector.load %arg13[%c4_255, %c0_256] : memref<8x128xf32, #tpu.memory_space<vmem>>, vector<1x128xf32>
    %cst_257 = arith.constant dense<0.000000e+00> : vector<1x128xf32>
    %474 = tpu.matmul %471, %327, %cst_257 {dimension_numbers = #tpu.dot_dimension_numbers<[1], [0], [0], [1], [0, 0, 1, 1], [], []>} : vector<1x32xf32>, vector<32x128xf32>, vector<1x128xf32> -> vector<1x128xf32>
    %475 = arith.addf %473, %474 : vector<1x128xf32>
    %476 = vector.extract_strided_slice %475 {offsets = [0, 0], sizes = [1, 32], strides = [1, 1]} : vector<1x128xf32> to vector<1x32xf32>
    %477 = arith.negf %476 : vector<1x32xf32>
    %478 = math.exp %477 : vector<1x32xf32>
    %cst_258 = arith.constant 1.000000e+00 : f32
    %479 = vector.broadcast %cst_258 : f32 to vector<1x32xf32>
    %480 = arith.addf %479, %478 : vector<1x32xf32>
    %481 = arith.divf %479, %480 : vector<1x32xf32>
    %482 = vector.extract_strided_slice %475 {offsets = [0, 32], sizes = [1, 32], strides = [1, 1]} : vector<1x128xf32> to vector<1x32xf32>
    %483 = arith.negf %482 : vector<1x32xf32>
    %484 = math.exp %483 : vector<1x32xf32>
    %cst_259 = arith.constant 1.000000e+00 : f32
    %485 = vector.broadcast %cst_259 : f32 to vector<1x32xf32>
    %486 = arith.addf %485, %484 : vector<1x32xf32>
    %487 = arith.divf %485, %486 : vector<1x32xf32>
    %488 = vector.extract_strided_slice %475 {offsets = [0, 64], sizes = [1, 32], strides = [1, 1]} : vector<1x128xf32> to vector<1x32xf32>
    %489 = math.tanh %488 : vector<1x32xf32>
    %490 = vector.extract_strided_slice %475 {offsets = [0, 96], sizes = [1, 32], strides = [1, 1]} : vector<1x128xf32> to vector<1x32xf32>
    %491 = arith.negf %490 : vector<1x32xf32>
    %492 = math.exp %491 : vector<1x32xf32>
    %cst_260 = arith.constant 1.000000e+00 : f32
    %493 = vector.broadcast %cst_260 : f32 to vector<1x32xf32>
    %494 = arith.addf %493, %492 : vector<1x32xf32>
    %495 = arith.divf %493, %494 : vector<1x32xf32>
    %496 = arith.mulf %487, %472 : vector<1x32xf32>
    %497 = arith.mulf %481, %489 : vector<1x32xf32>
    %498 = arith.addf %496, %497 : vector<1x32xf32>
    %499 = math.tanh %498 : vector<1x32xf32>
    %500 = arith.mulf %495, %499 : vector<1x32xf32>
    %c0_261 = arith.constant 0 : index
    %c0_262 = arith.constant 0 : index
    %501 = vector.load %arg15[%c0_261, %c0_262] : memref<1x32xf32, #tpu.memory_space<vmem>>, vector<1x32xf32>
    tpu.vector_store %arg15[%c0_261, %c0_262], %500 {strides = array<i32>} : memref<1x32xf32, #tpu.memory_space<vmem>>, vector<1x32xf32>,
    %c0_263 = arith.constant 0 : index
    %c0_264 = arith.constant 0 : index
    %502 = vector.load %arg16[%c0_263, %c0_264] : memref<1x32xf32, #tpu.memory_space<vmem>>, vector<1x32xf32>
    tpu.vector_store %arg16[%c0_263, %c0_264], %498 {strides = array<i32>} : memref<1x32xf32, #tpu.memory_space<vmem>>, vector<1x32xf32>,
    %c4_265 = arith.constant 4 : index
    %c0_266 = arith.constant 0 : index
    %503 = vector.load %arg14[%c4_265, %c0_266] : memref<8x32xf32, #tpu.memory_space<vmem>>, vector<1x32xf32>
    tpu.vector_store %arg14[%c4_265, %c0_266], %500 {strides = array<i32>} : memref<8x32xf32, #tpu.memory_space<vmem>>, vector<1x32xf32>,
    %c0_267 = arith.constant 0 : index
    %c0_268 = arith.constant 0 : index
    %504 = vector.load %arg15[%c0_267, %c0_268] : memref<1x32xf32, #tpu.memory_space<vmem>>, vector<1x32xf32>
    %c0_269 = arith.constant 0 : index
    %c0_270 = arith.constant 0 : index
    %505 = vector.load %arg16[%c0_269, %c0_270] : memref<1x32xf32, #tpu.memory_space<vmem>>, vector<1x32xf32>
    %c5_271 = arith.constant 5 : index
    %c0_272 = arith.constant 0 : index
    %506 = vector.load %arg13[%c5_271, %c0_272] : memref<8x128xf32, #tpu.memory_space<vmem>>, vector<1x128xf32>
    %cst_273 = arith.constant dense<0.000000e+00> : vector<1x128xf32>
    %507 = tpu.matmul %504, %327, %cst_273 {dimension_numbers = #tpu.dot_dimension_numbers<[1], [0], [0], [1], [0, 0, 1, 1], [], []>} : vector<1x32xf32>, vector<32x128xf32>, vector<1x128xf32> -> vector<1x128xf32>
    %508 = arith.addf %506, %507 : vector<1x128xf32>
    %509 = vector.extract_strided_slice %508 {offsets = [0, 0], sizes = [1, 32], strides = [1, 1]} : vector<1x128xf32> to vector<1x32xf32>
    %510 = arith.negf %509 : vector<1x32xf32>
    %511 = math.exp %510 : vector<1x32xf32>
    %cst_274 = arith.constant 1.000000e+00 : f32
    %512 = vector.broadcast %cst_274 : f32 to vector<1x32xf32>
    %513 = arith.addf %512, %511 : vector<1x32xf32>
    %514 = arith.divf %512, %513 : vector<1x32xf32>
    %515 = vector.extract_strided_slice %508 {offsets = [0, 32], sizes = [1, 32], strides = [1, 1]} : vector<1x128xf32> to vector<1x32xf32>
    %516 = arith.negf %515 : vector<1x32xf32>
    %517 = math.exp %516 : vector<1x32xf32>
    %cst_275 = arith.constant 1.000000e+00 : f32
    %518 = vector.broadcast %cst_275 : f32 to vector<1x32xf32>
    %519 = arith.addf %518, %517 : vector<1x32xf32>
    %520 = arith.divf %518, %519 : vector<1x32xf32>
    %521 = vector.extract_strided_slice %508 {offsets = [0, 64], sizes = [1, 32], strides = [1, 1]} : vector<1x128xf32> to vector<1x32xf32>
    %522 = math.tanh %521 : vector<1x32xf32>
    %523 = vector.extract_strided_slice %508 {offsets = [0, 96], sizes = [1, 32], strides = [1, 1]} : vector<1x128xf32> to vector<1x32xf32>
    %524 = arith.negf %523 : vector<1x32xf32>
    %525 = math.exp %524 : vector<1x32xf32>
    %cst_276 = arith.constant 1.000000e+00 : f32
    %526 = vector.broadcast %cst_276 : f32 to vector<1x32xf32>
    %527 = arith.addf %526, %525 : vector<1x32xf32>
    %528 = arith.divf %526, %527 : vector<1x32xf32>
    %529 = arith.mulf %520, %505 : vector<1x32xf32>
    %530 = arith.mulf %514, %522 : vector<1x32xf32>
    %531 = arith.addf %529, %530 : vector<1x32xf32>
    %532 = math.tanh %531 : vector<1x32xf32>
    %533 = arith.mulf %528, %532 : vector<1x32xf32>
    %c0_277 = arith.constant 0 : index
    %c0_278 = arith.constant 0 : index
    %534 = vector.load %arg15[%c0_277, %c0_278] : memref<1x32xf32, #tpu.memory_space<vmem>>, vector<1x32xf32>
    tpu.vector_store %arg15[%c0_277, %c0_278], %533 {strides = array<i32>} : memref<1x32xf32, #tpu.memory_space<vmem>>, vector<1x32xf32>,
    %c0_279 = arith.constant 0 : index
    %c0_280 = arith.constant 0 : index
    %535 = vector.load %arg16[%c0_279, %c0_280] : memref<1x32xf32, #tpu.memory_space<vmem>>, vector<1x32xf32>
    tpu.vector_store %arg16[%c0_279, %c0_280], %531 {strides = array<i32>} : memref<1x32xf32, #tpu.memory_space<vmem>>, vector<1x32xf32>,
    %c5_281 = arith.constant 5 : index
    %c0_282 = arith.constant 0 : index
    %536 = vector.load %arg14[%c5_281, %c0_282] : memref<8x32xf32, #tpu.memory_space<vmem>>, vector<1x32xf32>
    tpu.vector_store %arg14[%c5_281, %c0_282], %533 {strides = array<i32>} : memref<8x32xf32, #tpu.memory_space<vmem>>, vector<1x32xf32>,
    %c0_283 = arith.constant 0 : index
    %c0_284 = arith.constant 0 : index
    %537 = vector.load %arg15[%c0_283, %c0_284] : memref<1x32xf32, #tpu.memory_space<vmem>>, vector<1x32xf32>
    %c0_285 = arith.constant 0 : index
    %c0_286 = arith.constant 0 : index
    %538 = vector.load %arg16[%c0_285, %c0_286] : memref<1x32xf32, #tpu.memory_space<vmem>>, vector<1x32xf32>
    %c6_287 = arith.constant 6 : index
    %c0_288 = arith.constant 0 : index
    %539 = vector.load %arg13[%c6_287, %c0_288] : memref<8x128xf32, #tpu.memory_space<vmem>>, vector<1x128xf32>
    %cst_289 = arith.constant dense<0.000000e+00> : vector<1x128xf32>
    %540 = tpu.matmul %537, %327, %cst_289 {dimension_numbers = #tpu.dot_dimension_numbers<[1], [0], [0], [1], [0, 0, 1, 1], [], []>} : vector<1x32xf32>, vector<32x128xf32>, vector<1x128xf32> -> vector<1x128xf32>
    %541 = arith.addf %539, %540 : vector<1x128xf32>
    %542 = vector.extract_strided_slice %541 {offsets = [0, 0], sizes = [1, 32], strides = [1, 1]} : vector<1x128xf32> to vector<1x32xf32>
    %543 = arith.negf %542 : vector<1x32xf32>
    %544 = math.exp %543 : vector<1x32xf32>
    %cst_290 = arith.constant 1.000000e+00 : f32
    %545 = vector.broadcast %cst_290 : f32 to vector<1x32xf32>
    %546 = arith.addf %545, %544 : vector<1x32xf32>
    %547 = arith.divf %545, %546 : vector<1x32xf32>
    %548 = vector.extract_strided_slice %541 {offsets = [0, 32], sizes = [1, 32], strides = [1, 1]} : vector<1x128xf32> to vector<1x32xf32>
    %549 = arith.negf %548 : vector<1x32xf32>
    %550 = math.exp %549 : vector<1x32xf32>
    %cst_291 = arith.constant 1.000000e+00 : f32
    %551 = vector.broadcast %cst_291 : f32 to vector<1x32xf32>
    %552 = arith.addf %551, %550 : vector<1x32xf32>
    %553 = arith.divf %551, %552 : vector<1x32xf32>
    %554 = vector.extract_strided_slice %541 {offsets = [0, 64], sizes = [1, 32], strides = [1, 1]} : vector<1x128xf32> to vector<1x32xf32>
    %555 = math.tanh %554 : vector<1x32xf32>
    %556 = vector.extract_strided_slice %541 {offsets = [0, 96], sizes = [1, 32], strides = [1, 1]} : vector<1x128xf32> to vector<1x32xf32>
    %557 = arith.negf %556 : vector<1x32xf32>
    %558 = math.exp %557 : vector<1x32xf32>
    %cst_292 = arith.constant 1.000000e+00 : f32
    %559 = vector.broadcast %cst_292 : f32 to vector<1x32xf32>
    %560 = arith.addf %559, %558 : vector<1x32xf32>
    %561 = arith.divf %559, %560 : vector<1x32xf32>
    %562 = arith.mulf %553, %538 : vector<1x32xf32>
    %563 = arith.mulf %547, %555 : vector<1x32xf32>
    %564 = arith.addf %562, %563 : vector<1x32xf32>
    %565 = math.tanh %564 : vector<1x32xf32>
    %566 = arith.mulf %561, %565 : vector<1x32xf32>
    %c0_293 = arith.constant 0 : index
    %c0_294 = arith.constant 0 : index
    %567 = vector.load %arg15[%c0_293, %c0_294] : memref<1x32xf32, #tpu.memory_space<vmem>>, vector<1x32xf32>
    tpu.vector_store %arg15[%c0_293, %c0_294], %566 {strides = array<i32>} : memref<1x32xf32, #tpu.memory_space<vmem>>, vector<1x32xf32>,
    %c0_295 = arith.constant 0 : index
    %c0_296 = arith.constant 0 : index
    %568 = vector.load %arg16[%c0_295, %c0_296] : memref<1x32xf32, #tpu.memory_space<vmem>>, vector<1x32xf32>
    tpu.vector_store %arg16[%c0_295, %c0_296], %564 {strides = array<i32>} : memref<1x32xf32, #tpu.memory_space<vmem>>, vector<1x32xf32>,
    %c6_297 = arith.constant 6 : index
    %c0_298 = arith.constant 0 : index
    %569 = vector.load %arg14[%c6_297, %c0_298] : memref<8x32xf32, #tpu.memory_space<vmem>>, vector<1x32xf32>
    tpu.vector_store %arg14[%c6_297, %c0_298], %566 {strides = array<i32>} : memref<8x32xf32, #tpu.memory_space<vmem>>, vector<1x32xf32>,
    %c0_299 = arith.constant 0 : index
    %c0_300 = arith.constant 0 : index
    %570 = vector.load %arg15[%c0_299, %c0_300] : memref<1x32xf32, #tpu.memory_space<vmem>>, vector<1x32xf32>
    %c0_301 = arith.constant 0 : index
    %c0_302 = arith.constant 0 : index
    %571 = vector.load %arg16[%c0_301, %c0_302] : memref<1x32xf32, #tpu.memory_space<vmem>>, vector<1x32xf32>
    %c7_303 = arith.constant 7 : index
    %c0_304 = arith.constant 0 : index
    %572 = vector.load %arg13[%c7_303, %c0_304] : memref<8x128xf32, #tpu.memory_space<vmem>>, vector<1x128xf32>
    %cst_305 = arith.constant dense<0.000000e+00> : vector<1x128xf32>
    %573 = tpu.matmul %570, %327, %cst_305 {dimension_numbers = #tpu.dot_dimension_numbers<[1], [0], [0], [1], [0, 0, 1, 1], [], []>} : vector<1x32xf32>, vector<32x128xf32>, vector<1x128xf32> -> vector<1x128xf32>
    %574 = arith.addf %572, %573 : vector<1x128xf32>
    %575 = vector.extract_strided_slice %574 {offsets = [0, 0], sizes = [1, 32], strides = [1, 1]} : vector<1x128xf32> to vector<1x32xf32>
    %576 = arith.negf %575 : vector<1x32xf32>
    %577 = math.exp %576 : vector<1x32xf32>
    %cst_306 = arith.constant 1.000000e+00 : f32
    %578 = vector.broadcast %cst_306 : f32 to vector<1x32xf32>
    %579 = arith.addf %578, %577 : vector<1x32xf32>
    %580 = arith.divf %578, %579 : vector<1x32xf32>
    %581 = vector.extract_strided_slice %574 {offsets = [0, 32], sizes = [1, 32], strides = [1, 1]} : vector<1x128xf32> to vector<1x32xf32>
    %582 = arith.negf %581 : vector<1x32xf32>
    %583 = math.exp %582 : vector<1x32xf32>
    %cst_307 = arith.constant 1.000000e+00 : f32
    %584 = vector.broadcast %cst_307 : f32 to vector<1x32xf32>
    %585 = arith.addf %584, %583 : vector<1x32xf32>
    %586 = arith.divf %584, %585 : vector<1x32xf32>
    %587 = vector.extract_strided_slice %574 {offsets = [0, 64], sizes = [1, 32], strides = [1, 1]} : vector<1x128xf32> to vector<1x32xf32>
    %588 = math.tanh %587 : vector<1x32xf32>
    %589 = vector.extract_strided_slice %574 {offsets = [0, 96], sizes = [1, 32], strides = [1, 1]} : vector<1x128xf32> to vector<1x32xf32>
    %590 = arith.negf %589 : vector<1x32xf32>
    %591 = math.exp %590 : vector<1x32xf32>
    %cst_308 = arith.constant 1.000000e+00 : f32
    %592 = vector.broadcast %cst_308 : f32 to vector<1x32xf32>
    %593 = arith.addf %592, %591 : vector<1x32xf32>
    %594 = arith.divf %592, %593 : vector<1x32xf32>
    %595 = arith.mulf %586, %571 : vector<1x32xf32>
    %596 = arith.mulf %580, %588 : vector<1x32xf32>
    %597 = arith.addf %595, %596 : vector<1x32xf32>
    %598 = math.tanh %597 : vector<1x32xf32>
    %599 = arith.mulf %594, %598 : vector<1x32xf32>
    %c0_309 = arith.constant 0 : index
    %c0_310 = arith.constant 0 : index
    %600 = vector.load %arg15[%c0_309, %c0_310] : memref<1x32xf32, #tpu.memory_space<vmem>>, vector<1x32xf32>
    tpu.vector_store %arg15[%c0_309, %c0_310], %599 {strides = array<i32>} : memref<1x32xf32, #tpu.memory_space<vmem>>, vector<1x32xf32>,
    %c0_311 = arith.constant 0 : index
    %c0_312 = arith.constant 0 : index
    %601 = vector.load %arg16[%c0_311, %c0_312] : memref<1x32xf32, #tpu.memory_space<vmem>>, vector<1x32xf32>
    tpu.vector_store %arg16[%c0_311, %c0_312], %597 {strides = array<i32>} : memref<1x32xf32, #tpu.memory_space<vmem>>, vector<1x32xf32>,
    %c7_313 = arith.constant 7 : index
    %c0_314 = arith.constant 0 : index
    %602 = vector.load %arg14[%c7_313, %c0_314] : memref<8x32xf32, #tpu.memory_space<vmem>>, vector<1x32xf32>
    tpu.vector_store %arg14[%c7_313, %c0_314], %599 {strides = array<i32>} : memref<8x32xf32, #tpu.memory_space<vmem>>, vector<1x32xf32>,
    %c0_315 = arith.constant 0 : index
    %c0_316 = arith.constant 0 : index
    %603 = vector.load %arg14[%c0_315, %c0_316] : memref<8x32xf32, #tpu.memory_space<vmem>>, vector<8x32xf32>
    %c1_317 = arith.constant 1 : index
    %c0_318 = arith.constant 0 : index
    %c0_319 = arith.constant 0 : index
    %604 = vector.load %arg5[%c1_317, %c0_318, %c0_319] : memref<2x32x32xf32, #tpu.memory_space<vmem>>, vector<1x32x32xf32>
    %605 = vector.shape_cast %604 : vector<1x32x32xf32> to vector<32x32xf32>
    %cst_320 = arith.constant dense<0.000000e+00> : vector<8x32xf32>
    %606 = tpu.matmul %603, %605, %cst_320 {dimension_numbers = #tpu.dot_dimension_numbers<[1], [0], [0], [1], [0, 0, 1, 1], [], []>} : vector<8x32xf32>, vector<32x32xf32>, vector<8x32xf32> -> vector<8x32xf32>
    %c1_321 = arith.constant 1 : index
    %c0_322 = arith.constant 0 : index
    %c0_323 = arith.constant 0 : index
    %607 = vector.load %arg6[%c1_321, %c0_322, %c0_323] : memref<2x1x32xf32, #tpu.memory_space<vmem>>, vector<1x1x32xf32>
    %608 = vector.shape_cast %607 : vector<1x1x32xf32> to vector<1x32xf32>
    %609 = vector.broadcast %608 : vector<1x32xf32> to vector<8x32xf32>
    %610 = arith.addf %606, %609 : vector<8x32xf32>
    %611 = arith.negf %610 : vector<8x32xf32>
    %612 = math.exp %611 : vector<8x32xf32>
    %cst_324 = arith.constant 1.000000e+00 : f32
    %613 = vector.broadcast %cst_324 : f32 to vector<8x32xf32>
    %614 = arith.addf %613, %612 : vector<8x32xf32>
    %615 = arith.divf %613, %614 : vector<8x32xf32>
    %616 = arith.mulf %615, %603 : vector<8x32xf32>
    %617 = arith.addf %330, %616 : vector<8x32xf32>
    %c1_325 = arith.constant 1 : index
    %c0_326 = arith.constant 0 : index
    %c0_327 = arith.constant 0 : index
    %618 = vector.load %arg7[%c1_325, %c0_326, %c0_327] : memref<2x1x32xf32, #tpu.memory_space<vmem>>, vector<1x1x32xf32>
    %619 = vector.shape_cast %618 : vector<1x1x32xf32> to vector<1x32xf32>
    %c1_328 = arith.constant 1 : index
    %c0_329 = arith.constant 0 : index
    %c0_330 = arith.constant 0 : index
    %620 = vector.load %arg8[%c1_328, %c0_329, %c0_330] : memref<2x1x32xf32, #tpu.memory_space<vmem>>, vector<1x1x32xf32>
    %621 = vector.shape_cast %620 : vector<1x1x32xf32> to vector<1x32xf32>
    %cst_331 = arith.constant dense<0.000000e+00> : vector<8xf32>
    %622 = vector.multi_reduction <add>, %617, %cst_331 [1] : vector<8x32xf32> to vector<8xf32>
    %623 = vector.shape_cast %622 : vector<8xf32> to vector<8x1xf32>
    %cst_332 = arith.constant 3.200000e+01 : f32
    %624 = vector.broadcast %cst_332 : f32 to vector<8x1xf32>
    %625 = arith.divf %623, %624 : vector<8x1xf32>
    %626 = vector.broadcast %625 : vector<8x1xf32> to vector<8x32xf32>
    %627 = arith.subf %617, %626 : vector<8x32xf32>
    %628 = arith.mulf %627, %627 : vector<8x32xf32>
    %cst_333 = arith.constant dense<0.000000e+00> : vector<8xf32>
    %629 = vector.multi_reduction <add>, %628, %cst_333 [1] : vector<8x32xf32> to vector<8xf32>
    %630 = vector.shape_cast %629 : vector<8xf32> to vector<8x1xf32>
    %cst_334 = arith.constant 3.200000e+01 : f32
    %631 = vector.broadcast %cst_334 : f32 to vector<8x1xf32>
    %632 = arith.divf %630, %631 : vector<8x1xf32>
    %633 = vector.broadcast %625 : vector<8x1xf32> to vector<8x32xf32>
    %634 = arith.subf %617, %633 : vector<8x32xf32>
    %cst_335 = arith.constant 9.99999974E-6 : f32
    %635 = vector.broadcast %cst_335 : f32 to vector<8x1xf32>
    %636 = arith.addf %632, %635 : vector<8x1xf32>
    %637 = math.rsqrt %636 : vector<8x1xf32>
    %638 = vector.broadcast %637 : vector<8x1xf32> to vector<8x32xf32>
    %639 = arith.mulf %634, %638 : vector<8x32xf32>
    %640 = vector.broadcast %619 : vector<1x32xf32> to vector<8x32xf32>
    %641 = arith.mulf %639, %640 : vector<8x32xf32>
    %642 = vector.broadcast %621 : vector<1x32xf32> to vector<8x32xf32>
    %643 = arith.addf %641, %642 : vector<8x32xf32>
    %c0_336 = arith.constant 0 : index
    %c0_337 = arith.constant 0 : index
    %644 = vector.load %arg12[%c0_336, %c0_337] : memref<8x32xf32, #tpu.memory_space<vmem>>, vector<8x32xf32>
    tpu.vector_store %arg12[%c0_336, %c0_337], %643 {strides = array<i32>} : memref<8x32xf32, #tpu.memory_space<vmem>>, vector<8x32xf32>,
    %c0_338 = arith.constant 0 : index
    %c0_339 = arith.constant 0 : index
    %645 = vector.load %arg12[%c0_338, %c0_339] : memref<8x32xf32, #tpu.memory_space<vmem>>, vector<8x32xf32>
    %c0_340 = arith.constant 0 : index
    %c0_341 = arith.constant 0 : index
    %646 = vector.load %arg9[%c0_340, %c0_341] : memref<1x32xf32, #tpu.memory_space<vmem>>, vector<1x32xf32>
    %c0_342 = arith.constant 0 : index
    %c0_343 = arith.constant 0 : index
    %647 = vector.load %arg10[%c0_342, %c0_343] : memref<1x32xf32, #tpu.memory_space<vmem>>, vector<1x32xf32>
    %cst_344 = arith.constant dense<0.000000e+00> : vector<8xf32>
    %648 = vector.multi_reduction <add>, %645, %cst_344 [1] : vector<8x32xf32> to vector<8xf32>
    %649 = vector.shape_cast %648 : vector<8xf32> to vector<8x1xf32>
    %cst_345 = arith.constant 3.200000e+01 : f32
    %650 = vector.broadcast %cst_345 : f32 to vector<8x1xf32>
    %651 = arith.divf %649, %650 : vector<8x1xf32>
    %652 = vector.broadcast %651 : vector<8x1xf32> to vector<8x32xf32>
    %653 = arith.subf %645, %652 : vector<8x32xf32>
    %654 = arith.mulf %653, %653 : vector<8x32xf32>
    %cst_346 = arith.constant dense<0.000000e+00> : vector<8xf32>
    %655 = vector.multi_reduction <add>, %654, %cst_346 [1] : vector<8x32xf32> to vector<8xf32>
    %656 = vector.shape_cast %655 : vector<8xf32> to vector<8x1xf32>
    %cst_347 = arith.constant 3.200000e+01 : f32
    %657 = vector.broadcast %cst_347 : f32 to vector<8x1xf32>
    %658 = arith.divf %656, %657 : vector<8x1xf32>
    %659 = vector.broadcast %651 : vector<8x1xf32> to vector<8x32xf32>
    %660 = arith.subf %645, %659 : vector<8x32xf32>
    %cst_348 = arith.constant 9.99999974E-6 : f32
    %661 = vector.broadcast %cst_348 : f32 to vector<8x1xf32>
    %662 = arith.addf %658, %661 : vector<8x1xf32>
    %663 = math.rsqrt %662 : vector<8x1xf32>
    %664 = vector.broadcast %663 : vector<8x1xf32> to vector<8x32xf32>
    %665 = arith.mulf %660, %664 : vector<8x32xf32>
    %666 = vector.broadcast %646 : vector<1x32xf32> to vector<8x32xf32>
    %667 = arith.mulf %665, %666 : vector<8x32xf32>
    %668 = vector.broadcast %647 : vector<1x32xf32> to vector<8x32xf32>
    %669 = arith.addf %667, %668 : vector<8x32xf32>
    %c0_349 = arith.constant 0 : index
    %c0_350 = arith.constant 0 : index
    %c0_351 = arith.constant 0 : index
    %670 = vector.load %arg11[%c0_349, %c0_350, %c0_351] : memref<1x8x32xf32, #tpu.memory_space<vmem>>, vector<1x8x32xf32>
    %671 = vector.shape_cast %670 : vector<1x8x32xf32> to vector<8x32xf32>
    %672 = vector.shape_cast %669 : vector<8x32xf32> to vector<1x8x32xf32>
    tpu.vector_store %arg11[%c0_349, %c0_350, %c0_351], %672 {strides = array<i32>} : memref<1x8x32xf32, #tpu.memory_space<vmem>>, vector<1x8x32xf32>,
    return
  }
  func.func @transform_0(%arg0: i32) -> (i32, i32, i32) {
    %c0_i32 = arith.constant 0 : i32
    %c0_i32_0 = arith.constant 0 : i32
    %c0_i32_1 = arith.constant 0 : i32
    return %arg0, %c0_i32, %c0_i32_0 : i32, i32, i32
  }
  func.func @transform_1(%arg0: i32) -> (i32, i32, i32) {
    %c0_i32 = arith.constant 0 : i32
    %c0_i32_0 = arith.constant 0 : i32
    %c0_i32_1 = arith.constant 0 : i32
    %c0_i32_2 = arith.constant 0 : i32
    return %c0_i32, %c0_i32_0, %c0_i32_1 : i32, i32, i32
  }
  func.func @transform_2(%arg0: i32) -> (i32, i32, i32) {
    %c0_i32 = arith.constant 0 : i32
    %c0_i32_0 = arith.constant 0 : i32
    %c0_i32_1 = arith.constant 0 : i32
    %c0_i32_2 = arith.constant 0 : i32
    return %c0_i32, %c0_i32_0, %c0_i32_1 : i32, i32, i32
  }
  func.func @transform_3(%arg0: i32) -> (i32, i32, i32) {
    %c0_i32 = arith.constant 0 : i32
    %c0_i32_0 = arith.constant 0 : i32
    %c0_i32_1 = arith.constant 0 : i32
    %c0_i32_2 = arith.constant 0 : i32
    return %c0_i32, %c0_i32_0, %c0_i32_1 : i32, i32, i32
  }
  func.func @transform_4(%arg0: i32) -> (i32, i32, i32) {
    %c0_i32 = arith.constant 0 : i32
    %c0_i32_0 = arith.constant 0 : i32
    %c0_i32_1 = arith.constant 0 : i32
    %c0_i32_2 = arith.constant 0 : i32
    return %c0_i32, %c0_i32_0, %c0_i32_1 : i32, i32, i32
  }
  func.func @transform_5(%arg0: i32) -> (i32, i32, i32) {
    %c0_i32 = arith.constant 0 : i32
    %c0_i32_0 = arith.constant 0 : i32
    %c0_i32_1 = arith.constant 0 : i32
    %c0_i32_2 = arith.constant 0 : i32
    return %c0_i32, %c0_i32_0, %c0_i32_1 : i32, i32, i32
  }
  func.func @transform_6(%arg0: i32) -> (i32, i32, i32) {
    %c0_i32 = arith.constant 0 : i32
    %c0_i32_0 = arith.constant 0 : i32
    %c0_i32_1 = arith.constant 0 : i32
    %c0_i32_2 = arith.constant 0 : i32
    return %c0_i32, %c0_i32_0, %c0_i32_1 : i32, i32, i32
  }
  func.func @transform_7(%arg0: i32) -> (i32, i32, i32) {
    %c0_i32 = arith.constant 0 : i32
    %c0_i32_0 = arith.constant 0 : i32
    %c0_i32_1 = arith.constant 0 : i32
    %c0_i32_2 = arith.constant 0 : i32
    return %c0_i32, %c0_i32_0, %c0_i32_1 : i32, i32, i32
  }
  func.func @transform_8(%arg0: i32) -> (i32, i32) {
    %c0_i32 = arith.constant 0 : i32
    %c0_i32_0 = arith.constant 0 : i32
    %c0_i32_1 = arith.constant 0 : i32
    return %c0_i32, %c0_i32_0 : i32, i32
  }
  func.func @transform_9(%arg0: i32) -> (i32, i32) {
    %c0_i32 = arith.constant 0 : i32
    %c0_i32_0 = arith.constant 0 : i32
    %c0_i32_1 = arith.constant 0 : i32
    return %c0_i32, %c0_i32_0 : i32, i32
  }
  func.func @transform_10(%arg0: i32) -> (i32, i32, i32) {
    %c0_i32 = arith.constant 0 : i32
    %c0_i32_0 = arith.constant 0 : i32
    %c0_i32_1 = arith.constant 0 : i32
    return %arg0, %c0_i32, %c0_i32_0 : i32, i32, i32
  }
}

</mosaic_0001>

<bundles_post_ra>
// kernel: tpu_custom_call.1
= control target key start
LH: loop header
LB: loop body
LE: loop exit
PB: predicated region body
PF: predicated region fallthrough
CT: control target
= control target key end

     0   :  { %s4543_s0 = inlined_call_operand.hbm [shape: f32[2,8,32], index: 0, kind: input, shape index: {}]   ;;  %s4544_s1 = inlined_call_operand.hbm [shape: f32[2,32,128], index: 1, kind: input, shape index: {}]   ;;  %s4545_s2 = inlined_call_operand.hbm [shape: f32[2,32,128], index: 2, kind: input, shape index: {}]   ;;  %s4546_s3 = inlined_call_operand.vmem [shape: f32[2,1,128], index: 3, kind: input, shape index: {}]   ;;  %s4547_s4 = inlined_call_operand.hbm [shape: f32[2,32,32], index: 4, kind: input, shape index: {}]   ;;  %s4548_s5 = inlined_call_operand.vmem [shape: f32[2,1,32], index: 5, kind: input, shape index: {}]   ;;  %s4549_s6 = inlined_call_operand.vmem [shape: f32[2,1,32], index: 6, kind: input, shape index: {}]   ;;  %s4550_s7 = inlined_call_operand.vmem [shape: f32[2,1,32], index: 7, kind: input, shape index: {}]   ;;  %s4551_s8 = inlined_call_operand.vmem [shape: f32[1,32], index: 8, kind: input, shape index: {}]   ;;  %s4552_s9 = inlined_call_operand.vmem [shape: f32[1,32], index: 9, kind: input, shape index: {}]   ;;  %s4553_s10 = inlined_call_operand.hbm [shape: f32[2,8,32], index: 10, kind: output, shape index: {}]  }
   0x1   :  { %4560 = sst [smem:[#allocation22_spill]] %s4552_s9 }
   0x2   :  { %4561 = sst [smem:[#allocation23_spill]] %s4553_s10 }
   0x3   :  { %15 = vsyncpa [#allocation8], 0 }
   0x4   :  { %17 = vsyncpa [#allocation8 + $0x1], 0 }
   0x5   :  { %18 = vsyncpa [#allocation11], 0 }
   0x6   :  { %19 = vsyncpa [#allocation14], 0 }
   0x7   :  { %20 = vsyncpa [#allocation9], 0 }
   0x8   :  { %22 = vsyncpa [#allocation9 + $0x1], 0  ;;  %s3936_s13 = smov 0   ;;  %s3938_s14 = smov 0  }
   0x9   :  { %s3940_s15 = smov 0   ;;  %s3942_s16 = smov 0  }
   0xa LB: > { %4562 = sst [smem:[#allocation20_spill]] %s3854_s13  ;;  %s3957_s17 = sadd.s32 4294967295, %s3866_s16   ;;  %s3866_s16 = sphi %s3942_s16, %s4588_s16   ;;  %s3862_s15 = sphi %s3940_s15, %s4587_s15   ;;  %s3858_s14 = sphi %s3938_s14, %s4586_s14   ;;  %s3854_s13 = sphi %s3936_s13, %s4585_s13  }
   0xb   : > { %s2925_s18 = sadd.s32 4294967294, %s3866_s16   ;;  %p48_p0 = scmp.ne.s32.totalorder %s3858_s14, %s3854_s13 }
   0xc   : > { %p4554_p1 = scmp.eq.s32.totalorder %s3957_s17, 0  ;;  %p267_p3 = scmp.eq.s32.totalorder %s2925_s18, 1 }
   0xd   : > { %p2926_p5 = scmp.ge.s32.totalorder %s3866_s16, 1  ;;  %p274_p7 = scmp.lt.s32.totalorder %s3866_s16, 3 }
   0xe   : > { %p3966_p4 = por %p4554_p1, %p48_p0  ;;  %p3971_p6 = por %p267_p3, %p48_p0 }
   0xf   : > { %p3976_p8 = pnand %p2926_p5, %p274_p7  ;;  %s3868_s22 = smov [#allocation10]  }
  0x10   : > { %s4563_s19 = scalar_select %p3966_p4, 1, 0 }
  0x11   : > { %s4564_s20 = scalar_select %p3971_p6, 1, 0 }
  0x12   : > { %s4566_s21 = scalar_select %p3976_p8, 1, 0 }
  0x13   : > { %4565 = sst [smem:[#allocation21_spill]] %s4564_s20  ;;  %s286_s23 = sshll.u32 %s3868_s22, 4  ;;  %s3980_s23 = int_to_ptr.vmem [resolvable:$true] %s286_s23 }
  0x14   : > { %p3467_p9 = pneg %p3976_p8  ;;  %s3869_s25 = smov [#allocation12]  }
  0x15   : > { %s299_s26 = sshll.u32 %s3869_s25, 4  ;;  %s3870_s27 = smov [#allocation13]   ;;  %s3991_s26 = int_to_ptr.vmem [resolvable:$true] %s299_s26 }
  0x16   : > { %p3987_p11 = pnand %p3467_p9, %p4554_p1  ;;  %s3993_s28 = sshll.u32 %s3870_s27, 4  ;;  %s316_s28 = int_to_ptr.vmem [resolvable:$true] %s3993_s28 }
  0x17   : > { %s3678_s11 = scalar_lea.hbm %s4544_s1, 1024 }
  0x18   : > { %p3679_p12 = scmp.ne.s32.totalorder %s4544_s1, %s3678_s11  ;;  %p4003_p13 = pneg %p3987_p11 }
  0x19   : > { %p3685_p5 = scmp.lt.u32.totalorder %s3678_s11, %s4544_s1 }
  0x1a   : > { %p3681_p0 = pnand %p4003_p13, %p3679_p12 }
  0x1c   : > { %p3682_p3 = pneg %p3681_p0 }
  0x1e   : > { %p3687_p7 = pnand %p3685_p5, %p3682_p3 }
  0x20   : > { %3690 = shalt.err (!%p3687_p7)
}
  0x21   : > { %s3691_s29 = scalar_lea.vmem %s3980_s23, 1024  ;;  %p3699_p2 = scmp.lt.s32.totalorder %s3980_s23, %s3980_s23 }
  0x22   : > { %p3692_p9 = scmp.ne.s32.totalorder %s3980_s23, %s3691_s29  ;;  %p3700_p6 = scmp.lt.s32.totalorder %s3691_s29, %s3691_s29 }
  0x24   : > { %p3694_p10 = pnand %p3692_p9, %p4003_p13  ;;  %p3701_p12 = por %p3700_p6, %p3699_p2 }
  0x26   : > { %p3695_p1 = pneg %p3694_p10 }
  0x28   : > { %p3702_p0 = pnand %p3701_p12, %p3695_p1 }
  0x2a   : > { %3705 = shalt.err (!%p3702_p0)
}
  0x2b   : > { %s3871_s30 = smov 128   ;;  %s3872_s11 = smov 8  }
  0x2c   : > { %3470 = dma.hbm_to_vmem [thread:$0]  (!%p3987_p11), %s4544_s1, 1024, %s3980_s23, [#allocation11], %s3871_s30, %s3871_s30, %s3872_s11  }
  0x2d   : > { %s3706_s29 = scalar_lea.hbm %s4545_s2, 1024 }
  0x2e   : > { %p3707_p1 = scmp.ne.s32.totalorder %s4545_s2, %s3706_s29  ;;  %p3713_p10 = scmp.lt.u32.totalorder %s3706_s29, %s4545_s2 }
  0x30   : > { %p3709_p2 = pnand %p3707_p1, %p4003_p13 }
  0x32   : > { %p3710_p6 = pneg %p3709_p2 }
  0x34   : > { %p3715_p3 = pnand %p3713_p10, %p3710_p6 }
  0x36   : > { %3718 = shalt.err (!%p3715_p3)
}
  0x37   : > { %s3719_s23 = scalar_lea.vmem %s3991_s26, 1024  ;;  %p3727_p12 = scmp.lt.s32.totalorder %s3991_s26, %s3991_s26 }
  0x38   : > { %p3720_p5 = scmp.ne.s32.totalorder %s3991_s26, %s3719_s23  ;;  %p3728_p0 = scmp.lt.s32.totalorder %s3719_s23, %s3719_s23 }
  0x3a   : > { %p3722_p7 = pnand %p3720_p5, %p4003_p13  ;;  %p3729_p1 = por %p3728_p0, %p3727_p12 }
  0x3c   : > { %p3723_p9 = pneg %p3722_p7 }
  0x3e   : > { %p3730_p2 = pnand %p3729_p1, %p3723_p9 }
  0x40   : > { %3733 = shalt.err (!%p3730_p2)
}
  0x41   : > { %3473 = dma.hbm_to_vmem [thread:$0]  (!%p3987_p11), %s4545_s2, 1024, %s3991_s26, [#allocation11], %s3871_s30, %s3871_s30, %s3872_s11  }
  0x42   : > { %s3734_s12 = scalar_lea.hbm %s4547_s4, 1024 }
  0x43   : > { %p3735_p6 = scmp.ne.s32.totalorder %s4547_s4, %s3734_s12  ;;  %p3741_p5 = scmp.lt.u32.totalorder %s3734_s12, %s4547_s4 }
  0x45   : > { %p3737_p10 = pnand %p3735_p6, %p4003_p13 }
  0x47   : > { %p3738_p3 = pneg %p3737_p10 }
  0x49   : > { %p3743_p7 = pnand %p3741_p5, %p3738_p3 }
  0x4b   : > { %3746 = shalt.err (!%p3743_p7)
}
  0x4c   : > { %s3747_s23 = scalar_lea.vmem %s316_s28, 1024  ;;  %p3755_p1 = scmp.lt.s32.totalorder %s316_s28, %s316_s28 }
  0x4d   : > { %p3748_p9 = scmp.ne.s32.totalorder %s316_s28, %s3747_s23  ;;  %p3756_p2 = scmp.lt.s32.totalorder %s3747_s23, %s3747_s23 }
  0x4f   : > { %p3750_p12 = pnand %p3748_p9, %p4003_p13  ;;  %p3757_p4 = por %p3756_p2, %p3755_p1 }
  0x51   : > { %p3751_p0 = pneg %p3750_p12 }
  0x53   : > { %p3758_p8 = pnand %p3757_p4, %p3751_p0 }
  0x55   : > { %3761 = shalt.err (!%p3758_p8)
}
  0x56   : > { %3476 = dma.hbm_to_vmem [thread:$0]  (!%p3987_p11), %s4547_s4, 1024, %s316_s28, [#allocation14], %s3871_s30, %s3871_s30, %s3872_s11  }
  0x57   : > { %s4076_s22 = sadd.s32 1, %s3866_s16   ;;  %s35_s10 = sadd.s32 1, %s3862_s15 }
  0x58   : > { %s32_s24 = ssub.s32 %s3866_s16, %s4076_s22  ;;  %p42_p8 = scmp.ne.s32.totalorder %s3862_s15, %s3858_s14 }
  0x59   : > { %p33_p4 = scmp.eq.s32.totalorder %s32_s24, 0  ;;  %p43_p13 = scmp.eq.s32.totalorder %s3866_s16, 0 }
  0x5a   : > { %p3488_p6 = scmp.lt.s32.totalorder %s3866_s16, 2  ;;  %p4569_p3 = scmp.eq.s32.totalorder %s3957_s17, 1 }
  0x5b   : > { %s4086_s13 = scalar_select %p33_p4, %s3862_s15, %s35_s10  }
  0x5c   : > { %p44_p10 = por %p43_p13, %p42_p8  ;;  %p4090_p5 = por %p4569_p3, %p42_p8 }
  0x5d   : > { %s344_s12 = sand.u32 1, %s3862_s15   ;;  %s2932_s18 = sshll.u32 %s3866_s16, 7 }
  0x5e   : > { %s2931_s28 = sshll.u32 %s344_s12, 3  ;;  %s4099_s25 = scalar_lea.hbm %s4543_s0, %s2932_s18 }
  0x5f   : > { %s348_s27 = scalar_lea.vmem [#allocation7], %s2931_s28  ;;  %p4101_p11 = pnand %p3488_p6, %p44_p10 }
  0x60   : > { %s355_s29 = sshll.u32 %s348_s27, 4  ;;  %s345_s26 = scalar_lea.sflag [#allocation8], %s344_s12  ;;  %s4105_s29 = int_to_ptr.vmem [resolvable:$true] %s355_s29 }
  0x61   : > { %s3762_s9 = scalar_lea.hbm %s4099_s25, 128  ;;  %p3764_p9 = pneg %p4101_p11 }
  0x62   : > { %p3763_p7 = scmp.ne.s32.totalorder %s4099_s25, %s3762_s9  ;;  %s3767_s18 = scalar_lea.hbm %s4543_s0, 256 }
  0x63   : > { %p3768_p1 = scmp.lt.u32.totalorder %s4099_s25, %s4543_s0  ;;  %p3769_p2 = scmp.lt.u32.totalorder %s3767_s18, %s3762_s9 }
  0x64   : > { %p3765_p12 = pnand %p3764_p9, %p3763_p7  ;;  %p3771_p8 = scmp.lt.u32.totalorder %s3762_s9, %s4099_s25 }
  0x65   : > { %p3770_p4 = por %p3769_p2, %p3768_p1 }
  0x66   : > { %p3766_p0 = pneg %p3765_p12 }
  0x67   : > { %p3772_p13 = por %p3771_p8, %p3770_p4 }
  0x69   : > { %p3773_p6 = pnand %p3772_p13, %p3766_p0 }
  0x6b   : > { %3776 = shalt.err (!%p3773_p6)
}
  0x6c   : > { %s3777_s12 = scalar_lea.vmem %s4105_s29, 128  ;;  %s3873_s11 = smov [#allocation7]  }
  0x6d   : > { %p3778_p10 = scmp.ne.s32.totalorder %s4105_s29, %s3777_s12  ;;  %s3782_s27 = sshll.u32 %s3873_s11, 4  ;;  %s3783_s27 = int_to_ptr.vmem [resolvable:$false] %s3782_s27 }
  0x6e   : > { %s3784_s24 = scalar_lea.vmem %s3783_s27, 256  ;;  %p3785_p12 = scmp.lt.s32.totalorder %s4105_s29, %s3783_s27 }
  0x6f   : > { %p3780_p3 = pnand %p3778_p10, %p3764_p9  ;;  %p3786_p1 = scmp.lt.s32.totalorder %s3784_s24, %s3777_s12 }
  0x71   : > { %p3781_p7 = pneg %p3780_p3  ;;  %p3787_p2 = por %p3786_p1, %p3785_p12 }
  0x73   : > { %p3788_p4 = pnand %p3787_p2, %p3781_p7 }
  0x75   : > { %3791 = shalt.err (!%p3788_p4)
}
  0x76   : > { %3480 = dma.hbm_to_vmem [thread:$0]  (!%p4101_p11), %s4099_s25, 128, %s4105_s29, %s345_s26  }
  0x77   : > { %p4572_p0 = scmp.ne.s32.totalorder %s4566_s21, 0 }
  0x78   : > { %s4135_s9 = sand.u32 (!%p4572_p0), 1, %s3858_s14   ;;  %p4573_p9 = scmp.ne.s32.totalorder (!%p4572_p0), %s4563_s19, 0 }
  0x79   : > { %364 = sbr.rel (%p4572_p0) target bundleno = 12985 (0x32b9), region = 60  ;;  %s2934_s10 = sshll.u32 (!%p4572_p0), %s4135_s9, 3 }
  0x7a   : > { %s367_s18 = scalar_lea.sflag (!%p4572_p0), [#allocation8], %s4135_s9  ;;  %s370_s28 = scalar_lea.vmem (!%p4572_p0), [#allocation7], %s2934_s10 }
  0x80   : > { %3837 = dma.done.wait (%p4573_p9), %s367_s18, 128  }
  0x81   : > { %3839 = vsyncadd (%p4573_p9), %s367_s18, 4294967168  ;;  %p4574_p11 = scmp.eq.s32.totalorder %s3957_s17, 0 }
  0x83   : > { %3841 = dma.done.wait (%p4574_p11), [#allocation11], 2048   ;;  %p4575_p8 = pmov %p4574_p11 }
  0x85   : > { %3843 = vsyncadd (%p4575_p8), [#allocation11], 4294965248  ;;  %p4576_p13 = pmov %p4575_p8 }
  0x86   : > { %p4577_p6 = pmov %p4575_p8 }
  0x87   : > { %3845 = dma.done.wait (%p4576_p13), [#allocation14], 1024  }
  0x88   : > { %3847 = vsyncadd (%p4577_p6), [#allocation14], 4294966272  ;;  %v3874_v0 = vmov 0.0|0.0   ;;  %vm3875_vm0 = vmmov 0   ;;  %v3876_v1 = vmov 0.0   ;;  %vm512_vm1 = vcmask 253952  }
  0x89   : > { %3331 = vmatprep.subr.bf16.mxu0 %v3874_v0  ;;  %3119 = vmatprep.mubr.msk.f32.mxu0 %vm3875_vm0, %v3876_v1  ;;  %513 = vst.msk [vmem:[#allocation5] sm:$0x1] %vm512_vm1, %v3876_v1  ;;  %514 = vst.msk [vmem:[#allocation6] sm:$0x1] %vm512_vm1, %v3876_v1  ;;  %vm420_vm2 = vcmask 261120   ;;  %v422_v2 = vld [vmem:[#allocation10] sm:$0xff] }
  0x8a   : > { %3337 = vmatprep.subr.bf16.mxu1 %v3874_v0  ;;  %3130 = vmatprep.mubr.msk.f32.mxu1 %vm3875_vm0, %v3876_v1  ;;  %v423_v3 = vld [vmem:[#allocation10 + $0x8] sm:$0xff]  ;;  %v424_v4 = vld [vmem:[#allocation10 + $0x10] sm:$0xff]  ;;  %v425_v6 = vld [vmem:[#allocation10 + $0x18] sm:$0xff]  ;;  %s3877_s25 = smov 64   ;;  %s3878_s29 = smov 32  }
  0x8b   : > { %v3332_v5 = vpack.c.bf16 %v423_v3, %v422_v2  ;;  %v419_v7 = vld [vmem:[%s370_s28] sm:$0xff]  ;;  %v426_v8 = vld [vmem:[#allocation12] sm:$0xff]  ;;  %v427_v9 = vld [vmem:[#allocation12 + $0x8] sm:$0xff]  ;;  %v3335_v12 = vpack.c.bf16 %v425_v6, %v424_v4  ;;  %s3879_s23 = smov 96   ;;  %s4578_s24 = sld [smem:[#allocation22_spill]] }
  0x8c   : > { %421 = vst.msk [vmem:[#allocation2] sm:$0xff] %vm420_vm2, %v419_v7  ;;  %v428_v10 = vld [vmem:[#allocation12 + $0x10] sm:$0xff]  ;;  %v429_v11 = vld [vmem:[#allocation12 + $0x18] sm:$0xff]  ;;  %v4164_v13 = vpack.c.bf16 %v427_v9, %v426_v8  ;;  %s3008_s18 = sshll.u32 %s3957_s17, 7  ;;  %s418_s28 = scalar_lea.vmem [#allocation15], %s2934_s10 }
  0x8d   : > { %3333 = vmatpush3.bf16.msra.mxu0 %v3332_v5  ;;  %v4168_v14 = vpack.c.bf16 %v429_v11, %v428_v10  ;;  %v2939_v17 = vld [vmem:[%s4546_s3] ss:$0 sm:$0xff]  ;;  %s2826_s19 = sshll.u32 %s418_s28, 4  ;;  %s2813_s30 = scalar_lea.sflag [#allocation9], %s4135_s9  ;;  %s4500_s19 = int_to_ptr.vmem [resolvable:$true] %s2826_s19 }
  0x8e   : > { %3334 = vmatprep.subr.bf16.mxu0 %v3874_v0  ;;  %3339 = vmatpush3.bf16.msra.mxu1 %v4164_v13  ;;  %s3880_s17 = smov [#allocation15]  }
  0x8f   : > { %3340 = vmatprep.subr.bf16.mxu1 %v3874_v0  ;;  %s3796_s10 = sshll.u32 %s3880_s17, 4  ;;  %s3797_s10 = int_to_ptr.vmem [resolvable:$false] %s3796_s10 }
  0x90   : > { %v515_v16 = vld [vmem:[#allocation5] sm:$0x1]  ;;  %v2943_v26 = vld [vmem:[#allocation6] ss:$0 sm:$0xff]  ;;  %s3798_s12 = scalar_lea.vmem %s3797_s10, 256  ;;  %p3799_p12 = scmp.lt.s32.totalorder %s4500_s19, %s3797_s10 }
  0x91   : > { %3336 = vmatpush3.bf16.msra.mxu0 %v3335_v12 }
  0x92   : > { %3343 = vmatprep.subr.bf16.mxu0 %v3874_v0  ;;  %3342 = vmatpush3.bf16.msra.mxu1 %v4168_v14 }
  0x93   : > { %v4172_v15 = vld [vmem:[#allocation2] sm:$0xff]  ;;  %3349 = vmatprep.subr.bf16.mxu1 %v3874_v0 }
  0x94   : > { %3120 = vmatmul.mubr.msk.f32.vlgmr.msra.gmra.mrb[0].mxu0 %vm420_vm2, %v4172_v15 }
  0x95   : > { %3345 = vmatpush3.bf16.msra.mxu0 %v4164_v13  ;;  %3141 = vmatprep.mubr.msk.f32.mxu0 %vm3875_vm0, %v3876_v1 }
  0x96   : > { %3131 = vmatmul.mubr.msk.f32.vlgmr.msra.gmra.mrb[0].mxu1 %vm420_vm2, %v515_v16  ;;  %3346 = vmatprep.subr.bf16.mxu0 %v3874_v0 }
  0x97   : > { %3351 = vmatpush3.bf16.msra.mxu1 %v4164_v13  ;;  %3152 = vmatprep.mubr.msk.f32.mxu1 %vm3875_vm0, %v3876_v1 }
  0x98   : > { %3352 = vmatprep.subr.bf16.mxu1 %v3874_v0 }
  0x99   : > { %3348 = vmatpush3.bf16.msra.mxu0 %v4168_v14 }
  0x9a   : > { %3355 = vmatprep.subr.bf16.mxu0 %v3874_v0 }
  0x9b   : > { %3354 = vmatpush3.bf16.msra.mxu1 %v4168_v14 }
  0x9c   : > { %3361 = vmatprep.subr.bf16.mxu1 %v3874_v0 }
 0x167   : > { %v507_v18 = vpop.f32.mrb[0].mxu0 }
 0x168   : > { %v508_v19 = vadd.f32 %v2939_v17, %v507_v18  ;;  %v3121_v20 = vpop.f32.mrb[1].mxu0 }
 0x169   : > { %v587_v21 = vpop.f32.mrb[0].mxu1 }
 0x16a   : > { %511 = vst [vmem:[#allocation3] sm:$0xff] %v508_v19  ;;  %v3132_v22 = vpop.f32.mrb[1].mxu1 }
 0x171   : > { %v517_v23 = vld [vmem:[#allocation3] sm:$0x1]  ;;  %v637_v44 = vld [vmem:[#allocation3 + $0x1] sm:$0x1]  ;;  %v757_v4 = vld [vmem:[#allocation3 + $0x2] sm:$0x1] }
 0x172   : > { %v591_v24 = vadd.f32 %v587_v21, %v517_v23 }
 0x174   : > { %3536 = vtanh.f32 %v591_v24  ;;  %v2942_v27 = vmul.f32 -1.442695, %v591_v24 }
 0x176   : > { %3538 = vpow2.f32 %v2942_v27 }
 0x17e   : > { %v3537_v25 = vpop.eup %3536 }
 0x17f   : > { %609 = vrot.lane.b32.xlu0 %v3537_v25, %s3877_s25 }
 0x180   : > { %v3539_v28 = vpop.eup %3538 }
 0x181   : > { %v595_v29 = vadd.f32 1.0, %v3539_v28 }
 0x183   : > { %604 = vrot.lane.b32.xlu0 %v2943_v26, %s3878_s29  ;;  %3540 = vrcp.f32 %v595_v29  ;;  %v877_v29 = vld [vmem:[#allocation3 + $0x3] sm:$0x1] }
 0x18d   : > { %v3541_v30 = vpop.eup %3540 }
 0x1f1   : > { %v610_v31 = vpop.permute.xlu0 %609 }
 0x1f2   : > { %v612_v32 = vmul.f32 %v3541_v30, %v610_v31 }
 0x1f4   : > { %614 = vrot.lane.b32.xlu1 %v612_v32, %s3878_s29 }
 0x1f5   : > { %v605_v33 = vpop.permute.xlu0 %604 }
 0x1f6   : > { %v607_v34 = vmul.f32 %v3541_v30, %v605_v33 }
 0x266   : > { %v615_v35 = vpop.permute.xlu1 %614 }
 0x267   : > { %v617_v36 = vadd.f32 %v615_v35, %v607_v34 }
 0x269   : > { %3542 = vtanh.f32 %v617_v36 }
 0x273   : > { %v3543_v37 = vpop.eup %3542 }
 0x274   : > { %620 = vrot.lane.b32.xlu1 %v3543_v37, %s3877_s25 }
 0x278   : > { %630 = vrot.lane.b32.xlu1 %v617_v36, %s3879_s23 }
 0x2e6   : > { %v621_v38 = vpop.permute.xlu1 %620 }
 0x2e7   : > { %v623_v39 = vmul.f32 %v3541_v30, %v621_v38 }
 0x2e9   : > { %625 = vrot.lane.b32.xlu0 %v623_v39, %s3878_s29 }
 0x2ea   : > { %v631_v40 = vpop.permute.xlu1 %630 }
 0x2eb   : > { %633 = vst.msk [vmem:[#allocation6] sm:$0x1] %vm512_vm1, %v631_v40 }
 0x2f2   : > { %v2946_v41 = vld [vmem:[#allocation6] ss:$0 sm:$0xff] }
 0x2f3   : > { %724 = vrot.lane.b32.xlu1 %v2946_v41, %s3878_s29 }
 0x35b   : > { %v626_v42 = vpop.permute.xlu0 %625 }
 0x35c   : > { %628 = vst.msk [vmem:[#allocation5] sm:$0x1] %vm512_vm1, %v626_v42  ;;  %634 = vst.msk [vmem:[#allocation4] sm:$0x1] %vm512_vm1, %v626_v42 }
 0x363   : > { %v635_v43 = vld [vmem:[#allocation5] sm:$0x1] }
 0x364   : > { %3142 = vmatmul.mubr.msk.f32.vlgmr.msra.gmra.mrb[2].mxu0 %vm420_vm2, %v635_v43 }
 0x365   : > { %3357 = vmatpush3.bf16.msra.mxu0 %v4164_v13  ;;  %3163 = vmatprep.mubr.msk.f32.mxu0 %vm3875_vm0, %v3876_v1  ;;  %v725_v55 = vpop.permute.xlu1 %724 }
 0x366   : > { %3358 = vmatprep.subr.bf16.mxu0 %v3874_v0 }
 0x369   : > { %3360 = vmatpush3.bf16.msra.mxu0 %v4168_v14 }
 0x36a   : > { %3367 = vmatprep.subr.bf16.mxu0 %v3874_v0 }
 0x437   : > { %v707_v45 = vpop.f32.mrb[2].mxu0 }
 0x438   : > { %v711_v46 = vadd.f32 %v707_v45, %v637_v44  ;;  %v3143_v47 = vpop.f32.mrb[3].mxu0 }
 0x43a   : > { %3544 = vtanh.f32 %v711_v46  ;;  %v2945_v49 = vmul.f32 -1.442695, %v711_v46 }
 0x43c   : > { %3546 = vpow2.f32 %v2945_v49 }
 0x444   : > { %v3545_v48 = vpop.eup %3544 }
 0x445   : > { %729 = vrot.lane.b32.xlu0 %v3545_v48, %s3877_s25 }
 0x446   : > { %v3547_v50 = vpop.eup %3546 }
 0x447   : > { %v715_v51 = vadd.f32 1.0, %v3547_v50 }
 0x449   : > { %3548 = vrcp.f32 %v715_v51  ;;  %v997_v51 = vld [vmem:[#allocation3 + $0x4] sm:$0x1] }
 0x453   : > { %v3549_v52 = vpop.eup %3548 }
 0x454   : > { %v727_v56 = vmul.f32 %v3549_v52, %v725_v55 }
 0x4b7   : > { %v730_v53 = vpop.permute.xlu0 %729 }
 0x4b8   : > { %v732_v54 = vmul.f32 %v3549_v52, %v730_v53 }
 0x4ba   : > { %734 = vrot.lane.b32.xlu0 %v732_v54, %s3878_s29 }
 0x52c   : > { %v735_v57 = vpop.permute.xlu0 %734 }
 0x52d   : > { %v737_v58 = vadd.f32 %v735_v57, %v727_v56 }
 0x52f   : > { %3550 = vtanh.f32 %v737_v58 }
 0x539   : > { %v3551_v59 = vpop.eup %3550 }
 0x53a   : > { %740 = vrot.lane.b32.xlu1 %v3551_v59, %s3877_s25 }
 0x53e   : > { %750 = vrot.lane.b32.xlu1 %v737_v58, %s3879_s23 }
 0x5ac   : > { %v741_v60 = vpop.permute.xlu1 %740 }
 0x5ad   : > { %v743_v61 = vmul.f32 %v3549_v52, %v741_v60 }
 0x5af   : > { %745 = vrot.lane.b32.xlu0 %v743_v61, %s3878_s29 }
 0x5b0   : > { %v751_v62 = vpop.permute.xlu1 %750 }
 0x5b1   : > { %753 = vst.msk [vmem:[#allocation6] sm:$0x1] %vm512_vm1, %v751_v62 }
 0x5b8   : > { %v2949_v63 = vld [vmem:[#allocation6] ss:$0 sm:$0xff] }
 0x5b9   : > { %844 = vrot.lane.b32.xlu1 %v2949_v63, %s3878_s29 }
 0x621   : > { %v746_v2 = vpop.permute.xlu0 %745 }
 0x622   : > { %748 = vst.msk [vmem:[#allocation5] sm:$0x1] %vm512_vm1, %v746_v2  ;;  %754 = vst.msk [vmem:[#allocation4 + $0x1] sm:$0x1] %vm512_vm1, %v746_v2 }
 0x629   : > { %v755_v3 = vld [vmem:[#allocation5] sm:$0x1] }
 0x62a   : > { %3153 = vmatmul.mubr.msk.f32.vlgmr.msra.gmra.mrb[2].mxu1 %vm420_vm2, %v755_v3 }
 0x62b   : > { %3363 = vmatpush3.bf16.msra.mxu1 %v4164_v13  ;;  %3174 = vmatprep.mubr.msk.f32.mxu1 %vm3875_vm0, %v3876_v1  ;;  %v845_v18 = vpop.permute.xlu1 %844 }
 0x62c   : > { %3364 = vmatprep.subr.bf16.mxu1 %v3874_v0 }
 0x62f   : > { %3366 = vmatpush3.bf16.msra.mxu1 %v4168_v14 }
 0x630   : > { %3373 = vmatprep.subr.bf16.mxu1 %v3874_v0 }
 0x6fd   : > { %v827_v5 = vpop.f32.mrb[2].mxu1 }
 0x6fe   : > { %v831_v6 = vadd.f32 %v827_v5, %v757_v4  ;;  %v3154_v7 = vpop.f32.mrb[3].mxu1 }
 0x700   : > { %3552 = vtanh.f32 %v831_v6  ;;  %v2948_v9 = vmul.f32 -1.442695, %v831_v6 }
 0x702   : > { %3554 = vpow2.f32 %v2948_v9 }
 0x70a   : > { %v3553_v8 = vpop.eup %3552 }
 0x70b   : > { %849 = vrot.lane.b32.xlu0 %v3553_v8, %s3877_s25 }
 0x70c   : > { %v3555_v10 = vpop.eup %3554 }
 0x70d   : > { %v835_v11 = vadd.f32 1.0, %v3555_v10 }
 0x70f   : > { %3556 = vrcp.f32 %v835_v11  ;;  %v1117_v11 = vld [vmem:[#allocation3 + $0x5] sm:$0x1] }
 0x719   : > { %v3557_v12 = vpop.eup %3556 }
 0x71a   : > { %v847_v19 = vmul.f32 %v3557_v12, %v845_v18 }
 0x77d   : > { %v850_v16 = vpop.permute.xlu0 %849 }
 0x77e   : > { %v852_v17 = vmul.f32 %v3557_v12, %v850_v16 }
 0x780   : > { %854 = vrot.lane.b32.xlu0 %v852_v17, %s3878_s29 }
 0x7f2   : > { %v855_v20 = vpop.permute.xlu0 %854 }
 0x7f3   : > { %v857_v21 = vadd.f32 %v855_v20, %v847_v19 }
 0x7f5   : > { %3558 = vtanh.f32 %v857_v21 }
 0x7ff   : > { %v3559_v22 = vpop.eup %3558 }
 0x800   : > { %860 = vrot.lane.b32.xlu1 %v3559_v22, %s3877_s25 }
 0x804   : > { %870 = vrot.lane.b32.xlu1 %v857_v21, %s3879_s23 }
 0x872   : > { %v861_v23 = vpop.permute.xlu1 %860 }
 0x873   : > { %v863_v24 = vmul.f32 %v3557_v12, %v861_v23 }
 0x875   : > { %865 = vrot.lane.b32.xlu0 %v863_v24, %s3878_s29 }
 0x876   : > { %v871_v25 = vpop.permute.xlu1 %870 }
 0x877   : > { %873 = vst.msk [vmem:[#allocation6] sm:$0x1] %vm512_vm1, %v871_v25 }
 0x87e   : > { %v2952_v26 = vld [vmem:[#allocation6] ss:$0 sm:$0xff] }
 0x87f   : > { %964 = vrot.lane.b32.xlu1 %v2952_v26, %s3878_s29 }
 0x8e7   : > { %v866_v27 = vpop.permute.xlu0 %865 }
 0x8e8   : > { %868 = vst.msk [vmem:[#allocation5] sm:$0x1] %vm512_vm1, %v866_v27  ;;  %874 = vst.msk [vmem:[#allocation4 + $0x2] sm:$0x1] %vm512_vm1, %v866_v27 }
 0x8ef   : > { %v875_v28 = vld [vmem:[#allocation5] sm:$0x1] }
 0x8f0   : > { %3164 = vmatmul.mubr.msk.f32.vlgmr.msra.gmra.mrb[4].mxu0 %vm420_vm2, %v875_v28 }
 0x8f1   : > { %3369 = vmatpush3.bf16.msra.mxu0 %v4164_v13  ;;  %3185 = vmatprep.mubr.msk.f32.mxu0 %vm3875_vm0, %v3876_v1  ;;  %v965_v40 = vpop.permute.xlu1 %964 }
 0x8f2   : > { %3370 = vmatprep.subr.bf16.mxu0 %v3874_v0 }
 0x8f5   : > { %3372 = vmatpush3.bf16.msra.mxu0 %v4168_v14 }
 0x8f6   : > { %3379 = vmatprep.subr.bf16.mxu0 %v3874_v0 }
 0x9c3   : > { %v947_v30 = vpop.f32.mrb[4].mxu0 }
 0x9c4   : > { %v951_v31 = vadd.f32 %v947_v30, %v877_v29  ;;  %v3165_v32 = vpop.f32.mrb[5].mxu0 }
 0x9c6   : > { %3560 = vtanh.f32 %v951_v31  ;;  %v2951_v34 = vmul.f32 -1.442695, %v951_v31 }
 0x9c8   : > { %3562 = vpow2.f32 %v2951_v34  ;;  %v1237_v34 = vld [vmem:[#allocation3 + $0x6] sm:$0x1] }
 0x9d0   : > { %v3561_v33 = vpop.eup %3560 }
 0x9d1   : > { %969 = vrot.lane.b32.xlu0 %v3561_v33, %s3877_s25 }
 0x9d2   : > { %v3563_v35 = vpop.eup %3562 }
 0x9d3   : > { %v955_v36 = vadd.f32 1.0, %v3563_v35 }
 0x9d5   : > { %3564 = vrcp.f32 %v955_v36 }
 0x9df   : > { %v3565_v37 = vpop.eup %3564 }
 0x9e0   : > { %v967_v41 = vmul.f32 %v3565_v37, %v965_v40 }
 0xa43   : > { %v970_v38 = vpop.permute.xlu0 %969 }
 0xa44   : > { %v972_v39 = vmul.f32 %v3565_v37, %v970_v38 }
 0xa46   : > { %974 = vrot.lane.b32.xlu0 %v972_v39, %s3878_s29 }
 0xab8   : > { %v975_v42 = vpop.permute.xlu0 %974 }
 0xab9   : > { %v977_v43 = vadd.f32 %v975_v42, %v967_v41 }
 0xabb   : > { %3566 = vtanh.f32 %v977_v43 }
 0xac5   : > { %v3567_v44 = vpop.eup %3566 }
 0xac6   : > { %980 = vrot.lane.b32.xlu1 %v3567_v44, %s3877_s25 }
 0xaca   : > { %990 = vrot.lane.b32.xlu1 %v977_v43, %s3879_s23 }
 0xb38   : > { %v981_v45 = vpop.permute.xlu1 %980 }
 0xb39   : > { %v983_v46 = vmul.f32 %v3565_v37, %v981_v45 }
 0xb3b   : > { %985 = vrot.lane.b32.xlu0 %v983_v46, %s3878_s29 }
 0xb3c   : > { %v991_v47 = vpop.permute.xlu1 %990 }
 0xb3d   : > { %993 = vst.msk [vmem:[#allocation6] sm:$0x1] %vm512_vm1, %v991_v47 }
 0xb44   : > { %v2955_v48 = vld [vmem:[#allocation6] ss:$0 sm:$0xff] }
 0xb45   : > { %1084 = vrot.lane.b32.xlu1 %v2955_v48, %s3878_s29 }
 0xbad   : > { %v986_v49 = vpop.permute.xlu0 %985 }
 0xbae   : > { %988 = vst.msk [vmem:[#allocation5] sm:$0x1] %vm512_vm1, %v986_v49  ;;  %994 = vst.msk [vmem:[#allocation4 + $0x3] sm:$0x1] %vm512_vm1, %v986_v49 }
 0xbb5   : > { %v995_v50 = vld [vmem:[#allocation5] sm:$0x1] }
 0xbb6   : > { %3175 = vmatmul.mubr.msk.f32.vlgmr.msra.gmra.mrb[4].mxu1 %vm420_vm2, %v995_v50 }
 0xbb7   : > { %3375 = vmatpush3.bf16.msra.mxu1 %v4164_v13  ;;  %3196 = vmatprep.mubr.msk.f32.mxu1 %vm3875_vm0, %v3876_v1  ;;  %v1085_v62 = vpop.permute.xlu1 %1084 }
 0xbb8   : > { %3376 = vmatprep.subr.bf16.mxu1 %v3874_v0 }
 0xbbb   : > { %3378 = vmatpush3.bf16.msra.mxu1 %v4168_v14 }
 0xbbc   : > { %3385 = vmatprep.subr.bf16.mxu1 %v3874_v0 }
 0xc89   : > { %v1067_v52 = vpop.f32.mrb[4].mxu1 }
 0xc8a   : > { %v1071_v53 = vadd.f32 %v1067_v52, %v997_v51  ;;  %v3176_v54 = vpop.f32.mrb[5].mxu1 }
 0xc8c   : > { %3568 = vtanh.f32 %v1071_v53  ;;  %v2954_v56 = vmul.f32 -1.442695, %v1071_v53 }
 0xc8e   : > { %3570 = vpow2.f32 %v2954_v56  ;;  %v1357_v56 = vld [vmem:[#allocation3 + $0x7] sm:$0x1] }
 0xc96   : > { %v3569_v55 = vpop.eup %3568 }
 0xc97   : > { %1089 = vrot.lane.b32.xlu0 %v3569_v55, %s3877_s25 }
 0xc98   : > { %v3571_v57 = vpop.eup %3570 }
 0xc99   : > { %v1075_v58 = vadd.f32 1.0, %v3571_v57 }
 0xc9b   : > { %3572 = vrcp.f32 %v1075_v58 }
 0xca5   : > { %v3573_v59 = vpop.eup %3572 }
 0xca6   : > { %v1087_v63 = vmul.f32 %v3573_v59, %v1085_v62 }
 0xd09   : > { %v1090_v60 = vpop.permute.xlu0 %1089 }
 0xd0a   : > { %v1092_v61 = vmul.f32 %v3573_v59, %v1090_v60 }
 0xd0c   : > { %1094 = vrot.lane.b32.xlu0 %v1092_v61, %s3878_s29 }
 0xd7e   : > { %v1095_v2 = vpop.permute.xlu0 %1094 }
 0xd7f   : > { %v1097_v3 = vadd.f32 %v1095_v2, %v1087_v63 }
 0xd81   : > { %3574 = vtanh.f32 %v1097_v3 }
 0xd8b   : > { %v3575_v4 = vpop.eup %3574 }
 0xd8c   : > { %1100 = vrot.lane.b32.xlu1 %v3575_v4, %s3877_s25 }
 0xd90   : > { %1110 = vrot.lane.b32.xlu1 %v1097_v3, %s3879_s23 }
 0xdfe   : > { %v1101_v5 = vpop.permute.xlu1 %1100 }
 0xdff   : > { %v1103_v6 = vmul.f32 %v3573_v59, %v1101_v5 }
 0xe01   : > { %1105 = vrot.lane.b32.xlu0 %v1103_v6, %s3878_s29 }
 0xe02   : > { %v1111_v7 = vpop.permute.xlu1 %1110 }
 0xe03   : > { %1113 = vst.msk [vmem:[#allocation6] sm:$0x1] %vm512_vm1, %v1111_v7 }
 0xe0a   : > { %v2958_v8 = vld [vmem:[#allocation6] ss:$0 sm:$0xff] }
 0xe0b   : > { %1204 = vrot.lane.b32.xlu1 %v2958_v8, %s3878_s29 }
 0xe73   : > { %v1106_v9 = vpop.permute.xlu0 %1105 }
 0xe74   : > { %1108 = vst.msk [vmem:[#allocation5] sm:$0x1] %vm512_vm1, %v1106_v9  ;;  %1114 = vst.msk [vmem:[#allocation4 + $0x4] sm:$0x1] %vm512_vm1, %v1106_v9 }
 0xe7b   : > { %v1115_v10 = vld [vmem:[#allocation5] sm:$0x1] }
 0xe7c   : > { %3186 = vmatmul.mubr.msk.f32.vlgmr.msra.gmra.mrb[6].mxu0 %vm420_vm2, %v1115_v10  ;;  %v1476_v10 = vld [vmem:[#allocation13] sm:$0xff] }
 0xe7d   : > { %3381 = vmatpush3.bf16.msra.mxu0 %v4164_v13  ;;  %3207 = vmatprep.mubr.msk.f32.mxu0 %vm3875_vm0, %v3876_v1 }
 0xe7e   : > { %3382 = vmatprep.subr.bf16.mxu0 %v3874_v0 }
 0xe81   : > { %3384 = vmatpush3.bf16.msra.mxu0 %v4168_v14  ;;  %v1205_v14 = vpop.permute.xlu1 %1204 }
 0xe82   : > { %3391 = vmatprep.subr.bf16.mxu0 %v3874_v0 }
 0xf4f   : > { %v1187_v12 = vpop.f32.mrb[6].mxu0 }
 0xf50   : > { %v1191_v16 = vadd.f32 %v1187_v12, %v1117_v11  ;;  %v3187_v17 = vpop.f32.mrb[7].mxu0  ;;  %v1477_v11 = vld [vmem:[#allocation13 + $0x8] sm:$0xff] }
 0xf51   : > { %v3386_v12 = vpack.c.bf16 %v1477_v11, %v1476_v10  ;;  %v1479_v17 = vld [vmem:[#allocation13 + $0x18] sm:$0xff] }
 0xf52   : > { %3576 = vtanh.f32 %v1191_v16  ;;  %v2957_v19 = vmul.f32 -1.442695, %v1191_v16  ;;  %v1478_v16 = vld [vmem:[#allocation13 + $0x10] sm:$0xff] }
 0xf54   : > { %3578 = vpow2.f32 %v2957_v19 }
 0xf5c   : > { %v3577_v18 = vpop.eup %3576 }
 0xf5d   : > { %1209 = vrot.lane.b32.xlu0 %v3577_v18, %s3877_s25  ;;  %v3389_v18 = vpack.c.bf16 %v1479_v17, %v1478_v16 }
 0xf5e   : > { %v3579_v13 = vpop.eup %3578 }
 0xf5f   : > { %v1195_v20 = vadd.f32 1.0, %v3579_v13 }
 0xf61   : > { %3580 = vrcp.f32 %v1195_v20 }
 0xf6b   : > { %v3581_v21 = vpop.eup %3580 }
 0xf6c   : > { %v1207_v24 = vmul.f32 %v3581_v21, %v1205_v14 }
 0xfcf   : > { %v1210_v22 = vpop.permute.xlu0 %1209 }
 0xfd0   : > { %v1212_v23 = vmul.f32 %v3581_v21, %v1210_v22  ;;  %v2965_v22 = vld [vmem:[%s4548_s5] ss:$0 sm:$0xff] }
 0xfd2   : > { %1214 = vrot.lane.b32.xlu0 %v1212_v23, %s3878_s29 }
0x1044   : > { %v1215_v25 = vpop.permute.xlu0 %1214 }
0x1045   : > { %v1217_v26 = vadd.f32 %v1215_v25, %v1207_v24 }
0x1047   : > { %3582 = vtanh.f32 %v1217_v26 }
0x1051   : > { %v3583_v27 = vpop.eup %3582 }
0x1052   : > { %1220 = vrot.lane.b32.xlu1 %v3583_v27, %s3877_s25 }
0x1056   : > { %1230 = vrot.lane.b32.xlu1 %v1217_v26, %s3879_s23 }
0x10c4   : > { %v1221_v28 = vpop.permute.xlu1 %1220 }
0x10c5   : > { %v1223_v29 = vmul.f32 %v3581_v21, %v1221_v28 }
0x10c7   : > { %1225 = vrot.lane.b32.xlu0 %v1223_v29, %s3878_s29 }
0x10c8   : > { %v1231_v30 = vpop.permute.xlu1 %1230 }
0x10c9   : > { %1233 = vst.msk [vmem:[#allocation6] sm:$0x1] %vm512_vm1, %v1231_v30 }
0x10d0   : > { %v2961_v31 = vld [vmem:[#allocation6] ss:$0 sm:$0xff] }
0x10d1   : > { %1324 = vrot.lane.b32.xlu1 %v2961_v31, %s3878_s29 }
0x1139   : > { %v1226_v32 = vpop.permute.xlu0 %1225 }
0x113a   : > { %1228 = vst.msk [vmem:[#allocation5] sm:$0x1] %vm512_vm1, %v1226_v32  ;;  %1234 = vst.msk [vmem:[#allocation4 + $0x5] sm:$0x1] %vm512_vm1, %v1226_v32 }
0x1141   : > { %v1235_v33 = vld [vmem:[#allocation5] sm:$0x1] }
0x1142   : > { %3197 = vmatmul.mubr.msk.f32.vlgmr.msra.gmra.mrb[6].mxu1 %vm420_vm2, %v1235_v33 }
0x1143   : > { %3218 = vmatprep.mubr.msk.f32.mxu1 %vm3875_vm0, %v3876_v1  ;;  %v1325_v45 = vpop.permute.xlu1 %1324  ;;  %3387 = vmatpush3.bf16.msra.mxu1 %v3386_v12 }
0x1144   : > { %3388 = vmatprep.subr.bf16.mxu1 %v3874_v0 }
0x1147   : > { %3390 = vmatpush3.bf16.msra.mxu1 %v3389_v18 }
0x1148   : > { %3397 = vmatprep.subr.bf16.mxu1 %v3874_v0 }
0x1215   : > { %v1307_v35 = vpop.f32.mrb[6].mxu1 }
0x1216   : > { %v1311_v36 = vadd.f32 %v1307_v35, %v1237_v34  ;;  %v3198_v37 = vpop.f32.mrb[7].mxu1 }
0x1217   : > { %v1600_v37 = vld [vmem:[#allocation10 + $0x20] sm:$0xff] }
0x1218   : > { %3584 = vtanh.f32 %v1311_v36  ;;  %v2960_v39 = vmul.f32 -1.442695, %v1311_v36 }
0x121a   : > { %3586 = vpow2.f32 %v2960_v39  ;;  %v1602_v39 = vld [vmem:[#allocation10 + $0x30] sm:$0xff] }
0x1222   : > { %v3585_v38 = vpop.eup %3584 }
0x1223   : > { %1329 = vrot.lane.b32.xlu0 %v3585_v38, %s3877_s25  ;;  %v1601_v38 = vld [vmem:[#allocation10 + $0x28] sm:$0xff] }
0x1224   : > { %v3587_v40 = vpop.eup %3586 }
0x1225   : > { %v1315_v41 = vadd.f32 1.0, %v3587_v40  ;;  %v3392_v40 = vpack.c.bf16 %v1601_v38, %v1600_v37 }
0x1227   : > { %3588 = vrcp.f32 %v1315_v41  ;;  %v1603_v41 = vld [vmem:[#allocation10 + $0x38] sm:$0xff] }
0x1231   : > { %v3589_v42 = vpop.eup %3588 }
0x1232   : > { %v1327_v46 = vmul.f32 %v3589_v42, %v1325_v45 }
0x1295   : > { %v1330_v43 = vpop.permute.xlu0 %1329 }
0x1296   : > { %v1332_v44 = vmul.f32 %v3589_v42, %v1330_v43  ;;  %v1606_v43 = vld [vmem:[#allocation12 + $0x28] sm:$0xff] }
0x1298   : > { %1334 = vrot.lane.b32.xlu0 %v1332_v44, %s3878_s29  ;;  %v1607_v44 = vld [vmem:[#allocation12 + $0x30] sm:$0xff] }
0x130a   : > { %v1335_v47 = vpop.permute.xlu0 %1334 }
0x130b   : > { %v1337_v48 = vadd.f32 %v1335_v47, %v1327_v46  ;;  %v1608_v46 = vld [vmem:[#allocation12 + $0x38] sm:$0xff] }
0x130c   : > { %v4324_v47 = vpack.c.bf16 %v1608_v46, %v1607_v44 }
0x130d   : > { %3590 = vtanh.f32 %v1337_v48 }
0x1317   : > { %v3591_v49 = vpop.eup %3590 }
0x1318   : > { %1340 = vrot.lane.b32.xlu1 %v3591_v49, %s3877_s25 }
0x131c   : > { %1350 = vrot.lane.b32.xlu1 %v1337_v48, %s3879_s23 }
0x138a   : > { %v1341_v50 = vpop.permute.xlu1 %1340 }
0x138b   : > { %v1343_v51 = vmul.f32 %v3589_v42, %v1341_v50  ;;  %v3395_v42 = vpack.c.bf16 %v1603_v41, %v1602_v39 }
0x138d   : > { %1345 = vrot.lane.b32.xlu0 %v1343_v51, %s3878_s29 }
0x138e   : > { %v1351_v52 = vpop.permute.xlu1 %1350 }
0x138f   : > { %1353 = vst.msk [vmem:[#allocation6] sm:$0x1] %vm512_vm1, %v1351_v52 }
0x1396   : > { %v2964_v53 = vld [vmem:[#allocation6] ss:$0 sm:$0xff] }
0x1397   : > { %1444 = vrot.lane.b32.xlu1 %v2964_v53, %s3878_s29 }
0x13ff   : > { %v1346_v54 = vpop.permute.xlu0 %1345 }
0x1400   : > { %1348 = vst.msk [vmem:[#allocation5] sm:$0x1] %vm512_vm1, %v1346_v54  ;;  %1354 = vst.msk [vmem:[#allocation4 + $0x6] sm:$0x1] %vm512_vm1, %v1346_v54  ;;  %v2968_v54 = vld [vmem:[%s4549_s6] ss:$0 sm:$0xff] }
0x1407   : > { %v1355_v55 = vld [vmem:[#allocation5] sm:$0x1] }
0x1408   : > { %3208 = vmatmul.mubr.msk.f32.vlgmr.msra.gmra.mrb[8].mxu0 %vm420_vm2, %v1355_v55 }
0x1409   : > { %3229 = vmatprep.mubr.msk.f32.mxu0 %vm3875_vm0, %v3876_v1  ;;  %v1445_v5 = vpop.permute.xlu1 %1444  ;;  %3393 = vmatpush3.bf16.msra.mxu0 %v3392_v40 }
0x140a   : > { %3394 = vmatprep.subr.bf16.mxu0 %v3874_v0 }
0x140d   : > { %3396 = vmatpush3.bf16.msra.mxu0 %v3395_v42 }
0x140e   : > { %3403 = vmatprep.subr.bf16.mxu0 %v3874_v0 }
0x14db   : > { %v1427_v57 = vpop.f32.mrb[8].mxu0 }
0x14dc   : > { %v1431_v58 = vadd.f32 %v1427_v57, %v1357_v56  ;;  %v3209_v59 = vpop.f32.mrb[9].mxu0  ;;  %v2969_v56 = vld [vmem:[%s4550_s7] ss:$0 sm:$0xff] }
0x14de   : > { %3592 = vtanh.f32 %v1431_v58  ;;  %v2963_v61 = vmul.f32 -1.442695, %v1431_v58 }
0x14e0   : > { %3594 = vpow2.f32 %v2963_v61 }
0x14e8   : > { %v3593_v60 = vpop.eup %3592 }
0x14e9   : > { %1449 = vrot.lane.b32.xlu0 %v3593_v60, %s3877_s25 }
0x14ea   : > { %v3595_v62 = vpop.eup %3594 }
0x14eb   : > { %v1435_v63 = vadd.f32 1.0, %v3595_v62  ;;  %v2971_v62 = vld [vmem:[%s4546_s3 + $0x1] ss:$0 sm:$0xff] }
0x14ed   : > { %3596 = vrcp.f32 %v1435_v63 }
0x14f7   : > { %v3597_v2 = vpop.eup %3596 }
0x14f8   : > { %v1447_v6 = vmul.f32 %v3597_v2, %v1445_v5 }
0x155b   : > { %v1450_v3 = vpop.permute.xlu0 %1449 }
0x155c   : > { %v1452_v4 = vmul.f32 %v3597_v2, %v1450_v3 }
0x155e   : > { %1454 = vrot.lane.b32.xlu0 %v1452_v4, %s3878_s29 }
0x15d0   : > { %v1455_v7 = vpop.permute.xlu0 %1454 }
0x15d1   : > { %v1457_v8 = vadd.f32 %v1455_v7, %v1447_v6 }
0x15d3   : > { %3598 = vtanh.f32 %v1457_v8 }
0x15dd   : > { %v3599_v9 = vpop.eup %3598 }
0x15de   : > { %1460 = vrot.lane.b32.xlu1 %v3599_v9, %s3877_s25 }
0x1650   : > { %v1461_v19 = vpop.permute.xlu1 %1460 }
0x1651   : > { %v1463_v13 = vmul.f32 %v3597_v2, %v1461_v19 }
0x1653   : > { %1465 = vrot.lane.b32.xlu0 %v1463_v13, %s3878_s29 }
0x16c5   : > { %v1466_v20 = vpop.permute.xlu0 %1465 }
0x16c6   : > { %1468 = vst.msk [vmem:[#allocation5] sm:$0x1] %vm512_vm1, %v1466_v20  ;;  %1474 = vst.msk [vmem:[#allocation4 + $0x7] sm:$0x1] %vm512_vm1, %v1466_v20 }
0x16c7   : > { %1692 = vst.msk [vmem:[#allocation5] sm:$0x1] %vm512_vm1, %v3876_v1 }
0x16cd   : > { %v1475_v21 = vld [vmem:[#allocation4] sm:$0xff] }
0x16ce   : > { %3219 = vmatmul.mubr.msk.f32.vlgmr.msra.gmra.mrb[8].mxu1 %vm420_vm2, %v1475_v21  ;;  %v1694_v48 = vld [vmem:[#allocation5] sm:$0x1] }
0x16cf   : > { %3240 = vmatprep.mubr.msk.f32.mxu1 %vm3875_vm0, %v3876_v1 }
0x17a1   : > { %v1556_v23 = vpop.f32.mrb[8].mxu1 }
0x17a2   : > { %v1557_v14 = vadd.f32 %v2965_v22, %v1556_v23  ;;  %v3220_v24 = vpop.f32.mrb[9].mxu1 }
0x17a4   : > { %v2967_v25 = vmul.f32 -1.442695, %v1557_v14 }
0x17a6   : > { %3600 = vpow2.f32 %v2967_v25 }
0x17b0   : > { %v3601_v26 = vpop.eup %3600 }
0x17b1   : > { %v1563_v27 = vadd.f32 1.0, %v3601_v26 }
0x17b3   : > { %3602 = vrcp.f32 %v1563_v27 }
0x17bd   : > { %v3603_v28 = vpop.eup %3602 }
0x17be   : > { %v1566_v29 = vmul.f32 %v3603_v28, %v1475_v21 }
0x17c0   : > { %v1567_v30 = vadd.f32 %v1566_v29, %v4172_v15  ;;  %v1605_v15 = vld [vmem:[#allocation12 + $0x20] sm:$0xff] }
0x17c1   : > { %v4321_v45 = vpack.c.bf16 %v1606_v43, %v1605_v15 }
0x17c2   : > { %v1570_v31 = vsel %vm420_vm2, %v1567_v30, 0.0 }
0x17c3   : > { %1571 = vadd.xlane.f32.xlu1 %v1570_v31  ;;  %3399 = vmatpush3.bf16.msra.mxu1 %v4321_v45 }
0x17c4   : > { %3400 = vmatprep.subr.bf16.mxu1 %v3874_v0 }
0x17c7   : > { %3402 = vmatpush3.bf16.msra.mxu1 %v4324_v47 }
0x17c8   : > { %3409 = vmatprep.subr.bf16.mxu1 %v3874_v0 }
0x17ca   : > { %3241 = vmatmul.mubr.msk.f32.vlgmr.msra.gmra.mrb[10].mxu1 %vm420_vm2, %v1694_v48 }
0x17cb   : > { %3411 = vmatpush3.bf16.msra.mxu1 %v4321_v45  ;;  %3262 = vmatprep.mubr.msk.f32.mxu1 %vm3875_vm0, %v3876_v1 }
0x17cc   : > { %3412 = vmatprep.subr.bf16.mxu1 %v3874_v0 }
0x17cf   : > { %3414 = vmatpush3.bf16.msra.mxu1 %v4324_v47 }
0x17d0   : > { %3421 = vmatprep.subr.bf16.mxu1 %v3874_v0 }
0x1850   : > { %v1572_v32 = vpop.xlane.xlu1 %1571 }
0x1851   : > { %v1574_v33 = vmul.f32 0.03125, %v1572_v32 }
0x1853   : > { %v1575_v34 = vsub.f32 %v1567_v30, %v1574_v33 }
0x1855   : > { %v1576_v35 = vmul.f32 %v1575_v34, %v1575_v34 }
0x1857   : > { %v1577_v36 = vsel %vm420_vm2, %v1576_v35, 0.0 }
0x1858   : > { %1578 = vadd.xlane.f32.xlu0 %v1577_v36 }
0x186e   : > { %1470 = vrot.lane.b32.xlu0 %v1457_v8, %s3879_s23 }
0x189d   : > { %v1766_v60 = vpop.f32.mrb[10].mxu1 }
0x189e   : > { %v3242_v61 = vpop.f32.mrb[11].mxu1 }
0x18e5   : > { %v1579_v49 = vpop.xlane.xlu0 %1578 }
0x18e6   : > { %v1580_v50 = vmul.f32 0.03125, %v1579_v49 }
0x18e8   : > { %v1581_v51 = vadd.f32 1e-05, %v1580_v50 }
0x18e9   : > { %v1471_v52 = vpop.permute.xlu0 %1470 }
0x18ea   : > { %3604 = vrsqrt.f32 %v1581_v51  ;;  %1473 = vst.msk [vmem:[#allocation6] sm:$0x1] %vm512_vm1, %v1471_v52 }
0x18eb   : > { %1693 = vst.msk [vmem:[#allocation6] sm:$0x1] %vm512_vm1, %v3876_v1 }
0x18f2   : > { %v2975_v7 = vld [vmem:[#allocation6] ss:$0 sm:$0xff] }
0x18f4   : > { %v3605_v53 = vpop.eup %3604 }
0x18f5   : > { %v1583_v55 = vmul.f32 %v3605_v53, %v1575_v34 }
0x18f7   : > { %v1590_v57 = vmul.f32 %v2968_v54, %v1583_v55 }
0x18f9   : > { %v1597_v58 = vadd.f32 %v2969_v56, %v1590_v57 }
0x18fb   : > { %1598 = vst.msk [vmem:[#allocation2] sm:$0xff] %vm420_vm2, %v1597_v58 }
0x1902   : > { %v4346_v59 = vld [vmem:[#allocation2] sm:$0xff] }
0x1903   : > { %3230 = vmatmul.mubr.msk.f32.vlgmr.msra.gmra.mrb[10].mxu0 %vm420_vm2, %v4346_v59 }
0x1904   : > { %3405 = vmatpush3.bf16.msra.mxu0 %v4321_v45  ;;  %3251 = vmatprep.mubr.msk.f32.mxu0 %vm3875_vm0, %v3876_v1 }
0x1905   : > { %3406 = vmatprep.subr.bf16.mxu0 %v3874_v0 }
0x1908   : > { %3408 = vmatpush3.bf16.msra.mxu0 %v4324_v47 }
0x1909   : > { %3415 = vmatprep.subr.bf16.mxu0 %v3874_v0 }
0x19d6   : > { %v1687_v63 = vpop.f32.mrb[10].mxu0 }
0x19d7   : > { %v1688_v2 = vadd.f32 %v2971_v62, %v1687_v63  ;;  %v3231_v3 = vpop.f32.mrb[11].mxu0 }
0x19d9   : > { %1691 = vst [vmem:[#allocation3] sm:$0xff] %v1688_v2 }
0x19e0   : > { %v1696_v4 = vld [vmem:[#allocation3] sm:$0x1]  ;;  %v1816_v26 = vld [vmem:[#allocation3 + $0x1] sm:$0x1]  ;;  %v1936_v49 = vld [vmem:[#allocation3 + $0x2] sm:$0x1] }
0x19e1   : > { %v1770_v5 = vadd.f32 %v1766_v60, %v1696_v4 }
0x19e3   : > { %3606 = vtanh.f32 %v1770_v5  ;;  %v2974_v8 = vmul.f32 -1.442695, %v1770_v5 }
0x19e5   : > { %3608 = vpow2.f32 %v2974_v8 }
0x19ed   : > { %v3607_v6 = vpop.eup %3606 }
0x19ee   : > { %1788 = vrot.lane.b32.xlu1 %v3607_v6, %s3877_s25 }
0x19ef   : > { %v3609_v9 = vpop.eup %3608 }
0x19f0   : > { %v1774_v10 = vadd.f32 1.0, %v3609_v9 }
0x19f2   : > { %1783 = vrot.lane.b32.xlu1 %v2975_v7, %s3878_s29  ;;  %3610 = vrcp.f32 %v1774_v10  ;;  %v2056_v10 = vld [vmem:[#allocation3 + $0x3] sm:$0x1] }
0x19fc   : > { %v3611_v11 = vpop.eup %3610 }
0x1a60   : > { %v1789_v12 = vpop.permute.xlu1 %1788 }
0x1a61   : > { %v1791_v16 = vmul.f32 %v3611_v11, %v1789_v12 }
0x1a63   : > { %1793 = vrot.lane.b32.xlu0 %v1791_v16, %s3878_s29 }
0x1a64   : > { %v1784_v17 = vpop.permute.xlu1 %1783 }
0x1a65   : > { %v1786_v18 = vmul.f32 %v3611_v11, %v1784_v17 }
0x1ad5   : > { %v1794_v19 = vpop.permute.xlu0 %1793 }
0x1ad6   : > { %v1796_v13 = vadd.f32 %v1794_v19, %v1786_v18 }
0x1ad8   : > { %3612 = vtanh.f32 %v1796_v13 }
0x1ae2   : > { %v3613_v20 = vpop.eup %3612 }
0x1ae3   : > { %1799 = vrot.lane.b32.xlu1 %v3613_v20, %s3877_s25 }
0x1ae7   : > { %1809 = vrot.lane.b32.xlu1 %v1796_v13, %s3879_s23 }
0x1b55   : > { %v1800_v21 = vpop.permute.xlu1 %1799 }
0x1b56   : > { %v1802_v22 = vmul.f32 %v3611_v11, %v1800_v21 }
0x1b58   : > { %1804 = vrot.lane.b32.xlu0 %v1802_v22, %s3878_s29 }
0x1b59   : > { %v1810_v23 = vpop.permute.xlu1 %1809 }
0x1b5a   : > { %1812 = vst.msk [vmem:[#allocation6] sm:$0x1] %vm512_vm1, %v1810_v23 }
0x1b61   : > { %v2978_v14 = vld [vmem:[#allocation6] ss:$0 sm:$0xff] }
0x1b62   : > { %1903 = vrot.lane.b32.xlu1 %v2978_v14, %s3878_s29 }
0x1bca   : > { %v1805_v24 = vpop.permute.xlu0 %1804 }
0x1bcb   : > { %1807 = vst.msk [vmem:[#allocation5] sm:$0x1] %vm512_vm1, %v1805_v24  ;;  %1813 = vst.msk [vmem:[#allocation4] sm:$0x1] %vm512_vm1, %v1805_v24 }
0x1bd2   : > { %v1814_v25 = vld [vmem:[#allocation5] sm:$0x1] }
0x1bd3   : > { %3252 = vmatmul.mubr.msk.f32.vlgmr.msra.gmra.mrb[12].mxu0 %vm420_vm2, %v1814_v25 }
0x1bd4   : > { %3417 = vmatpush3.bf16.msra.mxu0 %v4321_v45  ;;  %3273 = vmatprep.mubr.msk.f32.mxu0 %vm3875_vm0, %v3876_v1  ;;  %v1904_v37 = vpop.permute.xlu1 %1903 }
0x1bd5   : > { %3418 = vmatprep.subr.bf16.mxu0 %v3874_v0 }
0x1bd8   : > { %3420 = vmatpush3.bf16.msra.mxu0 %v4324_v47 }
0x1bd9   : > { %3427 = vmatprep.subr.bf16.mxu0 %v3874_v0 }
0x1ca6   : > { %v1886_v27 = vpop.f32.mrb[12].mxu0 }
0x1ca7   : > { %v1890_v28 = vadd.f32 %v1886_v27, %v1816_v26  ;;  %v3253_v29 = vpop.f32.mrb[13].mxu0 }
0x1ca9   : > { %3614 = vtanh.f32 %v1890_v28  ;;  %v2977_v31 = vmul.f32 -1.442695, %v1890_v28 }
0x1cab   : > { %3616 = vpow2.f32 %v2977_v31 }
0x1cb3   : > { %v3615_v30 = vpop.eup %3614 }
0x1cb4   : > { %1908 = vrot.lane.b32.xlu0 %v3615_v30, %s3877_s25 }
0x1cb5   : > { %v3617_v32 = vpop.eup %3616 }
0x1cb6   : > { %v1894_v33 = vadd.f32 1.0, %v3617_v32 }
0x1cb8   : > { %3618 = vrcp.f32 %v1894_v33  ;;  %v2176_v33 = vld [vmem:[#allocation3 + $0x4] sm:$0x1] }
0x1cc2   : > { %v3619_v34 = vpop.eup %3618 }
0x1cc3   : > { %v1906_v38 = vmul.f32 %v3619_v34, %v1904_v37 }
0x1d26   : > { %v1909_v35 = vpop.permute.xlu0 %1908 }
0x1d27   : > { %v1911_v36 = vmul.f32 %v3619_v34, %v1909_v35 }
0x1d29   : > { %1913 = vrot.lane.b32.xlu0 %v1911_v36, %s3878_s29 }
0x1d9b   : > { %v1914_v39 = vpop.permute.xlu0 %1913 }
0x1d9c   : > { %v1916_v40 = vadd.f32 %v1914_v39, %v1906_v38 }
0x1d9e   : > { %3620 = vtanh.f32 %v1916_v40 }
0x1da8   : > { %v3621_v41 = vpop.eup %3620 }
0x1da9   : > { %1919 = vrot.lane.b32.xlu1 %v3621_v41, %s3877_s25 }
0x1dad   : > { %1929 = vrot.lane.b32.xlu1 %v1916_v40, %s3879_s23 }
0x1e1b   : > { %v1920_v42 = vpop.permute.xlu1 %1919 }
0x1e1c   : > { %v1922_v15 = vmul.f32 %v3619_v34, %v1920_v42 }
0x1e1e   : > { %1924 = vrot.lane.b32.xlu0 %v1922_v15, %s3878_s29 }
0x1e1f   : > { %v1930_v43 = vpop.permute.xlu1 %1929 }
0x1e20   : > { %1932 = vst.msk [vmem:[#allocation6] sm:$0x1] %vm512_vm1, %v1930_v43 }
0x1e27   : > { %v2981_v44 = vld [vmem:[#allocation6] ss:$0 sm:$0xff] }
0x1e28   : > { %2023 = vrot.lane.b32.xlu1 %v2981_v44, %s3878_s29 }
0x1e90   : > { %v1925_v46 = vpop.permute.xlu0 %1924 }
0x1e91   : > { %1933 = vst.msk [vmem:[#allocation4 + $0x1] sm:$0x1] %vm512_vm1, %v1925_v46  ;;  %1927 = vst.msk [vmem:[#allocation5] sm:$0x1] %vm512_vm1, %v1925_v46 }
0x1e98   : > { %v1934_v48 = vld [vmem:[#allocation5] sm:$0x1] }
0x1e99   : > { %3263 = vmatmul.mubr.msk.f32.vlgmr.msra.gmra.mrb[12].mxu1 %vm420_vm2, %v1934_v48 }
0x1e9a   : > { %3423 = vmatpush3.bf16.msra.mxu1 %v4321_v45  ;;  %3284 = vmatprep.mubr.msk.f32.mxu1 %vm3875_vm0, %v3876_v1  ;;  %v2024_v61 = vpop.permute.xlu1 %2023 }
0x1e9b   : > { %3424 = vmatprep.subr.bf16.mxu1 %v3874_v0 }
0x1e9e   : > { %3426 = vmatpush3.bf16.msra.mxu1 %v4324_v47 }
0x1e9f   : > { %3433 = vmatprep.subr.bf16.mxu1 %v3874_v0 }
0x1f6c   : > { %v2006_v50 = vpop.f32.mrb[12].mxu1 }
0x1f6d   : > { %v2010_v51 = vadd.f32 %v2006_v50, %v1936_v49  ;;  %v3264_v52 = vpop.f32.mrb[13].mxu1 }
0x1f6f   : > { %3622 = vtanh.f32 %v2010_v51  ;;  %v2980_v54 = vmul.f32 -1.442695, %v2010_v51 }
0x1f71   : > { %3624 = vpow2.f32 %v2980_v54 }
0x1f79   : > { %v3623_v53 = vpop.eup %3622 }
0x1f7a   : > { %2028 = vrot.lane.b32.xlu0 %v3623_v53, %s3877_s25 }
0x1f7b   : > { %v3625_v55 = vpop.eup %3624 }
0x1f7c   : > { %v2014_v56 = vadd.f32 1.0, %v3625_v55 }
0x1f7e   : > { %3626 = vrcp.f32 %v2014_v56  ;;  %v2296_v56 = vld [vmem:[#allocation3 + $0x5] sm:$0x1] }
0x1f88   : > { %v3627_v57 = vpop.eup %3626 }
0x1f89   : > { %v2026_v62 = vmul.f32 %v3627_v57, %v2024_v61 }
0x1fec   : > { %v2029_v58 = vpop.permute.xlu0 %2028 }
0x1fed   : > { %v2031_v60 = vmul.f32 %v3627_v57, %v2029_v58 }
0x1fef   : > { %2033 = vrot.lane.b32.xlu0 %v2031_v60, %s3878_s29 }
0x2061   : > { %v2034_v63 = vpop.permute.xlu0 %2033 }
0x2062   : > { %v2036_v2 = vadd.f32 %v2034_v63, %v2026_v62 }
0x2064   : > { %3628 = vtanh.f32 %v2036_v2 }
0x206e   : > { %v3629_v3 = vpop.eup %3628 }
0x206f   : > { %2039 = vrot.lane.b32.xlu1 %v3629_v3, %s3877_s25 }
0x2073   : > { %2049 = vrot.lane.b32.xlu1 %v2036_v2, %s3879_s23 }
0x20e1   : > { %v2040_v4 = vpop.permute.xlu1 %2039 }
0x20e2   : > { %v2042_v5 = vmul.f32 %v3627_v57, %v2040_v4 }
0x20e4   : > { %2044 = vrot.lane.b32.xlu0 %v2042_v5, %s3878_s29 }
0x20e5   : > { %v2050_v6 = vpop.permute.xlu1 %2049 }
0x20e6   : > { %2052 = vst.msk [vmem:[#allocation6] sm:$0x1] %vm512_vm1, %v2050_v6 }
0x20ed   : > { %v2984_v7 = vld [vmem:[#allocation6] ss:$0 sm:$0xff] }
0x20ee   : > { %2143 = vrot.lane.b32.xlu1 %v2984_v7, %s3878_s29 }
0x2156   : > { %v2045_v8 = vpop.permute.xlu0 %2044 }
0x2157   : > { %2053 = vst.msk [vmem:[#allocation4 + $0x2] sm:$0x1] %vm512_vm1, %v2045_v8  ;;  %2047 = vst.msk [vmem:[#allocation5] sm:$0x1] %vm512_vm1, %v2045_v8 }
0x215e   : > { %v2054_v9 = vld [vmem:[#allocation5] sm:$0x1] }
0x215f   : > { %3274 = vmatmul.mubr.msk.f32.vlgmr.msra.gmra.mrb[14].mxu0 %vm420_vm2, %v2054_v9 }
0x2160   : > { %3429 = vmatpush3.bf16.msra.mxu0 %v4321_v45  ;;  %3295 = vmatprep.mubr.msk.f32.mxu0 %vm3875_vm0, %v3876_v1  ;;  %v2144_v23 = vpop.permute.xlu1 %2143 }
0x2161   : > { %3430 = vmatprep.subr.bf16.mxu0 %v3874_v0 }
0x2164   : > { %3432 = vmatpush3.bf16.msra.mxu0 %v4324_v47 }
0x2165   : > { %3439 = vmatprep.subr.bf16.mxu0 %v3874_v0 }
0x2232   : > { %v2126_v11 = vpop.f32.mrb[14].mxu0 }
0x2233   : > { %v2130_v12 = vadd.f32 %v2126_v11, %v2056_v10  ;;  %v3275_v16 = vpop.f32.mrb[15].mxu0 }
0x2235   : > { %3630 = vtanh.f32 %v2130_v12  ;;  %v2983_v18 = vmul.f32 -1.442695, %v2130_v12 }
0x2237   : > { %3632 = vpow2.f32 %v2983_v18  ;;  %v2416_v18 = vld [vmem:[#allocation3 + $0x6] sm:$0x1] }
0x223f   : > { %v3631_v17 = vpop.eup %3630 }
0x2240   : > { %2148 = vrot.lane.b32.xlu0 %v3631_v17, %s3877_s25 }
0x2241   : > { %v3633_v19 = vpop.eup %3632 }
0x2242   : > { %v2134_v13 = vadd.f32 1.0, %v3633_v19 }
0x2244   : > { %3634 = vrcp.f32 %v2134_v13 }
0x224e   : > { %v3635_v20 = vpop.eup %3634 }
0x224f   : > { %v2146_v14 = vmul.f32 %v3635_v20, %v2144_v23 }
0x22b2   : > { %v2149_v21 = vpop.permute.xlu0 %2148 }
0x22b3   : > { %v2151_v22 = vmul.f32 %v3635_v20, %v2149_v21 }
0x22b5   : > { %2153 = vrot.lane.b32.xlu0 %v2151_v22, %s3878_s29 }
0x2327   : > { %v2154_v24 = vpop.permute.xlu0 %2153 }
0x2328   : > { %v2156_v25 = vadd.f32 %v2154_v24, %v2146_v14 }
0x232a   : > { %3636 = vtanh.f32 %v2156_v25 }
0x2334   : > { %v3637_v26 = vpop.eup %3636 }
0x2335   : > { %2159 = vrot.lane.b32.xlu1 %v3637_v26, %s3877_s25 }
0x2339   : > { %2169 = vrot.lane.b32.xlu1 %v2156_v25, %s3879_s23 }
0x23a7   : > { %v2160_v27 = vpop.permute.xlu1 %2159 }
0x23a8   : > { %v2162_v28 = vmul.f32 %v3635_v20, %v2160_v27 }
0x23aa   : > { %2164 = vrot.lane.b32.xlu0 %v2162_v28, %s3878_s29 }
0x23ab   : > { %v2170_v29 = vpop.permute.xlu1 %2169 }
0x23ac   : > { %2172 = vst.msk [vmem:[#allocation6] sm:$0x1] %vm512_vm1, %v2170_v29 }
0x23b3   : > { %v2987_v30 = vld [vmem:[#allocation6] ss:$0 sm:$0xff] }
0x23b4   : > { %2263 = vrot.lane.b32.xlu1 %v2987_v30, %s3878_s29 }
0x241c   : > { %v2165_v31 = vpop.permute.xlu0 %2164 }
0x241d   : > { %2173 = vst.msk [vmem:[#allocation4 + $0x3] sm:$0x1] %vm512_vm1, %v2165_v31  ;;  %2167 = vst.msk [vmem:[#allocation5] sm:$0x1] %vm512_vm1, %v2165_v31 }
0x2424   : > { %v2174_v32 = vld [vmem:[#allocation5] sm:$0x1] }
0x2425   : > { %3285 = vmatmul.mubr.msk.f32.vlgmr.msra.gmra.mrb[14].mxu1 %vm420_vm2, %v2174_v32 }
0x2426   : > { %3435 = vmatpush3.bf16.msra.mxu1 %v4321_v45  ;;  %3306 = vmatprep.mubr.msk.f32.mxu1 %vm3875_vm0, %v3876_v1  ;;  %v2264_v43 = vpop.permute.xlu1 %2263 }
0x2427   : > { %3436 = vmatprep.subr.bf16.mxu1 %v3874_v0 }
0x242a   : > { %3438 = vmatpush3.bf16.msra.mxu1 %v4324_v47 }
0x242b   : > { %3445 = vmatprep.subr.bf16.mxu1 %v3874_v0 }
0x24f8   : > { %v2246_v34 = vpop.f32.mrb[14].mxu1 }
0x24f9   : > { %v2250_v35 = vadd.f32 %v2246_v34, %v2176_v33  ;;  %v3286_v36 = vpop.f32.mrb[15].mxu1 }
0x24fb   : > { %3638 = vtanh.f32 %v2250_v35  ;;  %v2986_v38 = vmul.f32 -1.442695, %v2250_v35 }
0x24fd   : > { %3640 = vpow2.f32 %v2986_v38 }
0x2505   : > { %v3639_v37 = vpop.eup %3638 }
0x2506   : > { %2268 = vrot.lane.b32.xlu0 %v3639_v37, %s3877_s25  ;;  %v2536_v37 = vld [vmem:[#allocation3 + $0x7] sm:$0x1] }
0x2507   : > { %v3641_v39 = vpop.eup %3640 }
0x2508   : > { %v2254_v40 = vadd.f32 1.0, %v3641_v39 }
0x250a   : > { %3642 = vrcp.f32 %v2254_v40 }
0x2514   : > { %v3643_v41 = vpop.eup %3642 }
0x2515   : > { %v2266_v44 = vmul.f32 %v3643_v41, %v2264_v43 }
0x2578   : > { %v2269_v42 = vpop.permute.xlu0 %2268 }
0x2579   : > { %v2271_v15 = vmul.f32 %v3643_v41, %v2269_v42 }
0x257b   : > { %2273 = vrot.lane.b32.xlu0 %v2271_v15, %s3878_s29 }
0x25ed   : > { %v2274_v46 = vpop.permute.xlu0 %2273 }
0x25ee   : > { %v2276_v48 = vadd.f32 %v2274_v46, %v2266_v44 }
0x25f0   : > { %3644 = vtanh.f32 %v2276_v48 }
0x25fa   : > { %v3645_v49 = vpop.eup %3644 }
0x25fb   : > { %2279 = vrot.lane.b32.xlu1 %v3645_v49, %s3877_s25 }
0x25ff   : > { %2289 = vrot.lane.b32.xlu1 %v2276_v48, %s3879_s23 }
0x266d   : > { %v2280_v50 = vpop.permute.xlu1 %2279 }
0x266e   : > { %v2282_v51 = vmul.f32 %v3643_v41, %v2280_v50 }
0x2670   : > { %2284 = vrot.lane.b32.xlu0 %v2282_v51, %s3878_s29 }
0x2671   : > { %v2290_v52 = vpop.permute.xlu1 %2289 }
0x2672   : > { %2292 = vst.msk [vmem:[#allocation6] sm:$0x1] %vm512_vm1, %v2290_v52 }
0x2679   : > { %v2990_v53 = vld [vmem:[#allocation6] ss:$0 sm:$0xff] }
0x267a   : > { %2383 = vrot.lane.b32.xlu1 %v2990_v53, %s3878_s29 }
0x26e2   : > { %v2285_v54 = vpop.permute.xlu0 %2284 }
0x26e3   : > { %2293 = vst.msk [vmem:[#allocation4 + $0x4] sm:$0x1] %vm512_vm1, %v2285_v54  ;;  %2287 = vst.msk [vmem:[#allocation5] sm:$0x1] %vm512_vm1, %v2285_v54  ;;  %v2656_v54 = vld [vmem:[#allocation13 + $0x20] sm:$0xff] }
0x26ea   : > { %v2294_v55 = vld [vmem:[#allocation5] sm:$0x1] }
0x26eb   : > { %3296 = vmatmul.mubr.msk.f32.vlgmr.msra.gmra.mrb[16].mxu0 %vm420_vm2, %v2294_v55  ;;  %v2657_v55 = vld [vmem:[#allocation13 + $0x28] sm:$0xff] }
0x26ec   : > { %3441 = vmatpush3.bf16.msra.mxu0 %v4321_v45  ;;  %3317 = vmatprep.mubr.msk.f32.mxu0 %vm3875_vm0, %v3876_v1  ;;  %v2384_v5 = vpop.permute.xlu1 %2383 }
0x26ed   : > { %3442 = vmatprep.subr.bf16.mxu0 %v3874_v0 }
0x26f0   : > { %3444 = vmatpush3.bf16.msra.mxu0 %v4324_v47 }
0x27be   : > { %v2366_v57 = vpop.f32.mrb[16].mxu0 }
0x27bf   : > { %v2370_v58 = vadd.f32 %v2366_v57, %v2296_v56  ;;  %v3297_v60 = vpop.f32.mrb[17].mxu0  ;;  %v2658_v56 = vld [vmem:[#allocation13 + $0x30] sm:$0xff]  ;;  %v3446_v57 = vpack.c.bf16 %v2657_v55, %v2656_v54 }
0x27c1   : > { %3646 = vtanh.f32 %v2370_v58  ;;  %v2989_v62 = vmul.f32 -1.442695, %v2370_v58  ;;  %v2659_v58 = vld [vmem:[#allocation13 + $0x38] sm:$0xff] }
0x27c2   : > { %v3449_v60 = vpack.c.bf16 %v2659_v58, %v2658_v56 }
0x27c3   : > { %3648 = vpow2.f32 %v2989_v62 }
0x27cb   : > { %v3647_v61 = vpop.eup %3646 }
0x27cc   : > { %2388 = vrot.lane.b32.xlu0 %v3647_v61, %s3877_s25 }
0x27cd   : > { %v3649_v63 = vpop.eup %3648 }
0x27ce   : > { %v2374_v2 = vadd.f32 1.0, %v3649_v63 }
0x27d0   : > { %3650 = vrcp.f32 %v2374_v2 }
0x27da   : > { %v3651_v45 = vpop.eup %3650 }
0x27db   : > { %v2386_v47 = vmul.f32 %v3651_v45, %v2384_v5 }
0x283e   : > { %v2389_v3 = vpop.permute.xlu0 %2388 }
0x283f   : > { %v2391_v4 = vmul.f32 %v3651_v45, %v2389_v3 }
0x2841   : > { %2393 = vrot.lane.b32.xlu0 %v2391_v4, %s3878_s29 }
0x28b3   : > { %v2394_v6 = vpop.permute.xlu0 %2393 }
0x28b4   : > { %v2396_v7 = vadd.f32 %v2394_v6, %v2386_v47 }
0x28b6   : > { %3652 = vtanh.f32 %v2396_v7 }
0x28c0   : > { %v3653_v8 = vpop.eup %3652 }
0x28c1   : > { %2399 = vrot.lane.b32.xlu1 %v3653_v8, %s3877_s25 }
0x28c5   : > { %2409 = vrot.lane.b32.xlu1 %v2396_v7, %s3879_s23 }
0x2933   : > { %v2400_v9 = vpop.permute.xlu1 %2399 }
0x2934   : > { %v2402_v10 = vmul.f32 %v3651_v45, %v2400_v9  ;;  %v2998_v45 = vld [vmem:[%s4548_s5 + $0x1] ss:$0 sm:$0xff] }
0x2936   : > { %2404 = vrot.lane.b32.xlu0 %v2402_v10, %s3878_s29 }
0x2937   : > { %v2410_v11 = vpop.permute.xlu1 %2409 }
0x2938   : > { %2412 = vst.msk [vmem:[#allocation6] sm:$0x1] %vm512_vm1, %v2410_v11 }
0x293f   : > { %v2993_v12 = vld [vmem:[#allocation6] ss:$0 sm:$0xff] }
0x2940   : > { %2503 = vrot.lane.b32.xlu1 %v2993_v12, %s3878_s29 }
0x29a8   : > { %v2405_v16 = vpop.permute.xlu0 %2404 }
0x29a9   : > { %2413 = vst.msk [vmem:[#allocation4 + $0x5] sm:$0x1] %vm512_vm1, %v2405_v16  ;;  %2407 = vst.msk [vmem:[#allocation5] sm:$0x1] %vm512_vm1, %v2405_v16 }
0x29b0   : > { %v2414_v17 = vld [vmem:[#allocation5] sm:$0x1] }
0x29b1   : > { %3307 = vmatmul.mubr.msk.f32.vlgmr.msra.gmra.mrb[16].mxu1 %vm420_vm2, %v2414_v17 }
0x29b2   : > { %3328 = vmatprep.mubr.msk.f32.mxu1 %vm3875_vm0, %v3876_v1  ;;  %v2504_v27 = vpop.permute.xlu1 %2503  ;;  %3447 = vmatpush3.bf16.msra.mxu1 %v3446_v57 }
0x29b3   : > { %3448 = vmatprep.subr.bf16.mxu1 %v3874_v0 }
0x29b6   : > { %3450 = vmatpush3.bf16.msra.mxu1 %v3449_v60 }
0x2a84   : > { %v2486_v19 = vpop.f32.mrb[16].mxu1 }
0x2a85   : > { %v2490_v13 = vadd.f32 %v2486_v19, %v2416_v18  ;;  %v3308_v20 = vpop.f32.mrb[17].mxu1 }
0x2a87   : > { %3654 = vtanh.f32 %v2490_v13  ;;  %v2992_v22 = vmul.f32 -1.442695, %v2490_v13 }
0x2a89   : > { %3656 = vpow2.f32 %v2992_v22  ;;  %v3003_v22 = vld [vmem:[%s4549_s6 + $0x1] ss:$0 sm:$0xff] }
0x2a91   : > { %v3655_v21 = vpop.eup %3654 }
0x2a92   : > { %2508 = vrot.lane.b32.xlu0 %v3655_v21, %s3877_s25 }
0x2a93   : > { %v3657_v23 = vpop.eup %3656 }
0x2a94   : > { %v2494_v14 = vadd.f32 1.0, %v3657_v23  ;;  %v3004_v23 = vld [vmem:[%s4550_s7 + $0x1] ss:$0 sm:$0xff] }
0x2a96   : > { %3658 = vrcp.f32 %v2494_v14 }
0x2aa0   : > { %v3659_v24 = vpop.eup %3658 }
0x2aa1   : > { %v2506_v1 = vmul.f32 %v3659_v24, %v2504_v27 }
0x2b04   : > { %v2509_v25 = vpop.permute.xlu0 %2508 }
0x2b05   : > { %v2511_v26 = vmul.f32 %v3659_v24, %v2509_v25 }
0x2b07   : > { %2513 = vrot.lane.b32.xlu0 %v2511_v26, %s3878_s29 }
0x2b79   : > { %v2514_v28 = vpop.permute.xlu0 %2513 }
0x2b7a   : > { %v2516_v29 = vadd.f32 %v2514_v28, %v2506_v1 }
0x2b7c   : > { %3660 = vtanh.f32 %v2516_v29 }
0x2b86   : > { %v3661_v30 = vpop.eup %3660 }
0x2b87   : > { %2519 = vrot.lane.b32.xlu1 %v3661_v30, %s3877_s25 }
0x2b8b   : > { %2529 = vrot.lane.b32.xlu1 %v2516_v29, %s3879_s23 }
0x2bf9   : > { %v2520_v31 = vpop.permute.xlu1 %2519 }
0x2bfa   : > { %v2522_v32 = vmul.f32 %v3659_v24, %v2520_v31 }
0x2bfc   : > { %2524 = vrot.lane.b32.xlu0 %v2522_v32, %s3878_s29 }
0x2bfd   : > { %v2530_v33 = vpop.permute.xlu1 %2529 }
0x2bfe   : > { %2532 = vst.msk [vmem:[#allocation6] sm:$0x1] %vm512_vm1, %v2530_v33 }
0x2c05   : > { %v2996_v34 = vld [vmem:[#allocation6] ss:$0 sm:$0xff] }
0x2c06   : > { %2623 = vrot.lane.b32.xlu1 %v2996_v34, %s3878_s29 }
0x2c6e   : > { %v2525_v35 = vpop.permute.xlu0 %2524 }
0x2c6f   : > { %2533 = vst.msk [vmem:[#allocation4 + $0x6] sm:$0x1] %vm512_vm1, %v2525_v35  ;;  %2527 = vst.msk [vmem:[#allocation5] sm:$0x1] %vm512_vm1, %v2525_v35 }
0x2c76   : > { %v2534_v36 = vld [vmem:[#allocation5] sm:$0x1] }
0x2c77   : > { %3318 = vmatmul.mubr.msk.f32.vlgmr.msra.gmra.mrb[18].mxu0 %vm420_vm2, %v2534_v36  ;;  %v3005_v36 = vld [vmem:[%s4551_s8] ss:$0 sm:$0xff] }
0x2c78   : > { %v2624_v49 = vpop.permute.xlu1 %2623 }
0x2d4a   : > { %v2606_v38 = vpop.f32.mrb[18].mxu0 }
0x2d4b   : > { %v2610_v39 = vadd.f32 %v2606_v38, %v2536_v37  ;;  %v3319_v40 = vpop.f32.mrb[19].mxu0  ;;  %v3006_v38 = vld [vmem:[%s4578_s24] ss:$0 sm:$0xff] }
0x2d4d   : > { %3662 = vtanh.f32 %v2610_v39  ;;  %v2995_v42 = vmul.f32 -1.442695, %v2610_v39 }
0x2d4f   : > { %3664 = vpow2.f32 %v2995_v42 }
0x2d57   : > { %v3663_v41 = vpop.eup %3662 }
0x2d58   : > { %2628 = vrot.lane.b32.xlu0 %v3663_v41, %s3877_s25 }
0x2d59   : > { %v3665_v15 = vpop.eup %3664 }
0x2d5a   : > { %v2614_v43 = vadd.f32 1.0, %v3665_v15 }
0x2d5c   : > { %3666 = vrcp.f32 %v2614_v43 }
0x2d66   : > { %v3667_v44 = vpop.eup %3666 }
0x2d67   : > { %v2626_v50 = vmul.f32 %v3667_v44, %v2624_v49 }
0x2dca   : > { %v2629_v46 = vpop.permute.xlu0 %2628 }
0x2dcb   : > { %v2631_v48 = vmul.f32 %v3667_v44, %v2629_v46 }
0x2dcd   : > { %2633 = vrot.lane.b32.xlu0 %v2631_v48, %s3878_s29 }
0x2e3f   : > { %v2634_v51 = vpop.permute.xlu0 %2633 }
0x2e40   : > { %v2636_v52 = vadd.f32 %v2634_v51, %v2626_v50 }
0x2e42   : > { %3668 = vtanh.f32 %v2636_v52 }
0x2e4c   : > { %v3669_v53 = vpop.eup %3668 }
0x2e4d   : > { %2639 = vrot.lane.b32.xlu1 %v3669_v53, %s3877_s25 }
0x2ebf   : > { %v2640_v61 = vpop.permute.xlu1 %2639 }
0x2ec0   : > { %v2642_v62 = vmul.f32 %v3667_v44, %v2640_v61 }
0x2ec2   : > { %2644 = vrot.lane.b32.xlu0 %v2642_v62, %s3878_s29  ;;  %s4579_s29 = sld [smem:[#allocation23_spill]] }
0x2ec8   : > { %s4498_s26 = scalar_lea.hbm %s4579_s29, %s3008_s18 }
0x2f34   : > { %v2645_v63 = vpop.permute.xlu0 %2644 }
0x2f35   : > { %2647 = vst.msk [vmem:[#allocation5] sm:$0x1] %vm512_vm1, %v2645_v63  ;;  %2653 = vst.msk [vmem:[#allocation4 + $0x7] sm:$0x1] %vm512_vm1, %v2645_v63 }
0x2f3c   : > { %v2654_v2 = vld [vmem:[#allocation4] sm:$0xff] }
0x2f3d   : > { %3329 = vmatmul.mubr.msk.f32.vlgmr.msra.gmra.mrb[18].mxu1 %vm420_vm2, %v2654_v2 }
0x3010   : > { %v2737_v3 = vpop.f32.mrb[18].mxu1 }
0x3011   : > { %v2738_v4 = vadd.f32 %v2998_v45, %v2737_v3  ;;  %v3330_v0 = vpop.f32.mrb[19].mxu1 }
0x3013   : > { %v3000_v5 = vmul.f32 -1.442695, %v2738_v4 }
0x3015   : > { %3670 = vpow2.f32 %v3000_v5 }
0x301f   : > { %v3671_v47 = vpop.eup %3670 }
0x3020   : > { %v2744_v6 = vadd.f32 1.0, %v3671_v47 }
0x3022   : > { %3672 = vrcp.f32 %v2744_v6 }
0x302c   : > { %v3673_v7 = vpop.eup %3672 }
0x302d   : > { %v2747_v8 = vmul.f32 %v3673_v7, %v2654_v2 }
0x302f   : > { %v2748_v9 = vadd.f32 %v2747_v8, %v4346_v59 }
0x3031   : > { %v2753_v10 = vsel %vm420_vm2, %v2748_v9, 0.0 }
0x3032   : > { %2754 = vadd.xlane.f32.xlu1 %v2753_v10 }
0x30bf   : > { %v2755_v11 = vpop.xlane.xlu1 %2754 }
0x30c0   : > { %v2756_v12 = vmul.f32 0.03125, %v2755_v11 }
0x30c2   : > { %v2757_v16 = vsub.f32 %v2748_v9, %v2756_v12 }
0x30c4   : > { %v2758_v17 = vmul.f32 %v2757_v16, %v2757_v16 }
0x30c6   : > { %v2759_v18 = vsel %vm420_vm2, %v2758_v17, 0.0 }
0x30c7   : > { %2760 = vadd.xlane.f32.xlu0 %v2759_v18 }
0x3154   : > { %v2761_v19 = vpop.xlane.xlu0 %2760 }
0x3155   : > { %v2762_v13 = vmul.f32 0.03125, %v2761_v19 }
0x3157   : > { %v2763_v20 = vadd.f32 1e-05, %v2762_v13 }
0x3159   : > { %3674 = vrsqrt.f32 %v2763_v20 }
0x3163   : > { %v3675_v21 = vpop.eup %3674 }
0x3164   : > { %v2765_v59 = vmul.f32 %v3675_v21, %v2757_v16 }
0x3166   : > { %v2772_v14 = vmul.f32 %v3003_v22, %v2765_v59 }
0x3168   : > { %v2779_v24 = vadd.f32 %v3004_v23, %v2772_v14 }
0x316a   : > { %2780 = vst.msk [vmem:[#allocation2] sm:$0xff] %vm420_vm2, %v2779_v24 }
0x3171   : > { %v2781_v25 = vld [vmem:[#allocation2] sm:$0xff] }
0x3172   : > { %v2784_v26 = vsel %vm420_vm2, %v2781_v25, 0.0 }
0x3173   : > { %2785 = vadd.xlane.f32.xlu0 %v2784_v26 }
0x3189   : > { %2649 = vrot.lane.b32.xlu0 %v2636_v52, %s3879_s23  ;;  %s3792_s23 = scalar_lea.vmem %s4500_s19, 128 }
0x318a   : > { %p3793_p10 = scmp.ne.s32.totalorder %s4500_s19, %s3792_s23  ;;  %p3800_p1 = scmp.lt.s32.totalorder %s3798_s12, %s3792_s23 }
0x318c   : > { %p3794_p3 = pnand %p3793_p10, %p4090_p5  ;;  %p3801_p2 = por %p3800_p1, %p3799_p12 }
0x318e   : > { %p3795_p7 = pneg %p3794_p3 }
0x3190   : > { %p3802_p4 = pnand %p3801_p2, %p3795_p7 }
0x3200   : > { %v2786_v27 = vpop.xlane.xlu0 %2785 }
0x3201   : > { %v2787_v1 = vmul.f32 0.03125, %v2786_v27 }
0x3203   : > { %v2788_v28 = vsub.f32 %v2781_v25, %v2787_v1 }
0x3204   : > { %v2650_v29 = vpop.permute.xlu0 %2649 }
0x3205   : > { %2652 = vst.msk [vmem:[#allocation6] sm:$0x1] %vm512_vm1, %v2650_v29  ;;  %v2789_v30 = vmul.f32 %v2788_v28, %v2788_v28 }
0x3207   : > { %v2790_v31 = vsel %vm420_vm2, %v2789_v30, 0.0 }
0x3208   : > { %2791 = vadd.xlane.f32.xlu1 %v2790_v31 }
0x3295   : > { %v2792_v32 = vpop.xlane.xlu1 %2791 }
0x3296   : > { %v2793_v33 = vmul.f32 0.03125, %v2792_v32 }
0x3298   : > { %v2794_v34 = vadd.f32 1e-05, %v2793_v33 }
0x329a   : > { %3676 = vrsqrt.f32 %v2794_v34 }
0x32a4   : > { %v3677_v35 = vpop.eup %3676 }
0x32a5   : > { %v2796_v37 = vmul.f32 %v3677_v35, %v2788_v28 }
0x32a7   : > { %v2803_v39 = vmul.f32 %v3005_v36, %v2796_v37 }
0x32a9   : > { %v2810_v40 = vadd.f32 %v3006_v38, %v2803_v39 }
0x32ab   : > { %2811 = vst.msk [vmem:[%s418_s28] sm:$0xff] %vm420_vm2, %v2810_v40 }
0x32ac   : > { %3805 = shalt.err (!%p3802_p4)
}
0x32ad   : > { %s3806_s9 = scalar_lea.hbm %s4498_s26, 128  ;;  %s3810_s24 = scalar_lea.hbm %s4579_s29, 256 }
0x32ae   : > { %p3807_p0 = scmp.ne.s32.totalorder %s4498_s26, %s3806_s9  ;;  %p3811_p8 = scmp.lt.u32.totalorder %s4498_s26, %s4579_s29 }
0x32af   : > { %p3812_p13 = scmp.lt.u32.totalorder %s3810_s24, %s3806_s9  ;;  %p3814_p10 = scmp.lt.u32.totalorder %s3806_s9, %s4498_s26 }
0x32b0   : > { %p3808_p9 = pnand %p3807_p0, %p4090_p5 }
0x32b1   : > { %p3813_p6 = por %p3812_p13, %p3811_p8 }
0x32b2   : > { %p3809_p11 = pneg %p3808_p9 }
0x32b3   : > { %p3815_p3 = por %p3814_p10, %p3813_p6 }
0x32b5   : > { %p3816_p7 = pnand %p3815_p3, %p3809_p11 }
0x32b7   : > { %3819 = shalt.err (!%p3816_p7)
}
0x32b8   : > { %3465 = dma.vmem_to_hbm [thread:$0]  (%p4090_p5), %s4500_s19, 128, %s4498_s26, %s2813_s30  }
0x32b9 PF: > { %s4580_s21 = sld [smem:[#allocation20_spill]]  ;;  %s4581_s25 = sld [smem:[#allocation21_spill]] }
0x32ba   : > { %p4583_p1 = scmp.ge.s32.totalorder %s3866_s16, 2 }
0x32bf   : > { %s2838_s23 = sand.u32 1, %s4580_s21   ;;  %p4582_p12 = scmp.ne.s32.totalorder %s4581_s25, 0 }
0x32c0   : > { %s2839_s17 = scalar_lea.sflag [#allocation9], %s2838_s23 }
0x32c1   : > { %p3482_p2 = pnand %p4583_p1, %p4582_p12 }
0x32c3   : > { %3849 = dma.done.wait (!%p3482_p2), %s2839_s17, 128  }
0x32c4   : > { %3851 = vsyncadd (!%p3482_p2), %s2839_s17, 4294967168  ;;  %s4584_s10 = smov %s4086_s13  ;;  %p25_p4 = scmp.ge.s32.totalorder %s4076_s22, 4  }
0x32c5   : > { %s4585_s13 = smov %s3858_s14  ;;  %s4586_s14 = smov %s3862_s15 }
0x32c6   : > { %s4587_s15 = smov %s4584_s10  ;;  %s4588_s16 = smov %s4076_s22 }
0x32c7   :  { %27 = sbr.rel (!%p25_p4) target bundleno = 10 (0xa), region = 124 }
0x32ce   :  { %2844 = vsyncpa [#allocation8], 1 }
0x32cf   :  { %2846 = vsyncpa [#allocation8 + $0x1], 1 }
0x32d0   :  { %2847 = vsyncpa [#allocation11], 1 }
0x32d1   :  { %2848 = vsyncpa [#allocation14], 1 }
0x32d2   :  { %2849 = vsyncpa [#allocation9], 1 }
0x32d3   :  { %2851 = vsyncpa [#allocation9 + $0x1], 1 }

</bundles_post_ra>
